<compile_context>
chip_gen: v5e
topology: v5e:2x2
jax: 0.10.0
libtpu: 0.0.40
codegen_flags: <defaults>
</compile_context>

<pallas_src>
import functools
import math

import jax
import jax.numpy as jnp
from jax.experimental import pallas as pl
from jax.experimental.pallas import tpu as pltpu


def _qconv_kernel(cw_ref, sw_ref, x_ref, o_ref, *,
                  kernel_size, pad_h, pad_w, out_h, out_w):
    # cw_ref / sw_ref : (n_qubits,) f32 in SMEM  -- cos(w_i), sin(w_i)
    # x_ref           : (Bt, C, H, W)  f32 in VMEM -- un-padded input block
    # o_ref           : (Bt, H, W)     f32 in VMEM -- channel-summed VQC map
    bt, c, h, w = x_ref.shape
    x = x_ref[...]

    # Two transcendental passes total (EUP), instead of one cos per tap.
    cosx = jnp.cos(x)
    sinx = jnp.sin(x)

    # In-kernel 'same' zero padding applied after the trig transform:
    # zero-padded pixel -> cos(0 + w) = cos(w)  <=>  cosx = 1, sinx = 0 at borders.
    if pad_w > 0:
        one_c = jnp.ones((bt, c, h, pad_w), jnp.float32)
        zer_c = jnp.zeros((bt, c, h, pad_w), jnp.float32)
        cosx = jnp.concatenate([one_c, cosx, one_c], axis=3)
        sinx = jnp.concatenate([zer_c, sinx, zer_c], axis=3)
    if pad_h > 0:
        wp = w + 2 * pad_w
        one_r = jnp.ones((bt, c, pad_h, wp), jnp.float32)
        zer_r = jnp.zeros((bt, c, pad_h, wp), jnp.float32)
        cosx = jnp.concatenate([one_r, cosx, one_r], axis=2)
        sinx = jnp.concatenate([zer_r, sinx, zer_r], axis=2)

    # Analytic <Z_0> of the ring-entangled circuit: qubit 0 drops out of the product.
    prod = None
    for p in range(kernel_size):
        for q in range(kernel_size):
            idx = p * kernel_size + q
            if idx == 0:
                continue
            cwin = cosx[:, :, p:p + out_h, q:q + out_w]   # static shifted windows of the
            swin = sinx[:, :, p:p + out_h, q:q + out_w]   # precomputed trig arrays
            tap = cw_ref[idx] * cwin - sw_ref[idx] * swin  # == cos(x_win + w_idx), VPU only
            prod = tap if prod is None else prod * tap     # first tap initializes prod

    # Channel reduction stays on the VPU (C is tiny; no MXU plumbing).
    o_ref[...] = jnp.sum(prod, axis=1).astype(o_ref.dtype)


def _vmem_tile_bytes(rows, cols, itemsize=4):
    # f32 VMEM tiling pads second-minor to 8 sublanes and minor to 128 lanes.
    return ((rows + 7) // 8) * 8 * ((cols + 127) // 128) * 128 * itemsize


def _choose_batch_tile(b, c, h, w, hp, wp, out_h, out_w):
    """Largest divisor of b that fits a conservative VMEM budget and keeps >=2 grid steps."""
    per_elem = (2 * c * _vmem_tile_bytes(h, w)            # input block, double-buffered
                + 2 * _vmem_tile_bytes(out_h, out_w)       # output block, double-buffered
                + 4 * c * _vmem_tile_bytes(hp, wp))        # cos/sin padded values + tap temps
    budget = 16 * 1024 * 1024   # conservative vs v7x's 32 MiB scoped / 64 MiB physical VMEM
    cap = max(1, budget // per_elem)
    if b >= 2:
        cap = min(cap, b // 2)  # >= 2 parallel grid steps so both v7x TensorCores get work
    bt = 1
    for d in range(1, b + 1):
        if b % d == 0 and d <= cap:
            bt = d
    return bt, per_elem


def qconv1(x, vqc_weights, output_filters, kernel_size=3, strides=1, padding='same',
           n_qlayers=1, qembed_type='angle', qlayer_type='basic'):
    """Pallas implementation of QCONV1.forward (strides=1, default VQC)."""
    # TODO(synk): strides > 1 (reference leaves skipped output positions as zeros) not implemented.
    # TODO(synk): n_qlayers > 1 / non-'angle' embedding / non-'basic' entangler have no
    #             closed-form expectation; would need in-kernel statevector simulation.
    assert strides == 1, "only strides=1 (module default) is implemented"
    assert n_qlayers == 1 and qembed_type == 'angle' and qlayer_type == 'basic', \
        "only the default VQC (1 basic entangler layer, angle embedding) is implemented"

    b, c, h, w = x.shape
    n_qubits = kernel_size ** 2
    if padding == 'same':
        assert kernel_size % 2 == 1, "'same' padding requires an odd kernel_size"
        h_pad = int(((h - 1) * strides - h + (kernel_size - 1) + 1) / 2)
        w_pad = int(((w - 1) * strides - w + (kernel_size - 1) + 1) / 2)
    else:
        h_pad = w_pad = 0
    out_h = int((h - (kernel_size - 1) + 2 * h_pad - 1) / strides + 1)
    out_w = int((w - (kernel_size - 1) + 2 * w_pad - 1) / strides + 1)
    hp, wp = h + 2 * h_pad, w + 2 * w_pad

    w_flat = vqc_weights.reshape(-1).astype(jnp.float32)
    assert w_flat.shape[0] == n_qubits, "weights must have kernel_size**2 entries per layer"
    cos_w = jnp.cos(w_flat)   # 9 scalars each, placed in SMEM
    sin_w = jnp.sin(w_flat)

    bt, per_elem = _choose_batch_tile(b, c, h, w, hp, wp, out_h, out_w)
    grid = (b // bt,)
    vmem_limit = int(min(32 * 1024 * 1024, max(4 * 1024 * 1024, 2 * bt * per_elem)))

    kernel = functools.partial(_qconv_kernel, kernel_size=kernel_size,
                               pad_h=h_pad, pad_w=w_pad, out_h=out_h, out_w=out_w)

    summed = pl.pallas_call(
        kernel,
        out_shape=jax.ShapeDtypeStruct((b, out_h, out_w), jnp.float32),
        grid_spec=pltpu.PrefetchScalarGridSpec(
            num_scalar_prefetch=0,
            grid=grid,
            in_specs=[
                pl.BlockSpec(memory_space=pltpu.MemorySpace.SMEM),     # cos(w)
                pl.BlockSpec(memory_space=pltpu.MemorySpace.SMEM),     # sin(w)
                pl.BlockSpec((bt, c, h, w), lambda i: (i, 0, 0, 0)),   # un-padded input block
            ],
            out_specs=pl.BlockSpec((bt, out_h, out_w), lambda i: (i, 0, 0)),
        ),
        compiler_params=pltpu.CompilerParams(
            dimension_semantics=("parallel",),
            vmem_limit_bytes=vmem_limit,
        ),
    )(cos_w, sin_w, x.astype(jnp.float32))

    # Every output filter of the reference module is identical: broadcast once in the
    # wrapper instead of writing F copies from the kernel.
    # TODO(synk): output last dim (W=16) is lane-sparse; a (B, H*W) lane-dense store layout
    #             would further speed stores but needs an in-kernel minor-dim reshape.
    return jnp.broadcast_to(summed[:, None], (b, output_filters, out_h, out_w))


def _ref_qconv(x, weights, output_filters, kernel_size=3):
    """Pure-JAX reference (direct cos(x+w) closed form), for correctness check."""
    b, c, h, w = x.shape
    pad = (kernel_size - 1) // 2
    xp = jnp.pad(x, ((0, 0), (0, 0), (pad, pad), (pad, pad)))
    wflat = weights.reshape(-1)
    prod = jnp.ones((b, c, h, w), jnp.float32)
    for p in range(kernel_size):
        for q in range(kernel_size):
            idx = p * kernel_size + q
            if idx == 0:
                continue
            prod = prod * jnp.cos(xp[:, :, p:p + h, q:q + w] + wflat[idx])
    s = prod.sum(axis=1)
    return jnp.broadcast_to(s[:, None], (b, output_filters, h, w))


if __name__ == "__main__":
    key = jax.random.PRNGKey(0)
    kx, kw = jax.random.split(key)

    B, C, H, W = 2, 4, 16, 16
    OUTPUT_FILTERS = 4
    KERNEL_SIZE = 3
    N_QLAYERS = 1
    N_QUBITS = KERNEL_SIZE ** 2

    x = jax.random.normal(kx, (B, C, H, W), dtype=jnp.float32)
    # Deterministic VQC weights (BasicEntanglerLayers shape: (n_layers, n_qubits)).
    vqc_weights = jax.random.uniform(kw, (N_QLAYERS, N_QUBITS), dtype=jnp.float32,
                                     minval=0.0, maxval=2.0 * math.pi)

    out = qconv1(x, vqc_weights, OUTPUT_FILTERS,
                 kernel_size=KERNEL_SIZE, strides=1, padding='same')
    out = jax.block_until_ready(out)

    ref = _ref_qconv(x, vqc_weights, OUTPUT_FILTERS, KERNEL_SIZE)
    assert out.shape == (B, OUTPUT_FILTERS, H, W), out.shape
    assert jnp.allclose(out, ref, atol=1e-4, rtol=1e-4), "mismatch vs JAX reference"

    print("KERNEL_OK")
</pallas_src>

<mosaic_0001>
module attributes {stable_mosaic.version = 11 : i64} {
  func.func @_qconv_kernel(%arg0: i32, %arg1: memref<9xf32, #tpu.memory_space<smem>>, %arg2: memref<9xf32, #tpu.memory_space<smem>>, %arg3: memref<1x4x16x16xf32, #tpu.memory_space<vmem>>, %arg4: memref<1x16x16xf32, #tpu.memory_space<vmem>>) attributes {dimension_semantics = [#tpu.dimension_semantics<parallel>], iteration_bounds = array<i64: 2>, scalar_prefetch = 0 : i64, scratch_operands = 0 : i64, tpu.core_type = #tpu.core_type<tc>, window_params = [{transform_indices = @transform_0, window_bounds = array<i64: 9>}, {transform_indices = @transform_1, window_bounds = array<i64: 9>}, {transform_indices = @transform_2, window_bounds = array<i64: 1, 4, 16, 16>}, {transform_indices = @transform_3, window_bounds = array<i64: 1, 16, 16>}]} {
    %c0 = arith.constant 0 : index
    %c0_0 = arith.constant 0 : index
    %c0_1 = arith.constant 0 : index
    %c0_2 = arith.constant 0 : index
    %0 = vector.load %arg3[%c0, %c0_0, %c0_1, %c0_2] : memref<1x4x16x16xf32, #tpu.memory_space<vmem>>, vector<1x4x16x16xf32>
    %1 = math.cos %0 : vector<1x4x16x16xf32>
    %2 = math.sin %0 : vector<1x4x16x16xf32>
    %cst = arith.constant 1.000000e+00 : f32
    %3 = vector.broadcast %cst : f32 to vector<1x4x16x1xf32>
    %cst_3 = arith.constant 0.000000e+00 : f32
    %4 = vector.broadcast %cst_3 : f32 to vector<1x4x16x1xf32>
    %5 = tpu.concatenate %3, %1, %3 in 3 : vector<1x4x16x1xf32>, vector<1x4x16x16xf32>, vector<1x4x16x1xf32> -> vector<1x4x16x18xf32>
    %6 = tpu.concatenate %4, %2, %4 in 3 : vector<1x4x16x1xf32>, vector<1x4x16x16xf32>, vector<1x4x16x1xf32> -> vector<1x4x16x18xf32>
    %cst_4 = arith.constant 1.000000e+00 : f32
    %7 = vector.broadcast %cst_4 : f32 to vector<1x4x1x18xf32>
    %cst_5 = arith.constant 0.000000e+00 : f32
    %8 = vector.broadcast %cst_5 : f32 to vector<1x4x1x18xf32>
    %9 = tpu.concatenate %7, %5, %7 in 2 : vector<1x4x1x18xf32>, vector<1x4x16x18xf32>, vector<1x4x1x18xf32> -> vector<1x4x18x18xf32>
    %10 = tpu.concatenate %8, %6, %8 in 2 : vector<1x4x1x18xf32>, vector<1x4x16x18xf32>, vector<1x4x1x18xf32> -> vector<1x4x18x18xf32>
    %11 = vector.extract_strided_slice %9 {offsets = [0, 0, 0, 1], sizes = [1, 4, 16, 16], strides = [1, 1, 1, 1]} : vector<1x4x18x18xf32> to vector<1x4x16x16xf32>
    %12 = vector.extract_strided_slice %10 {offsets = [0, 0, 0, 1], sizes = [1, 4, 16, 16], strides = [1, 1, 1, 1]} : vector<1x4x18x18xf32> to vector<1x4x16x16xf32>
    %c1 = arith.constant 1 : index
    %13 = memref.load %arg1[%c1] : memref<9xf32, #tpu.memory_space<smem>>
    %14 = vector.broadcast %13 : f32 to vector<1x4x16x16xf32>
    %15 = arith.mulf %14, %11 : vector<1x4x16x16xf32>
    %c1_6 = arith.constant 1 : index
    %16 = memref.load %arg2[%c1_6] : memref<9xf32, #tpu.memory_space<smem>>
    %17 = vector.broadcast %16 : f32 to vector<1x4x16x16xf32>
    %18 = arith.mulf %17, %12 : vector<1x4x16x16xf32>
    %19 = arith.subf %15, %18 : vector<1x4x16x16xf32>
    %20 = vector.extract_strided_slice %9 {offsets = [0, 0, 0, 2], sizes = [1, 4, 16, 16], strides = [1, 1, 1, 1]} : vector<1x4x18x18xf32> to vector<1x4x16x16xf32>
    %21 = vector.extract_strided_slice %10 {offsets = [0, 0, 0, 2], sizes = [1, 4, 16, 16], strides = [1, 1, 1, 1]} : vector<1x4x18x18xf32> to vector<1x4x16x16xf32>
    %c2 = arith.constant 2 : index
    %22 = memref.load %arg1[%c2] : memref<9xf32, #tpu.memory_space<smem>>
    %23 = vector.broadcast %22 : f32 to vector<1x4x16x16xf32>
    %24 = arith.mulf %23, %20 : vector<1x4x16x16xf32>
    %c2_7 = arith.constant 2 : index
    %25 = memref.load %arg2[%c2_7] : memref<9xf32, #tpu.memory_space<smem>>
    %26 = vector.broadcast %25 : f32 to vector<1x4x16x16xf32>
    %27 = arith.mulf %26, %21 : vector<1x4x16x16xf32>
    %28 = arith.subf %24, %27 : vector<1x4x16x16xf32>
    %29 = arith.mulf %19, %28 : vector<1x4x16x16xf32>
    %30 = vector.extract_strided_slice %9 {offsets = [0, 0, 1, 0], sizes = [1, 4, 16, 16], strides = [1, 1, 1, 1]} : vector<1x4x18x18xf32> to vector<1x4x16x16xf32>
    %31 = vector.extract_strided_slice %10 {offsets = [0, 0, 1, 0], sizes = [1, 4, 16, 16], strides = [1, 1, 1, 1]} : vector<1x4x18x18xf32> to vector<1x4x16x16xf32>
    %c3 = arith.constant 3 : index
    %32 = memref.load %arg1[%c3] : memref<9xf32, #tpu.memory_space<smem>>
    %33 = vector.broadcast %32 : f32 to vector<1x4x16x16xf32>
    %34 = arith.mulf %33, %30 : vector<1x4x16x16xf32>
    %c3_8 = arith.constant 3 : index
    %35 = memref.load %arg2[%c3_8] : memref<9xf32, #tpu.memory_space<smem>>
    %36 = vector.broadcast %35 : f32 to vector<1x4x16x16xf32>
    %37 = arith.mulf %36, %31 : vector<1x4x16x16xf32>
    %38 = arith.subf %34, %37 : vector<1x4x16x16xf32>
    %39 = arith.mulf %29, %38 : vector<1x4x16x16xf32>
    %40 = vector.extract_strided_slice %9 {offsets = [0, 0, 1, 1], sizes = [1, 4, 16, 16], strides = [1, 1, 1, 1]} : vector<1x4x18x18xf32> to vector<1x4x16x16xf32>
    %41 = vector.extract_strided_slice %10 {offsets = [0, 0, 1, 1], sizes = [1, 4, 16, 16], strides = [1, 1, 1, 1]} : vector<1x4x18x18xf32> to vector<1x4x16x16xf32>
    %c4 = arith.constant 4 : index
    %42 = memref.load %arg1[%c4] : memref<9xf32, #tpu.memory_space<smem>>
    %43 = vector.broadcast %42 : f32 to vector<1x4x16x16xf32>
    %44 = arith.mulf %43, %40 : vector<1x4x16x16xf32>
    %c4_9 = arith.constant 4 : index
    %45 = memref.load %arg2[%c4_9] : memref<9xf32, #tpu.memory_space<smem>>
    %46 = vector.broadcast %45 : f32 to vector<1x4x16x16xf32>
    %47 = arith.mulf %46, %41 : vector<1x4x16x16xf32>
    %48 = arith.subf %44, %47 : vector<1x4x16x16xf32>
    %49 = arith.mulf %39, %48 : vector<1x4x16x16xf32>
    %50 = vector.extract_strided_slice %9 {offsets = [0, 0, 1, 2], sizes = [1, 4, 16, 16], strides = [1, 1, 1, 1]} : vector<1x4x18x18xf32> to vector<1x4x16x16xf32>
    %51 = vector.extract_strided_slice %10 {offsets = [0, 0, 1, 2], sizes = [1, 4, 16, 16], strides = [1, 1, 1, 1]} : vector<1x4x18x18xf32> to vector<1x4x16x16xf32>
    %c5 = arith.constant 5 : index
    %52 = memref.load %arg1[%c5] : memref<9xf32, #tpu.memory_space<smem>>
    %53 = vector.broadcast %52 : f32 to vector<1x4x16x16xf32>
    %54 = arith.mulf %53, %50 : vector<1x4x16x16xf32>
    %c5_10 = arith.constant 5 : index
    %55 = memref.load %arg2[%c5_10] : memref<9xf32, #tpu.memory_space<smem>>
    %56 = vector.broadcast %55 : f32 to vector<1x4x16x16xf32>
    %57 = arith.mulf %56, %51 : vector<1x4x16x16xf32>
    %58 = arith.subf %54, %57 : vector<1x4x16x16xf32>
    %59 = arith.mulf %49, %58 : vector<1x4x16x16xf32>
    %60 = vector.extract_strided_slice %9 {offsets = [0, 0, 2, 0], sizes = [1, 4, 16, 16], strides = [1, 1, 1, 1]} : vector<1x4x18x18xf32> to vector<1x4x16x16xf32>
    %61 = vector.extract_strided_slice %10 {offsets = [0, 0, 2, 0], sizes = [1, 4, 16, 16], strides = [1, 1, 1, 1]} : vector<1x4x18x18xf32> to vector<1x4x16x16xf32>
    %c6 = arith.constant 6 : index
    %62 = memref.load %arg1[%c6] : memref<9xf32, #tpu.memory_space<smem>>
    %63 = vector.broadcast %62 : f32 to vector<1x4x16x16xf32>
    %64 = arith.mulf %63, %60 : vector<1x4x16x16xf32>
    %c6_11 = arith.constant 6 : index
    %65 = memref.load %arg2[%c6_11] : memref<9xf32, #tpu.memory_space<smem>>
    %66 = vector.broadcast %65 : f32 to vector<1x4x16x16xf32>
    %67 = arith.mulf %66, %61 : vector<1x4x16x16xf32>
    %68 = arith.subf %64, %67 : vector<1x4x16x16xf32>
    %69 = arith.mulf %59, %68 : vector<1x4x16x16xf32>
    %70 = vector.extract_strided_slice %9 {offsets = [0, 0, 2, 1], sizes = [1, 4, 16, 16], strides = [1, 1, 1, 1]} : vector<1x4x18x18xf32> to vector<1x4x16x16xf32>
    %71 = vector.extract_strided_slice %10 {offsets = [0, 0, 2, 1], sizes = [1, 4, 16, 16], strides = [1, 1, 1, 1]} : vector<1x4x18x18xf32> to vector<1x4x16x16xf32>
    %c7 = arith.constant 7 : index
    %72 = memref.load %arg1[%c7] : memref<9xf32, #tpu.memory_space<smem>>
    %73 = vector.broadcast %72 : f32 to vector<1x4x16x16xf32>
    %74 = arith.mulf %73, %70 : vector<1x4x16x16xf32>
    %c7_12 = arith.constant 7 : index
    %75 = memref.load %arg2[%c7_12] : memref<9xf32, #tpu.memory_space<smem>>
    %76 = vector.broadcast %75 : f32 to vector<1x4x16x16xf32>
    %77 = arith.mulf %76, %71 : vector<1x4x16x16xf32>
    %78 = arith.subf %74, %77 : vector<1x4x16x16xf32>
    %79 = arith.mulf %69, %78 : vector<1x4x16x16xf32>
    %80 = vector.extract_strided_slice %9 {offsets = [0, 0, 2, 2], sizes = [1, 4, 16, 16], strides = [1, 1, 1, 1]} : vector<1x4x18x18xf32> to vector<1x4x16x16xf32>
    %81 = vector.extract_strided_slice %10 {offsets = [0, 0, 2, 2], sizes = [1, 4, 16, 16], strides = [1, 1, 1, 1]} : vector<1x4x18x18xf32> to vector<1x4x16x16xf32>
    %c8 = arith.constant 8 : index
    %82 = memref.load %arg1[%c8] : memref<9xf32, #tpu.memory_space<smem>>
    %83 = vector.broadcast %82 : f32 to vector<1x4x16x16xf32>
    %84 = arith.mulf %83, %80 : vector<1x4x16x16xf32>
    %c8_13 = arith.constant 8 : index
    %85 = memref.load %arg2[%c8_13] : memref<9xf32, #tpu.memory_space<smem>>
    %86 = vector.broadcast %85 : f32 to vector<1x4x16x16xf32>
    %87 = arith.mulf %86, %81 : vector<1x4x16x16xf32>
    %88 = arith.subf %84, %87 : vector<1x4x16x16xf32>
    %89 = arith.mulf %79, %88 : vector<1x4x16x16xf32>
    %cst_14 = arith.constant dense<0.000000e+00> : vector<1x16x16xf32>
    %90 = vector.multi_reduction <add>, %89, %cst_14 [1] : vector<1x4x16x16xf32> to vector<1x16x16xf32>
    %c0_15 = arith.constant 0 : index
    %c0_16 = arith.constant 0 : index
    %c0_17 = arith.constant 0 : index
    %91 = vector.load %arg4[%c0_15, %c0_16, %c0_17] : memref<1x16x16xf32, #tpu.memory_space<vmem>>, vector<1x16x16xf32>
    tpu.vector_store %arg4[%c0_15, %c0_16, %c0_17], %90 {strides = array<i32>} : memref<1x16x16xf32, #tpu.memory_space<vmem>>, vector<1x16x16xf32>,
    return
  }
  func.func @transform_0(%arg0: i32) -> i32 {
    %c0_i32 = arith.constant 0 : i32
    %c0_i32_0 = arith.constant 0 : i32
    return %c0_i32 : i32
  }
  func.func @transform_1(%arg0: i32) -> i32 {
    %c0_i32 = arith.constant 0 : i32
    %c0_i32_0 = arith.constant 0 : i32
    return %c0_i32 : i32
  }
  func.func @transform_2(%arg0: i32) -> (i32, i32, i32, i32) {
    %c0_i32 = arith.constant 0 : i32
    %c0_i32_0 = arith.constant 0 : i32
    %c0_i32_1 = arith.constant 0 : i32
    %c0_i32_2 = arith.constant 0 : i32
    return %arg0, %c0_i32, %c0_i32_0, %c0_i32_1 : i32, i32, i32, i32
  }
  func.func @transform_3(%arg0: i32) -> (i32, i32, i32) {
    %c0_i32 = arith.constant 0 : i32
    %c0_i32_0 = arith.constant 0 : i32
    %c0_i32_1 = arith.constant 0 : i32
    return %arg0, %c0_i32, %c0_i32_0 : i32, i32, i32
  }
}

</mosaic_0001>

<bundles_post_ra>
// kernel: tpu_custom_call.1
= control target key start
LH: loop header
LB: loop body
LE: loop exit
PB: predicated region body
PF: predicated region fallthrough
CT: control target
= control target key end

     0   :  { %s6097_s0 = inlined_call_operand.hbm [shape: f32[9], index: 0, kind: input, shape index: {}]   ;;  %s6098_s1 = inlined_call_operand.hbm [shape: f32[9], index: 1, kind: input, shape index: {}]   ;;  %s6099_s2 = inlined_call_operand.hbm [shape: f32[2,4,16,16], index: 2, kind: input, shape index: {}]   ;;  %s6100_s3 = inlined_call_operand.hbm [shape: f32[2,16,16], index: 3, kind: output, shape index: {}]  }
   0x1   :  { %6154 = sst [smem:[#allocation37_spill]] %s6097_s0 }
   0x2   :  { %8 = vsyncpa [#allocation5], 0 }
   0x3   :  { %9 = vsyncpa [#allocation7], 0 }
   0x4   :  { %10 = vsyncpa [#allocation3], 0 }
   0x5   :  { %12 = vsyncpa [#allocation3 + $0x1], 0 }
   0x6   :  { %13 = vsyncpa [#allocation4], 0 }
   0x7   :  { %15 = vsyncpa [#allocation4 + $0x1], 0  ;;  %s4040_s12 = smov 0   ;;  %s4042_s13 = smov 0  }
   0x8   :  { %s4044_s14 = smov 0   ;;  %s4046_s15 = smov 0  }
   0x9 LB: > { %s4061_s16 = sadd.s32 4294967295, %s4003_s15   ;;  %s3704_s17 = sadd.s32 4294967294, %s4003_s15   ;;  %s4003_s15 = sphi %s4046_s15, %s6259_s15   ;;  %s3999_s14 = sphi %s4044_s14, %s6258_s14   ;;  %s3995_s13 = sphi %s4042_s13, %s6257_s13   ;;  %s3991_s12 = sphi %s4040_s12, %s6256_s12  }
   0xa   : > { %s4065_s18 = sadd.s32 1, %s4003_s15   ;;  %s70_s19 = sadd.s32 1, %s3999_s14 }
   0xb   : > { %s67_s20 = ssub.s32 %s4003_s15, %s4065_s18  ;;  %p77_p0 = scmp.ne.s32.totalorder %s3999_s14, %s3995_s13 }
   0xc   : > { %p68_p1 = scmp.eq.s32.totalorder %s67_s20, 0  ;;  %p78_p2 = scmp.eq.s32.totalorder %s4003_s15, 0 }
   0xd   : > { %p83_p3 = scmp.ne.s32.totalorder %s3995_s13, %s3991_s12  ;;  %p84_p4 = scmp.eq.s32.totalorder %s4061_s16, 0 }
   0xe   : > { %s4077_s21 = scalar_select %p68_p1, %s3999_s14, %s70_s19  }
   0xf   : > { %p4079_p5 = por %p78_p2, %p77_p0  ;;  %p4085_p6 = por %p84_p4, %p83_p3 }
  0x10   : > { %p107_p7 = scmp.eq.s32.totalorder %s4061_s16, 1  ;;  %p113_p8 = scmp.eq.s32.totalorder %s3704_s17, 1 }
  0x11   : > { %p3705_p9 = scmp.ge.s32.totalorder %s4003_s15, 1  ;;  %p120_p10 = scmp.lt.s32.totalorder %s4003_s15, 3 }
  0x12   : > { %p4092_p11 = por %p107_p7, %p77_p0  ;;  %p4096_p12 = por %p113_p8, %p83_p3 }
  0x13   : > { %p4100_p13 = pnand %p3705_p9, %p120_p10  ;;  %s6160_s0 = sld [smem:[#allocation37_spill]] }
  0x14   : > { %p3817_p2 = scmp.lt.s32.totalorder %s4003_s15, 2  ;;  %s142_s5 = sshll.u32 %s6098_s1, 4  ;;  %s143_s5 = int_to_ptr.hbm [resolvable:$true] %s142_s5 }
  0x15   : > { %p3800_p1 = pneg %p4100_p13  ;;  %s4005_s7 = smov [#allocation2]  }
  0x16   : > { %p4118_p7 = pnand %p3817_p2, %p4079_p5  ;;  %s153_s8 = sand.u32 1, %s3999_s14  }
  0x17   : > { %p3801_p3 = pnand %p3800_p1, %p84_p4  ;;  %s4006_s9 = smov [#allocation6]  }
  0x18   : > { %s3709_s10 = sshll.u32 %s153_s8, 6  ;;  %s3786_s11 = sshll.u32 %s4003_s15, 6 }
  0x19   : > { %s132_s29 = sshll.u32 %s6160_s0, 4  ;;  %s162_s20 = scalar_lea.hbm %s6099_s2, %s3786_s11  ;;  %s133_s29 = int_to_ptr.hbm [resolvable:$true] %s132_s29 }
  0x1a   : > { %3803 = dma.hbm_to_smem (!%p3801_p3), %s133_s29, 16, %s4005_s7, [#allocation5]  }
  0x1b   : > { %3806 = dma.hbm_to_smem (!%p3801_p3), %s143_s5, 16, %s4006_s9, [#allocation7]  }
  0x1c   : > { %s157_s27 = scalar_lea.vmem [#allocation8], %s3709_s10  ;;  %s163_s22 = sshll.u32 %s162_s20, 4  ;;  %s164_s22 = int_to_ptr.hbm [resolvable:$true] %s163_s22 }
  0x1d   : > { %s165_s28 = sshll.u32 %s157_s27, 4  ;;  %s154_s30 = scalar_lea.sflag [#allocation3], %s153_s8  ;;  %s166_s28 = int_to_ptr.vmem [resolvable:$true] %s165_s28 }
  0x1e   : > { %s3899_s4 = sshra.s32 %s164_s22, 4  ;;  %p3903_p8 = pneg %p4118_p7  ;;  %s3900_s4 = int_to_ptr.hbm [resolvable:$true] %s3899_s4 }
  0x1f   : > { %s3901_s0 = scalar_lea.hbm %s3900_s4, 64  ;;  %s3906_s7 = scalar_lea.hbm %s6099_s2, 128 }
  0x20   : > { %p3902_p5 = scmp.ne.s32.totalorder %s3900_s4, %s3901_s0  ;;  %p3907_p1 = scmp.lt.s32.totalorder %s3900_s4, %s6099_s2 }
  0x21   : > { %p3908_p2 = scmp.lt.s32.totalorder %s3906_s7, %s3901_s0 }
  0x22   : > { %p3904_p9 = pnand %p3903_p8, %p3902_p5 }
  0x23   : > { %p3909_p3 = por %p3908_p2, %p3907_p1 }
  0x24   : > { %p3905_p10 = pneg %p3904_p9 }
  0x26   : > { %p3910_p0 = pnand %p3909_p3, %p3905_p10 }
  0x28   : > { %3913 = shalt.err (!%p3910_p0)
}
  0x29   : > { %s4007_s8 = smov 128   ;;  %s4008_s10 = smov 8  }
  0x2a   : > { %3810 = dma.hbm_to_vmem [thread:$0]  (!%p4118_p7), %s164_s22, 1024, %s166_s28, %s154_s30, %s4007_s8, %s4007_s8, %s4008_s10  }
  0x2b   : > { %177 = sbr.rel (%p4100_p13) target bundleno = 863 (0x35f), region = 32 }
  0x30   : > { %3974 = dma.done.wait (%p84_p4), [#allocation5], 16  }
  0x31   : > { %3976 = vsyncadd (%p84_p4), [#allocation5], 4294967280 }
  0x32   : > { %3978 = dma.done.wait (%p84_p4), [#allocation7], 16  }
  0x33   : > { %3980 = vsyncadd (%p84_p4), [#allocation7], 4294967280  ;;  %s4148_s0 = sand.u32 1, %s3995_s13  }
  0x34   : > { %s3715_s26 = sshll.u32 %s4148_s0, 6  ;;  %s190_s6 = scalar_lea.sflag [#allocation3], %s4148_s0 }
  0x35   : > { %s4152_s17 = scalar_lea.vmem [#allocation8], %s3715_s26 }
  0x36   : > { %3982 = dma.done.wait (%p4085_p6), %s190_s6, 1024  }
  0x37   : > { %3984 = vsyncadd (%p4085_p6), %s190_s6, 4294966272 }
  0x38   : > { %199 = sfence }
  0x39   : > { %v4159_v0 = vld [vmem:[%s4152_s17 + $0x10] sm:$0xff]  ;;  %v4164_v3 = vld [vmem:[%s4152_s17] sm:$0xff]  ;;  %v6112_v24 = vmov 683565275   ;;  %v4010_v26 = vmov 2475754826  }
  0x3a   : > { %v534_v1 = vand.u32 2147483647, %v4159_v0  ;;  %v537_v2 = vand.u32 2139095040, %v4159_v0  ;;  %v229_v6 = vand.u32 2139095040, %v4164_v3  ;;  %v226_v7 = vand.u32 2147483647, %v4164_v3 }
  0x3b   : > { %v4171_v10 = vld [vmem:[%s4152_s17 + $0x20] sm:$0xff]  ;;  %v4011_v28 = vmov 2131351028   ;;  %v4012_v30 = vmov 2102212464   ;;  %s4016_s23 = smov 1  }
  0x3c   : > { %v538_v4 = vshrl.u32 %v537_v2, 23  ;;  %v541_v5 = vand.u32 8388607, %v534_v1  ;;  %v230_v9 = vshrl.u32 %v229_v6, 23  ;;  %v233_v14 = vand.u32 8388607, %v226_v7 }
  0x3d   : > { %v845_v15 = vand.u32 2139095040, %v4171_v10  ;;  %v4013_v32 = vmov 920167782   ;;  %v4014_v41 = vmov 1326507024   ;;  %s3767_s19 = sld [smem:[#allocation2 + $0x2]] }
  0x3e   : > { %v3723_v8 = vadd.s32 4294967169, %v538_v4  ;;  %v542_v11 = vor.u32 8388608, %v541_v5  ;;  %v3717_v13 = vadd.s32 4294967169, %v230_v9  ;;  %v234_v21 = vor.u32 8388608, %v233_v14  ;;  %s3768_s20 = sld [smem:[#allocation6 + $0x2]]  ;;  %s4017_s27 = smov 127  }
  0x3f   : > { %v4178_v22 = vshrl.u32 %v845_v15, 23  ;;  %s3770_s28 = sld [smem:[#allocation6 + $0x3]] }
  0x40   : > { %v544_v12 = vadd.s32 1, %v3723_v8  ;;  %v236_v16 = vadd.s32 1, %v3717_v13  ;;  %v4176_v18 = vshll.u32 %v542_v11, 8  ;;  %v4199_v60 = vshll.u32 %v234_v21, 8  ;;  %s3769_s22 = sld [smem:[#allocation2 + $0x3]] }
  0x41   : > { %s3773_s30 = sld [smem:[#allocation2 + $0x5]] }
  0x42   : > { %vm545_vm0 = vcmp.gt.s32.totalorder %v544_v12, 0  ;;  %vm237_vm1 = vcmp.gt.s32.totalorder %v236_v16, 0  ;;  %v583_v34 = vand.u32 65535, %v4176_v18  ;;  %v584_v59 = vshrl.u32 %v4176_v18, 16  ;;  %s3774_s4 = sld [smem:[#allocation6 + $0x5]] }
  0x43   : > { %v546_v17 = vsel %vm545_vm0, %v544_v12, 0  ;;  %v238_v35 = vsel %vm237_vm1, %v236_v16, 0  ;;  %s3775_s29 = sld [smem:[#allocation2 + $0x6]] }
  0x44   : > { %v548_v19 = vand.u32 31, %v546_v17  ;;  %v547_v20 = vshrl.u32 %v546_v17, 5  ;;  %v4193_v48 = vand.u32 31, %v238_v35  ;;  %v4206_v2 = vshrl.u32 %v238_v35, 5  ;;  %s3776_s5 = sld [smem:[#allocation6 + $0x6]] }
  0x45   : > { %s5364_s7 = sld [smem:[#allocation2 + $0x8]] }
  0x46   : > { %v549_v23 = vsub.s32 32, %v548_v19  ;;  %v551_v25 = vshll.u32 %v6112_v24, %v548_v19  ;;  %v554_v27 = vshll.u32 %v4010_v26, %v548_v19  ;;  %v557_v29 = vshll.u32 %v4011_v28, %v548_v19  ;;  %s5382_s9 = sld [smem:[#allocation6 + $0x8]] }
  0x47   : > { %v560_v31 = vshll.u32 %v4012_v30, %v548_v19  ;;  %v563_v33 = vshll.u32 %v4013_v32, %v548_v19  ;;  %vm566_vm2 = vcmp.lt.s32.totalorder %v547_v20, 1  ;;  %vm567_vm3 = vcmp.lt.s32.totalorder %v547_v20, 2  ;;  %s5424_s11 = sld [smem:[#allocation2 + $0x1]] }
  0x48   : > { %v550_v36 = vshrl.u32 %v6112_v24, %v549_v23  ;;  %v552_v37 = vshrl.u32 %v4010_v26, %v549_v23  ;;  %v555_v38 = vshrl.u32 %v4011_v28, %v549_v23  ;;  %v558_v39 = vshrl.u32 %v4012_v30, %v549_v23  ;;  %s5440_s8 = sld [smem:[#allocation6 + $0x1]] }
  0x49   : > { %v561_v40 = vshrl.u32 %v4013_v32, %v549_v23  ;;  %v564_v42 = vshrl.u32 %v4014_v41, %v549_v23  ;;  %vm569_vm4 = vcmp.lt.s32.totalorder %v547_v20, 4  ;;  %vm568_vm5 = vcmp.lt.s32.totalorder %v547_v20, 3  ;;  %s5581_s10 = sld [smem:[#allocation2 + $0x4]] }
  0x4a   : > { %v553_v43 = vor.u32 %v552_v37, %v551_v25  ;;  %v556_v44 = vor.u32 %v555_v38, %v554_v27  ;;  %v559_v45 = vor.u32 %v558_v39, %v557_v29  ;;  %v4196_v56 = vsub.s32 32, %v4193_v48  ;;  %s5597_s26 = sld [smem:[#allocation6 + $0x4]] }
  0x4b   : > { %v562_v46 = vor.u32 %v561_v40, %v560_v31  ;;  %v565_v47 = vor.u32 %v564_v42, %v563_v33  ;;  %v243_v9 = vshll.u32 %v6112_v24, %v4193_v48  ;;  %v246_v12 = vshll.u32 %v4010_v26, %v4193_v48  ;;  %s5698_s6 = sld [smem:[#allocation2 + $0x7]] }
  0x4c   : > { %v570_v49 = vsel %vm566_vm2, %v550_v36, %v553_v43  ;;  %v571_v50 = vsel %vm569_vm4, %v559_v45, 2102212464  ;;  %v574_v51 = vsel %vm566_vm2, %v553_v43, %v556_v44  ;;  %v578_v52 = vsel %vm566_vm2, %v556_v44, %v559_v45 }
  0x4d   : > { %v572_v53 = vsel %vm568_vm5, %v556_v44, %v571_v50  ;;  %v575_v54 = vsel %vm569_vm4, %v562_v46, 920167782  ;;  %v579_v55 = vsel %vm569_vm4, %v565_v47, 1326507024  ;;  %v244_v11 = vshrl.u32 %v4010_v26, %v4196_v56 }
  0x4e   : > { %v576_v57 = vsel %vm568_vm5, %v559_v45, %v575_v54  ;;  %v580_v58 = vsel %vm568_vm5, %v562_v46, %v579_v55  ;;  %v4202_v61 = vsel %vm567_vm3, %v570_v49, %v572_v53  ;;  %v247_v13 = vshrl.u32 %v4011_v28, %v4196_v56 }
  0x4f   : > { %v577_v62 = vsel %vm567_vm3, %v574_v51, %v576_v57  ;;  %v581_v63 = vsel %vm567_vm3, %v578_v52, %v580_v58  ;;  %v249_v17 = vshll.u32 %v4011_v28, %v4193_v48  ;;  %v4218_v40 = vor.u32 %v244_v11, %v243_v9 }
  0x50   : > { %v585_v4 = vand.u32 65535, %v581_v63  ;;  %v586_v5 = vshrl.u32 %v581_v63, 16  ;;  %v607_v6 = vand.u32 65535, %v577_v62  ;;  %v608_v8 = vshrl.u32 %v577_v62, 16 }
  0x51   : > { %v4015_v42 = vmov 0   ;;  %v252_v47 = vshll.u32 %v4012_v30, %v4193_v48  ;;  %v248_v51 = vor.u32 %v247_v13, %v246_v12  ;;  %v253_v55 = vshrl.u32 %v4013_v32, %v4196_v56 }
  0x52   : > { %v587_v14 = vmul.u32 %v585_v4, %v583_v34  ;;  %v588_v15 = vmul.u32 %v586_v5, %v583_v34  ;;  %v589_v16 = vmul.u32 %v585_v4, %v584_v59  ;;  %v590_v19 = vmul.u32 %v586_v5, %v584_v59 }
  0x53   : > { %v609_v20 = vmul.u32 %v607_v6, %v583_v34  ;;  %v610_v21 = vmul.u32 %v608_v8, %v583_v34  ;;  %v611_v23 = vmul.u32 %v607_v6, %v584_v59  ;;  %v612_v31 = vmul.u32 %v608_v8, %v584_v59 }
  0x54   : > { %v591_v25 = vshll.u32 %v588_v15, 16  ;;  %v592_v27 = vshrl.u32 %v588_v15, 16  ;;  %v593_v29 = vshll.u32 %v589_v16, 16  ;;  %v594_v33 = vshrl.u32 %v589_v16, 16 }
  0x55   : > { %v613_v35 = vshll.u32 %v610_v21, 16  ;;  %v614_v36 = vshrl.u32 %v610_v21, 16  ;;  %v615_v37 = vshll.u32 %v611_v23, 16  ;;  %v616_v39 = vshrl.u32 %v611_v23, 16 }
  0x56   : > { %vm595_vm6 = vc.u32 %v587_v14, %v591_v25  ;;  %v597_v38 = vadd.s32 %v591_v25, %v587_v14  ;;  %v250_v34 = vshrl.u32 %v4012_v30, %v4196_v56  ;;  %v255_v58 = vshll.u32 %v4013_v32, %v4193_v48 }
  0x57   : > { %v596_v43 = vsel %vm595_vm6, 1, %v4015_v42  ;;  %vm617_vm7 = vc.u32 %v609_v20, %v613_v35  ;;  %v619_v44 = vadd.s32 %v613_v35, %v609_v20  ;;  %v256_v59 = vshrl.u32 %v4014_v41, %v4196_v56 }
  0x58   : > { %v598_v45 = vadd.s32 %v596_v43, %v590_v19  ;;  %vm599_vm8 = vc.u32 %v597_v38, %v593_v29  ;;  %v618_v46 = vsel %vm617_vm7, 1, %v4015_v42  ;;  %v251_v54 = vor.u32 %v250_v34, %v249_v17 }
  0x59   : > { %v600_v49 = vsel %vm599_vm8, 1, %v4015_v42  ;;  %v620_v50 = vadd.s32 %v618_v46, %v612_v31  ;;  %vm621_vm9 = vc.u32 %v619_v44, %v615_v37  ;;  %vm258_vm10 = vcmp.lt.s32.totalorder %v4206_v2, 1 }
  0x5a   : > { %v602_v52 = vadd.s32 %v600_v49, %v598_v45  ;;  %v622_v53 = vsel %vm621_vm9, 1, %v4015_v42  ;;  %v4235_v63 = vadd.s32 %v619_v44, %v615_v37  ;;  %v254_v4 = vor.u32 %v253_v55, %v252_v47 }
  0x5b   : > { %v624_v57 = vadd.s32 %v622_v53, %v620_v50  ;;  %vm260_vm11 = vcmp.lt.s32.totalorder %v4206_v2, 3  ;;  %v257_v6 = vor.u32 %v256_v59, %v255_v58  ;;  %vm259_vm12 = vcmp.lt.s32.totalorder %v4206_v2, 2 }
  0x5c   : > { %v603_v62 = vadd.s32 %v602_v52, %v592_v27  ;;  %vm261_vm13 = vcmp.lt.s32.totalorder %v4206_v2, 4  ;;  %v266_v48 = vsel %vm258_vm10, %v4218_v40, %v248_v51  ;;  %v3729_v11 = vadd.s32 4294967169, %v4178_v22 }
  0x5d   : > { %v625_v5 = vadd.s32 %v624_v57, %v614_v36  ;;  %v267_v9 = vsel %vm261_vm13, %v254_v4, 920167782  ;;  %v275_v14 = vand.u32 65535, %v4199_v60  ;;  %v276_v15 = vshrl.u32 %v4199_v60, 16 }
  0x5e   : > { %v4240_v8 = vadd.s32 %v603_v62, %v594_v33  ;;  %v268_v13 = vsel %vm260_vm11, %v251_v54, %v267_v9  ;;  %v627_v16 = vmul.u32 %v4176_v18, %v4202_v61  ;;  %v270_v22 = vsel %vm258_vm10, %v248_v51, %v251_v54 }
  0x5f   : > { %v626_v12 = vadd.s32 %v625_v5, %v616_v39  ;;  %v269_v17 = vsel %vm259_vm12, %v266_v48, %v268_v13  ;;  %v271_v20 = vsel %vm261_vm13, %v257_v6, 1326507024  ;;  %v852_v27 = vadd.s32 1, %v3729_v11 }
  0x60   : > { %vm629_vm14 = vc.u32 %v4240_v8, %v4235_v63  ;;  %v299_v21 = vand.u32 65535, %v269_v17  ;;  %v300_v23 = vshrl.u32 %v269_v17, 16  ;;  %v272_v25 = vsel %vm260_vm11, %v254_v4, %v271_v20 }
  0x61   : > { %v630_v19 = vadd.s32 1, %v626_v12  ;;  %v242_v61 = vshrl.u32 %v6112_v24, %v4196_v56  ;;  %v273_v29 = vsel %vm259_vm12, %v270_v22, %v272_v25  ;;  %v263_v35 = vsel %vm261_vm13, %v251_v54, 2102212464 }
  0x62   : > { %v302_v31 = vmul.u32 %v300_v23, %v275_v14  ;;  %v277_v36 = vand.u32 65535, %v273_v29  ;;  %v278_v37 = vshrl.u32 %v273_v29, 16  ;;  %v301_v38 = vmul.u32 %v299_v21, %v275_v14 }
  0x63   : > { %v631_v18 = vsel %vm629_vm14, %v630_v19, %v626_v12  ;;  %v303_v39 = vmul.u32 %v299_v21, %v276_v15  ;;  %v262_v56 = vsel %vm258_vm10, %v242_v61, %v4218_v40  ;;  %v264_v47 = vsel %vm260_vm11, %v248_v51, %v263_v35 }
  0x64   : > { %v632_v33 = vadd.s32 %v631_v18, %v627_v16  ;;  %v305_v43 = vshll.u32 %v302_v31, 16  ;;  %v279_v34 = vmul.u32 %v277_v36, %v275_v14  ;;  %v280_v45 = vmul.u32 %v278_v37, %v275_v14 }
  0x65   : > { %v281_v46 = vmul.u32 %v277_v36, %v276_v15  ;;  %v307_v49 = vshll.u32 %v303_v39, 16  ;;  %vm853_vm15 = vcmp.gt.s32.totalorder %v852_v27, 0  ;;  %v282_v52 = vmul.u32 %v278_v37, %v276_v15 }
  0x66   : > { %v633_v44 = vadd.s32 536870912, %v632_v33  ;;  %v283_v53 = vshll.u32 %v280_v45, 16  ;;  %v304_v55 = vmul.u32 %v300_v23, %v276_v15  ;;  %vm309_vm0 = vc.u32 %v301_v38, %v305_v43 }
  0x67   : > { %v285_v54 = vshll.u32 %v281_v46, 16  ;;  %v311_v57 = vadd.s32 %v305_v43, %v301_v38  ;;  %v842_v58 = vand.u32 2147483647, %v4171_v10  ;;  %v265_v62 = vsel %vm259_vm12, %v262_v56, %v264_v47 }
  0x68   : > { %v634_v50 = vshrl.u32 %v633_v44, 30  ;;  %vm287_vm1 = vc.u32 %v279_v34, %v283_v53  ;;  %v289_v40 = vadd.s32 %v283_v53, %v279_v34  ;;  %v310_v51 = vsel %vm309_vm0, 1, %v4015_v42 }
  0x69   : > { %v288_v4 = vsel %vm287_vm1, 1, %v4015_v42  ;;  %vm313_vm2 = vc.u32 %v311_v57, %v307_v49  ;;  %v854_v5 = vsel %vm853_vm15, %v852_v27, 0  ;;  %v284_v48 = vshrl.u32 %v280_v45, 16 }
  0x6a   : > { %v635_v59 = vshll.u32 %v634_v50, 30  ;;  %v290_v9 = vadd.s32 %v288_v4, %v282_v52  ;;  %vm291_vm3 = vc.u32 %v289_v40, %v285_v54  ;;  %v306_v12 = vshrl.u32 %v302_v31, 16 }
  0x6b   : > { %v292_v11 = vsel %vm291_vm3, 1, %v4015_v42  ;;  %v312_v13 = vadd.s32 %v310_v51, %v304_v55  ;;  %v314_v2 = vsel %vm313_vm2, 1, %v4015_v42  ;;  %v286_v15 = vshrl.u32 %v281_v46, 16 }
  0x6c   : > { %v636_v6 = vsub.s32 %v632_v33, %v635_v59  ;;  %v294_v16 = vadd.s32 %v292_v11, %v290_v9  ;;  %v308_v17 = vshrl.u32 %v303_v39, 16  ;;  %v849_v19 = vand.u32 8388607, %v842_v58 }
  0x6d   : > { %v316_v22 = vadd.s32 %v314_v2, %v312_v13  ;;  %v856_v20 = vand.u32 31, %v854_v5  ;;  %v658_v23 = vsub.s32 4, %v634_v50  ;;  %v4285_v18 = vadd.s32 %v311_v57, %v307_v49 }
  0x6e   : > { %vm637_vm4 = vcmp.lt.s32.totalorder %v636_v6, 0  ;;  %v638_v14 = vsub.s32 0, %v636_v6  ;;  %v295_v25 = vadd.s32 %v294_v16, %v284_v48  ;;  %vm536_vm5 = vcmp.lt.s32.totalorder %v4159_v0, 0 }
  0x6f   : > { %v317_v61 = vadd.s32 %v316_v22, %v306_v12  ;;  %v4287_v29 = vsub.s32 32, %v856_v20  ;;  %v628_v31 = vadd.s32 %v4235_v63, %v4240_v8  ;;  %v319_v35 = vmul.u32 %v4199_v60, %v265_v62 }
  0x70   : > { %v639_v21 = vsel %vm637_vm4, %v638_v14, %v636_v6  ;;  %v296_v33 = vadd.s32 %v295_v25, %v286_v15  ;;  %v850_v38 = vor.u32 8388608, %v849_v19  ;;  %v4293_v39 = vshrl.u32 %v854_v5, 5 }
  0x71   : > { %v640_v27 = vclz %v639_v21  ;;  %v318_v37 = vadd.s32 %v317_v61, %v308_v17  ;;  %v859_v43 = vshll.u32 %v6112_v24, %v856_v20  ;;  %v860_v44 = vshrl.u32 %v4010_v26, %v4287_v29  ;;  %v4338_v61 = vld [vmem:[%s4152_s17 + $0x18] sm:$0xff] }
  0x72   : > { %v862_v34 = vshll.u32 %v4010_v26, %v856_v20  ;;  %v863_v45 = vshrl.u32 %v4011_v28, %v4287_v29  ;;  %v659_v63 = vsel %vm536_vm5, %v658_v23, %v634_v50  ;;  %vm321_vm7 = vc.u32 %v296_v33, %v4285_v18 }
  0x73   : > { %v3724_v36 = vadd.s32 4294967294, %v640_v27  ;;  %v322_v60 = vadd.s32 1, %v318_v37  ;;  %v865_v46 = vshll.u32 %v4011_v28, %v856_v20  ;;  %v866_v56 = vshrl.u32 %v4012_v30, %v4287_v29 }
  0x74   : > { %v868_v47 = vshll.u32 %v4012_v30, %v856_v20  ;;  %vm874_vm8 = vcmp.lt.s32.totalorder %v4293_v39, 1  ;;  %v861_v55 = vor.u32 %v860_v44, %v859_v43  ;;  %v864_v57 = vor.u32 %v863_v45, %v862_v34 }
  0x75   : > { %vm3725_vm6 = vcmp.lt.s32.totalorder %v3724_v36, 0  ;;  %v323_v54 = vsel %vm321_vm7, %v322_v60, %v318_v37  ;;  %v869_v50 = vshrl.u32 %v4013_v32, %v4287_v29  ;;  %v871_v4 = vshll.u32 %v4013_v32, %v856_v20 }
  0x76   : > { %v643_v8 = vsel %vm3725_vm6, 0, %v3724_v36  ;;  %v324_v40 = vadd.s32 %v323_v54, %v319_v35  ;;  %v867_v51 = vor.u32 %v866_v56, %v865_v46  ;;  %v872_v48 = vshrl.u32 %v4014_v41, %v4287_v29 }
  0x77   : > { %v644_v49 = vsub.s32 32, %v643_v8  ;;  %v645_v52 = vshll.u32 %v636_v6, %v643_v8  ;;  %v648_v53 = vsub.s32 4294967266, %v643_v8  ;;  %v870_v5 = vor.u32 %v869_v50, %v868_v47 }
  0x78   : > { %vm877_vm9 = vcmp.lt.s32.totalorder %v4293_v39, 4  ;;  %v325_v11 = vadd.s32 536870912, %v324_v40  ;;  %vm876_vm10 = vcmp.lt.s32.totalorder %v4293_v39, 3  ;;  %v873_v12 = vor.u32 %v872_v48, %v871_v4 }
  0x79   : > { %v646_v59 = vshrl.u32 %v628_v31, %v644_v49  ;;  %v649_v62 = vadd.s32 127, %v648_v53  ;;  %vm875_vm11 = vcmp.lt.s32.totalorder %v4293_v39, 2  ;;  %v882_v13 = vsel %vm874_vm8, %v861_v55, %v864_v57 }
  0x7a   : > { %v883_v2 = vsel %vm877_vm9, %v870_v5, 920167782  ;;  %v326_v16 = vshrl.u32 %v325_v11, 30  ;;  %v4321_v17 = vshll.u32 %v850_v38, 8  ;;  %vm4325_vm12 = vcmp.le.f32.partialorder %v534_v1, 0.7853982 }
  0x7b   : > { %v647_v6 = vor.u32 %v646_v59, %v645_v52  ;;  %v650_v9 = vshll.u32 %v649_v62, 23  ;;  %v884_v19 = vsel %vm876_vm10, %v867_v51, %v883_v2  ;;  %v887_v20 = vsel %vm877_vm9, %v873_v12, 1326507024 }
  0x7c   : > { %v327_v23 = vshll.u32 %v326_v16, 30  ;;  %v885_v25 = vsel %vm875_vm11, %v882_v13, %v884_v19  ;;  %v886_v27 = vsel %vm874_vm8, %v864_v57, %v867_v51  ;;  %v4342_v1 = vsel %vm4325_vm12, 0, %v659_v63 }
  0x7d   : > { %v651_v14 = vor.u32 4788187, %v650_v9  ;;  %v654_v15 = vcvt.s32.f32 %v647_v6  ;;  %vm228_vm13 = vcmp.lt.s32.totalorder %v4164_v3, 0  ;;  %v888_v31 = vsel %vm876_vm10, %v870_v5, %v887_v20 }
  0x7e   : > { %v688_v35 = vand.u32 2147483647, %v4338_v61  ;;  %v4348_v37 = vsub.s32 %v324_v40, %v327_v23  ;;  %v858_v38 = vshrl.u32 %v6112_v24, %v4287_v29  ;;  %v891_v43 = vand.u32 65535, %v4321_v17 }
  0x7f   : > { %v652_v21 = vand.u32 2147483647, %v651_v14  ;;  %v320_v44 = vadd.s32 %v4285_v18, %v296_v33  ;;  %v889_v34 = vsel %vm875_vm11, %v886_v27, %v888_v31  ;;  %v892_v45 = vshrl.u32 %v4321_v17, 16 }
  0x80   : > { %v916_v63 = vshrl.u32 %v885_v25, 16  ;;  %vm329_vm14 = vcmp.lt.s32.totalorder %v4348_v37, 0  ;;  %v330_v8 = vsub.s32 0, %v4348_v37  ;;  %v893_v46 = vand.u32 65535, %v889_v34 }
  0x81   : > { %v655_v36 = vmul.f32 %v654_v15, %v652_v21  ;;  %v350_v56 = vsub.s32 4, %v326_v16  ;;  %v879_v29 = vsel %vm877_vm9, %v867_v51, 2102212464  ;;  %v894_v47 = vshrl.u32 %v889_v34, 16 }
  0x82   : > { %v915_v49 = vand.u32 65535, %v885_v25  ;;  %v331_v33 = vsel %vm329_vm14, %v330_v8, %v4348_v37  ;;  %v895_v52 = vmul.u32 %v893_v46, %v891_v43  ;;  %v4364_v53 = vmul.u32 %v916_v63, %v891_v43 }
  0x83   : > { %v656_v60 = vxor.u32 2147483648, %v655_v36  ;;  %v332_v50 = vclz %v331_v33  ;;  %v896_v59 = vmul.u32 %v894_v47, %v891_v43  ;;  %v4371_v62 = vmul.u32 %v893_v46, %v892_v45 }
  0x84   : > { %v4376_v4 = vand.u32 3, %v4342_v1  ;;  %v4380_v51 = vsel %vm874_vm8, %v858_v38, %v861_v55  ;;  %v4384_v5 = vsel %vm876_vm10, %v864_v57, %v879_v29  ;;  %v4388_v6 = vsel %vm228_vm13, %v350_v56, %v326_v16 }
  0x85   : > { %v657_v18 = vsel %vm536_vm5, %v656_v60, %v655_v36  ;;  %v3718_v48 = vadd.s32 4294967294, %v332_v50  ;;  %v899_v9 = vshll.u32 %v896_v59, 16  ;;  %v917_v11 = vmul.u32 %v915_v49, %v891_v43 }
  0x86   : > { %v4369_v54 = vsel %vm4325_vm12, %v4159_v0, %v657_v18  ;;  %v898_v2 = vmul.u32 %v894_v47, %v892_v45  ;;  %v4390_v14 = vmul.u32 %v915_v49, %v892_v45  ;;  %v901_v55 = vshll.u32 %v4371_v62, 16 }
  0x87   : > { %v662_v40 = vmul.f32 %v4369_v54, %v4369_v54  ;;  %vm3719_vm15 = vcmp.lt.s32.totalorder %v3718_v48, 0  ;;  %vm903_vm0 = vc.u32 %v895_v52, %v899_v9  ;;  %v921_v15 = vshll.u32 %v4364_v53, 16 }
  0x88   : > { %v335_v19 = vsel %vm3719_vm15, 0, %v3718_v48  ;;  %v904_v20 = vsel %vm903_vm0, 1, %v4015_v42  ;;  %vm683_vm1 = vcmp.eq.s32.totalorder %v4376_v4, 2  ;;  %v902_v25 = vshrl.u32 %v4371_v62, 16 }
  0x89   : > { %v663_v12 = vmul.f32 -0.001358992, %v662_v40  ;;  %v670_v13 = vmul.f32 -0.00019511016, %v662_v40  ;;  %v336_v16 = vsub.s32 32, %v335_v19  ;;  %v337_v21 = vshll.u32 %v4348_v37, %v335_v19 }
  0x8a   : > { %v340_v23 = vsub.s32 4294967266, %v335_v19  ;;  %v900_v36 = vshrl.u32 %v896_v59, 16  ;;  %v920_v38 = vmul.u32 %v916_v63, %v892_v45  ;;  %vm680_vm2 = vcmp.eq.s32.totalorder %v4376_v4, 0 }
  0x8b   : > { %v664_v57 = vadd.f32 0.041655596, %v663_v12  ;;  %v671_v22 = vadd.f32 0.008332121, %v670_v13  ;;  %v338_v43 = vshrl.u32 %v320_v44, %v336_v16  ;;  %v905_v60 = vadd.s32 %v899_v9, %v895_v52 }
  0x8c   : > { %v341_v34 = vadd.s32 127, %v340_v23  ;;  %v906_v8 = vadd.s32 %v904_v20, %v898_v2  ;;  %vm679_vm3 = vcmp.lt.s32.totalorder %v4376_v4, 2  ;;  %vm4402_vm4 = vcmp.le.f32.partialorder %v226_v7, 0.7853982 }
  0x8d   : > { %v665_v27 = vmul.f32 %v664_v57, %v662_v40  ;;  %v672_v31 = vmul.f32 %v671_v22, %v662_v40  ;;  %v923_v29 = vshll.u32 %v4390_v14, 16  ;;  %vm925_vm5 = vc.u32 %v917_v11, %v921_v15 }
  0x8e   : > { %v339_v45 = vor.u32 %v338_v43, %v337_v21  ;;  %v342_v63 = vshll.u32 %v341_v34, 23  ;;  %vm907_vm6 = vc.u32 %v905_v60, %v901_v55  ;;  %v926_v44 = vsel %vm925_vm5, 1, %v4015_v42 }
  0x8f   : > { %v666_v46 = vadd.f32 -0.4999988, %v665_v27  ;;  %v673_v56 = vadd.f32 -0.16666654, %v672_v31  ;;  %v908_v18 = vsel %vm907_vm6, 1, %v4015_v42  ;;  %v927_v33 = vadd.s32 %v921_v15, %v917_v11 }
  0x90   : > { %v343_v52 = vor.u32 4788187, %v342_v63  ;;  %v346_v50 = vcvt.s32.f32 %v339_v45  ;;  %v910_v59 = vadd.s32 %v908_v18, %v906_v8  ;;  %v928_v7 = vadd.s32 %v926_v44, %v920_v38 }
  0x91   : > { %v667_v47 = vmul.f32 %v666_v46, %v662_v40  ;;  %v674_v49 = vmul.f32 %v673_v56, %v662_v40  ;;  %v922_v9 = vshrl.u32 %v4364_v53, 16  ;;  %vm929_vm7 = vc.u32 %v927_v33, %v923_v29 }
  0x92   : > { %v344_v12 = vand.u32 2147483647, %v343_v52  ;;  %v911_v13 = vadd.s32 %v910_v59, %v900_v36  ;;  %v924_v2 = vshrl.u32 %v4390_v14, 16  ;;  %v930_v55 = vsel %vm929_vm7, 1, %v4015_v42 }
  0x93   : > { %v4409_v62 = vadd.f32 1.0, %v667_v47  ;;  %v675_v48 = vadd.f32 1.0, %v674_v49  ;;  %v932_v15 = vadd.s32 %v930_v55, %v928_v7  ;;  %v691_v57 = vand.u32 2139095040, %v4338_v61  ;;  %v4457_v49 = vld [vmem:[%s4152_s17 + $0x8] sm:$0xff] }
  0x94   : > { %v347_v22 = vmul.f32 %v346_v50, %v344_v12  ;;  %v881_v53 = vsel %vm875_vm11, %v4380_v51, %v4384_v5  ;;  %v912_v19 = vadd.s32 %v911_v13, %v902_v25  ;;  %v931_v20 = vadd.s32 %v927_v33, %v923_v29 }
  0x95   : > { %v4415_v40 = vmul.f32 %v675_v48, %v4369_v54  ;;  %v6107_v11 = vxor.u32 2147483648, %v4409_v62  ;;  %v933_v16 = vadd.s32 %v932_v15, %v922_v9  ;;  %v692_v21 = vshrl.u32 %v691_v57, 23 }
  0x96   : > { %vm677_vm8 = vweird.f32 %v4159_v0  ;;  %v348_v23 = vxor.u32 2147483648, %v347_v22  ;;  %v4433_v39 = vsel %vm4402_vm4, 0, %v4388_v6  ;;  %v935_v25 = vmul.u32 %v4321_v17, %v881_v53 }
  0x97   : > { %v6108_v14 = vxor.u32 2147483648, %v4415_v40  ;;  %v685_v54 = vsel %vm683_vm1, %v6107_v11, %v4415_v40  ;;  %v934_v5 = vadd.s32 %v933_v16, %v924_v2  ;;  %v3726_v27 = vadd.s32 4294967169, %v692_v21 }
  0x98   : > { %v349_v36 = vsel %vm228_vm13, %v348_v23, %v347_v22  ;;  %vm937_vm9 = vc.u32 %v912_v19, %v931_v20  ;;  %v695_v6 = vand.u32 8388607, %v688_v35  ;;  %v4454_v60 = vand.u32 3, %v4433_v39 }
  0x99   : > { %v682_v51 = vsel %vm680_vm2, %v4409_v62, %v6108_v14  ;;  %v352_v43 = vsel %vm4402_vm4, %v4164_v3, %v349_v36  ;;  %v938_v34 = vadd.s32 1, %v934_v5  ;;  %v698_v17 = vadd.s32 1, %v3726_v27 }
  0x9a   : > { %v686_v31 = vsel %vm679_vm3, %v682_v51, %v685_v54  ;;  %v354_v4 = vmul.f32 %v352_v43, %v352_v43  ;;  %v696_v45 = vor.u32 8388608, %v695_v6  ;;  %vm375_vm11 = vcmp.eq.s32.totalorder %v4454_v60, 2 }
  0x9b   : > { %v687_v38 = vsel %vm677_vm8, nan, %v686_v31  ;;  %v939_v8 = vsel %vm937_vm9, %v938_v34, %v934_v5  ;;  %vm699_vm10 = vcmp.gt.s32.totalorder %v698_v17, 0  ;;  %v380_v33 = vand.u32 2147483647, %v4457_v49 }
  0x9c   : > { %2710 = vrot.lane.b32.xlu1 %v687_v38, %s4016_s23  ;;  %v355_v46 = vmul.f32 -0.001358992, %v354_v4  ;;  %v362_v56 = vmul.f32 -0.00019511016, %v354_v4  ;;  %v940_v29 = vadd.s32 %v939_v8, %v935_v25  ;;  %v700_v63 = vsel %vm699_vm10, %v698_v17, 0 }
  0x9d   : > { %v702_v18 = vand.u32 31, %v700_v63  ;;  %v4463_v7 = vshll.u32 %v696_v45, 8  ;;  %vm372_vm12 = vcmp.eq.s32.totalorder %v4454_v60, 0  ;;  %v4466_v48 = vshrl.u32 %v700_v63, 5 }
  0x9e   : > { %v356_v44 = vadd.f32 0.041655596, %v355_v46  ;;  %v363_v37 = vadd.f32 0.008332121, %v362_v56  ;;  %v941_v47 = vadd.s32 536870912, %v940_v29  ;;  %vm371_vm13 = vcmp.lt.s32.totalorder %v4454_v60, 2 }
  0x9f   : > { %v703_v9 = vsub.s32 32, %v702_v18  ;;  %v705_v12 = vshll.u32 %v6112_v24, %v702_v18  ;;  %v708_v13 = vshll.u32 %v4010_v26, %v702_v18  ;;  %v936_v15 = vadd.s32 %v931_v20, %v912_v19 }
  0xa0   : > { %v357_v52 = vmul.f32 %v356_v44, %v354_v4  ;;  %v364_v50 = vmul.f32 %v363_v37, %v354_v4  ;;  %v4461_v59 = vshrl.u32 %v941_v47, 30  ;;  %vm369_vm14 = vweird.f32 %v4164_v3 }
  0xa1   : > { %v706_v22 = vshrl.u32 %v4010_v26, %v703_v9  ;;  %v709_v53 = vshrl.u32 %v4011_v28, %v703_v9  ;;  %v711_v54 = vshll.u32 %v4011_v28, %v702_v18  ;;  %v712_v16 = vshrl.u32 %v4012_v30, %v703_v9 }
  0xa2   : > { %v358_v2 = vadd.f32 -0.4999988, %v357_v52  ;;  %v365_v55 = vadd.f32 -0.16666654, %v364_v50  ;;  %v943_v57 = vshll.u32 %v4461_v59, 30  ;;  %v383_v5 = vand.u32 2139095040, %v4457_v49 }
  0xa3   : > { %v707_v25 = vor.u32 %v706_v22, %v705_v12  ;;  %v710_v27 = vor.u32 %v709_v53, %v708_v13  ;;  %vm720_vm15 = vcmp.lt.s32.totalorder %v4466_v48, 1  ;;  %v4480_v19 = vand.u32 65535, %v4463_v7 }
  0xa4   : > { %v359_v21 = vmul.f32 %v358_v2, %v354_v4  ;;  %v366_v23 = vmul.f32 %v365_v55, %v354_v4  ;;  %v944_v51 = vsub.s32 %v940_v29, %v943_v57  ;;  %v713_v6 = vor.u32 %v712_v16, %v711_v54 }
  0xa5   : > { %v714_v38 = vshll.u32 %v4012_v30, %v702_v18  ;;  %v715_v34 = vshrl.u32 %v4013_v32, %v703_v9  ;;  %v717_v17 = vshll.u32 %v4013_v32, %v702_v18  ;;  %v718_v56 = vshrl.u32 %v4014_v41, %v703_v9 }
  0xa6   : > { %v4482_v20 = vadd.f32 1.0, %v359_v21  ;;  %v367_v31 = vadd.f32 1.0, %v366_v23  ;;  %vm945_vm0 = vcmp.lt.s32.totalorder %v944_v51, 0  ;;  %v946_v36 = vsub.s32 0, %v944_v51 }
  0xa7   : > { %v716_v45 = vor.u32 %v715_v34, %v714_v38  ;;  %vm722_vm1 = vcmp.lt.s32.totalorder %v4466_v48, 3  ;;  %v384_v63 = vshrl.u32 %v383_v5, 23  ;;  %vm723_vm2 = vcmp.lt.s32.totalorder %v4466_v48, 4 }
  0xa8   : > { %v4487_v4 = vmul.f32 %v367_v31, %v352_v43  ;;  %v6105_v8 = vxor.u32 2147483648, %v4482_v20  ;;  %v947_v46 = vsel %vm945_vm0, %v946_v36, %v944_v51  ;;  %v738_v43 = vshrl.u32 %v4463_v7, 16 }
  0xa9   : > { %v948_v29 = vclz %v947_v46  ;;  %vm844_vm3 = vcmp.lt.s32.totalorder %v4171_v10, 0  ;;  %vm721_vm4 = vcmp.lt.s32.totalorder %v4466_v48, 2  ;;  %v728_v18 = vsel %vm720_vm15, %v707_v25, %v710_v27 }
  0xaa   : > { %v6106_v44 = vxor.u32 2147483648, %v4487_v4  ;;  %v377_v37 = vsel %vm375_vm11, %v6105_v8, %v4487_v4  ;;  %v729_v52 = vsel %vm723_vm2, %v716_v45, 920167782  ;;  %v704_v12 = vshrl.u32 %v6112_v24, %v703_v9 }
  0xab   : > { %v3730_v47 = vadd.s32 4294967294, %v948_v29  ;;  %v719_v13 = vor.u32 %v718_v56, %v717_v17  ;;  %v730_v2 = vsel %vm722_vm1, %v713_v6, %v729_v52  ;;  %v725_v57 = vsel %vm723_vm2, %v713_v6, 2102212464 }
  0xac   : > { %v374_v50 = vsel %vm372_vm12, %v4482_v20, %v6106_v44  ;;  %v3720_v22 = vadd.s32 4294967169, %v384_v63  ;;  %v966_v16 = vsub.s32 4, %v4461_v59  ;;  %v731_v9 = vsel %vm721_vm4, %v728_v18, %v730_v2 }
  0xad   : > { %v378_v55 = vsel %vm371_vm13, %v374_v50, %v377_v37  ;;  %vm3731_vm5 = vcmp.lt.s32.totalorder %v3730_v47, 0  ;;  %v732_v5 = vsel %vm720_vm15, %v710_v27, %v713_v6  ;;  %v724_v31 = vsel %vm720_vm15, %v704_v12, %v707_v25 }
  0xae   : > { %v379_v53 = vsel %vm369_vm14, nan, %v378_v55  ;;  %v951_v54 = vsel %vm3731_vm5, 0, %v3730_v47  ;;  %v726_v36 = vsel %vm722_vm1, %v710_v27, %v725_v57  ;;  %v733_v38 = vsel %vm723_vm2, %v719_v13, 1326507024 }
  0xaf   : > { %2706 = vrot.lane.b32.xlu0 %v379_v53, %s4016_s23  ;;  %v952_v21 = vsub.s32 32, %v951_v54  ;;  %v953_v23 = vshll.u32 %v944_v51, %v951_v54  ;;  %v956_v60 = vsub.s32 4294967266, %v951_v54  ;;  %v761_v34 = vand.u32 65535, %v731_v9 }
  0xb0   : > { %v734_v56 = vsel %vm722_vm1, %v716_v45, %v733_v38  ;;  %v762_v51 = vshrl.u32 %v731_v9, 16  ;;  %v4538_v25 = vand.u32 8388607, %v380_v33  ;;  %v390_v63 = vadd.s32 1, %v3720_v22 }
  0xb1   : > { %v954_v17 = vshrl.u32 %v936_v15, %v952_v21  ;;  %v957_v46 = vadd.s32 127, %v956_v60  ;;  %v735_v29 = vsel %vm721_vm4, %v732_v5, %v734_v56  ;;  %v765_v6 = vmul.u32 %v761_v34, %v738_v43 }
  0xb2   : > { %vm4542_vm6 = vcmp.le.f32.partialorder %v842_v58, 0.7853982  ;;  %v739_v47 = vand.u32 65535, %v735_v29  ;;  %v740_v45 = vshrl.u32 %v735_v29, 16  ;;  %v967_v18 = vsel %vm844_vm3, %v966_v16, %v4461_v59 }
  0xb3   : > { %v955_v15 = vor.u32 %v954_v17, %v953_v23  ;;  %v958_v37 = vshll.u32 %v957_v46, 23  ;;  %v4551_v52 = vsel %vm721_vm4, %v724_v31, %v726_v36  ;;  %v763_v50 = vmul.u32 %v761_v34, %v4480_v19 }
  0xb4   : > { %v764_v12 = vmul.u32 %v762_v51, %v4480_v19  ;;  %v741_v2 = vmul.u32 %v739_v47, %v4480_v19  ;;  %v742_v55 = vmul.u32 %v740_v45, %v4480_v19  ;;  %v743_v57 = vmul.u32 %v739_v47, %v738_v43 }
  0xb5   : > { %v959_v58 = vor.u32 4788187, %v958_v37  ;;  %v962_v13 = vcvt.s32.f32 %v955_v15  ;;  %v766_v22 = vmul.u32 %v762_v51, %v738_v43  ;;  %v769_v54 = vshll.u32 %v765_v6, 16 }
  0xb6   : > { %v767_v53 = vshll.u32 %v764_v12, 16  ;;  %v744_v59 = vmul.u32 %v740_v45, %v738_v43  ;;  %v745_v16 = vshll.u32 %v742_v55, 16  ;;  %v768_v48 = vshrl.u32 %v764_v12, 16 }
  0xb7   : > { %v960_v9 = vand.u32 2147483647, %v959_v58  ;;  %v747_v21 = vshll.u32 %v743_v57, 16  ;;  %vm391_vm9 = vcmp.gt.s32.totalorder %v390_v63, 0  ;;  %v746_v36 = vshrl.u32 %v742_v55, 16 }
  0xb8   : > { %vm771_vm7 = vc.u32 %v763_v50, %v767_v53  ;;  %v773_v23 = vadd.s32 %v767_v53, %v763_v50  ;;  %vm749_vm10 = vc.u32 %v741_v2, %v745_v16  ;;  %v751_v5 = vadd.s32 %v745_v16, %v741_v2 }
  0xb9   : > { %v963_v60 = vmul.f32 %v962_v13, %v960_v9  ;;  %v772_v31 = vsel %vm771_vm7, 1, %v4015_v42  ;;  %v750_v19 = vsel %vm749_vm10, 1, %v4015_v42  ;;  %v770_v56 = vshrl.u32 %v765_v6, 16 }
  0xba   : > { %v774_v38 = vadd.s32 %v772_v31, %v766_v22  ;;  %vm775_vm11 = vc.u32 %v773_v23, %v769_v54  ;;  %v752_v17 = vadd.s32 %v750_v19, %v744_v59  ;;  %vm753_vm12 = vc.u32 %v751_v5, %v747_v21 }
  0xbb   : > { %v964_v34 = vxor.u32 2147483648, %v963_v60  ;;  %v776_v43 = vsel %vm775_vm11, 1, %v4015_v42  ;;  %v754_v46 = vsel %vm753_vm12, 1, %v4015_v42  ;;  %v392_v29 = vsel %vm391_vm9, %v390_v63, 0 }
  0xbc   : > { %v778_v51 = vadd.s32 %v776_v43, %v774_v38  ;;  %v748_v37 = vshrl.u32 %v743_v57, 16  ;;  %v756_v47 = vadd.s32 %v754_v46, %v752_v17  ;;  %v394_v45 = vand.u32 31, %v392_v29 }
  0xbd   : > { %v965_v15 = vsel %vm844_vm3, %v964_v34, %v963_v60  ;;  %v388_v58 = vor.u32 8388608, %v4538_v25  ;;  %v4568_v55 = vadd.s32 %v773_v23, %v769_v54  ;;  %v4574_v63 = vsel %vm4542_vm6, 0, %v967_v18 }
  0xbe   : > { %v968_v50 = vsel %vm4542_vm6, %v4171_v10, %v965_v15  ;;  %v779_v12 = vadd.s32 %v778_v51, %v768_v48  ;;  %v757_v2 = vadd.s32 %v756_v47, %v746_v36  ;;  %v4570_v6 = vsub.s32 32, %v394_v45 }
  0xbf   : > { %v970_v13 = vmul.f32 %v968_v50, %v968_v50  ;;  %v781_v22 = vmul.u32 %v4463_v7, %v4551_v52  ;;  %v397_v53 = vshll.u32 %v6112_v24, %v394_v45  ;;  %v400_v25 = vshll.u32 %v4010_v26, %v394_v45 }
  0xc0   : > { %v780_v57 = vadd.s32 %v779_v12, %v770_v56  ;;  %v4579_v59 = vadd.s32 %v757_v2, %v748_v37  ;;  %v398_v16 = vshrl.u32 %v4010_v26, %v4570_v6  ;;  %v401_v27 = vshrl.u32 %v4011_v28, %v4570_v6 }
  0xc1   : > { %v971_v10 = vmul.f32 -0.001358992, %v970_v13  ;;  %v978_v9 = vmul.f32 -0.00019511016, %v970_v13  ;;  %v403_v18 = vshll.u32 %v4011_v28, %v394_v45  ;;  %v404_v7 = vshrl.u32 %v4012_v30, %v4570_v6 }
  0xc2   : > { %v784_v54 = vadd.s32 1, %v780_v57  ;;  %vm783_vm13 = vc.u32 %v4579_v59, %v4568_v55  ;;  %v986_v52 = vand.u32 3, %v4574_v63  ;;  %v4592_v60 = vshrl.u32 %v392_v29, 5 }
  0xc3   : > { %v972_v48 = vadd.f32 0.041655596, %v971_v10  ;;  %v979_v21 = vadd.f32 0.008332121, %v978_v9  ;;  %v406_v5 = vshll.u32 %v4012_v30, %v394_v45  ;;  %v399_v38 = vor.u32 %v398_v16, %v397_v53 }
  0xc4   : > { %v785_v23 = vsel %vm783_vm13, %v784_v54, %v780_v57  ;;  %v4595_v34 = vor.u32 %v401_v27, %v400_v25  ;;  %v407_v17 = vshrl.u32 %v4013_v32, %v4570_v6  ;;  %v409_v43 = vshll.u32 %v4013_v32, %v394_v45 }
  0xc5   : > { %v973_v31 = vmul.f32 %v972_v48, %v970_v13  ;;  %v980_v36 = vmul.f32 %v979_v21, %v970_v13  ;;  %v786_v19 = vadd.s32 %v785_v23, %v781_v22  ;;  %v410_v46 = vshrl.u32 %v4014_v41, %v4570_v6 }
  0xc6   : > { %v4602_v15 = vor.u32 %v404_v7, %v403_v18  ;;  %v408_v37 = vor.u32 %v407_v17, %v406_v5  ;;  %vm412_vm15 = vcmp.lt.s32.totalorder %v4592_v60, 1  ;;  %vm414_vm0 = vcmp.lt.s32.totalorder %v4592_v60, 3 }
  0xc7   : > { %v974_v56 = vadd.f32 -0.4999988, %v973_v31  ;;  %v981_v51 = vadd.f32 -0.16666654, %v980_v36  ;;  %v787_v29 = vadd.s32 536870912, %v786_v19  ;;  %v411_v47 = vor.u32 %v410_v46, %v409_v43  ;;  %v4643_v36 = vld [vmem:[%s4152_s17 + $0x20] sm:$0xff] }
  0xc8   : > { %vm415_vm1 = vcmp.lt.s32.totalorder %v4592_v60, 4  ;;  %vm987_vm2 = vcmp.lt.s32.totalorder %v986_v52, 2  ;;  %vm413_vm3 = vcmp.lt.s32.totalorder %v4592_v60, 2  ;;  %v4612_v22 = vshll.u32 %v388_v58, 8  ;;  %6168 = vst [vmem:[#allocation14_spill] sm:$0xff] %v4643_v36 }
  0xc9   : > { %v975_v12 = vmul.f32 %v974_v56, %v970_v13  ;;  %v982_v2 = vmul.f32 %v981_v51, %v970_v13  ;;  %v4606_v57 = vshrl.u32 %v787_v29, 30  ;;  %v421_v45 = vsel %vm415_vm1, %v408_v37, 920167782 }
  0xca   : > { %v420_v13 = vsel %vm412_vm15, %v399_v38, %v4595_v34  ;;  %vm988_vm4 = vcmp.eq.s32.totalorder %v986_v52, 0  ;;  %vm991_vm5 = vcmp.eq.s32.totalorder %v986_v52, 2  ;;  %v422_v25 = vsel %vm414_vm0, %v4602_v15, %v421_v45 }
  0xcb   : > { %v4614_v53 = vadd.f32 1.0, %v975_v12  ;;  %v983_v10 = vadd.f32 1.0, %v982_v2  ;;  %v789_v9 = vshll.u32 %v4606_v57, 30  ;;  %v425_v58 = vsel %vm415_vm1, %v411_v47, 1326507024 }
  0xcc   : > { %v424_v18 = vsel %vm412_vm15, %v4595_v34, %v4602_v15  ;;  %v423_v48 = vsel %vm413_vm3, %v420_v13, %v422_v25  ;;  %v426_v21 = vsel %vm414_vm0, %v408_v37, %v425_v58  ;;  %v429_v7 = vand.u32 65535, %v4612_v22 }
  0xcd   : > { %v4625_v54 = vmul.f32 %v983_v10, %v968_v50  ;;  %v6101_v16 = vxor.u32 2147483648, %v4614_v53  ;;  %v790_v27 = vsub.s32 %v786_v19, %v789_v9  ;;  %v430_v23 = vshrl.u32 %v4612_v22, 16 }
  0xce   : > { %vm985_vm7 = vweird.f32 %v4643_v36  ;;  %v396_v19 = vshrl.u32 %v6112_v24, %v4570_v6  ;;  %v427_v17 = vsel %vm413_vm3, %v424_v18, %v426_v21  ;;  %v454_v43 = vshrl.u32 %v423_v48, 16 }
  0xcf   : > { %v6102_v50 = vxor.u32 2147483648, %v4625_v54  ;;  %v993_v5 = vsel %vm991_vm5, %v6101_v16, %v4625_v54  ;;  %vm791_vm6 = vcmp.lt.s32.totalorder %v790_v27, 0  ;;  %v792_v31 = vsub.s32 0, %v790_v27 }
  0xd0   : > { %v431_v51 = vand.u32 65535, %v427_v17  ;;  %v432_v29 = vshrl.u32 %v427_v17, 16  ;;  %v453_v12 = vand.u32 65535, %v423_v48  ;;  %v456_v2 = vmul.u32 %v454_v43, %v429_v7 }
  0xd1   : > { %v990_v46 = vsel %vm988_vm4, %v4614_v53, %v6102_v50  ;;  %v793_v56 = vsel %vm791_vm6, %v792_v31, %v790_v27  ;;  %v782_v25 = vadd.s32 %v4568_v55, %v4579_v59  ;;  %v416_v58 = vsel %vm412_vm15, %v396_v19, %v399_v38 }
  0xd2   : > { %v994_v37 = vsel %vm987_vm2, %v990_v46, %v993_v5  ;;  %v794_v47 = vclz %v793_v56  ;;  %v433_v45 = vmul.u32 %v431_v51, %v429_v7  ;;  %v434_v10 = vmul.u32 %v432_v29, %v429_v7 }
  0xd3   : > { %v995_v6 = vsel %vm985_vm7, nan, %v994_v37  ;;  %v435_v9 = vmul.u32 %v431_v51, %v430_v23  ;;  %v436_v48 = vmul.u32 %v432_v29, %v430_v23  ;;  %v455_v21 = vmul.u32 %v453_v12, %v429_v7 }
  0xd4   : > { %2714 = vrot.lane.b32.xlu2 %v995_v6, %s4016_s23  ;;  %v3727_v13 = vadd.s32 4294967294, %v794_v47  ;;  %v437_v52 = vshll.u32 %v434_v10, 16  ;;  %v457_v5 = vmul.u32 %v453_v12, %v430_v23  ;;  %v459_v46 = vshll.u32 %v456_v2, 16 }
  0xd5   : > { %v439_v18 = vshll.u32 %v435_v9, 16  ;;  %v417_v55 = vsel %vm415_vm1, %v4602_v15, 2102212464  ;;  %v438_v59 = vshrl.u32 %v434_v10, 16  ;;  %v458_v19 = vmul.u32 %v454_v43, %v430_v23  ;;  %v4669_v10 = vld [vmem:[%s4152_s17 + $0x28] sm:$0xff] }
  0xd6   : > { %vm3728_vm9 = vcmp.lt.s32.totalorder %v3727_v13, 0  ;;  %vm441_vm10 = vc.u32 %v433_v45, %v437_v52  ;;  %v443_v17 = vadd.s32 %v437_v52, %v433_v45  ;;  %v440_v6 = vshrl.u32 %v435_v9, 16 }
  0xd7   : > { %v797_v31 = vsel %vm3728_vm9, 0, %v3727_v13  ;;  %v442_v38 = vsel %vm441_vm10, 1, %v4015_v42  ;;  %v461_v45 = vshll.u32 %v457_v5, 16  ;;  %vm463_vm12 = vc.u32 %v455_v21, %v459_v46 }
  0xd8   : > { %v798_v56 = vsub.s32 32, %v797_v31  ;;  %v799_v51 = vshll.u32 %v790_v27, %v797_v31  ;;  %v802_v37 = vsub.s32 4294967266, %v797_v31  ;;  %vm445_vm11 = vc.u32 %v443_v17, %v439_v18 }
  0xd9   : > { %v444_v47 = vadd.s32 %v442_v38, %v436_v48  ;;  %v446_v12 = vsel %vm445_vm11, 1, %v4015_v42  ;;  %v465_v27 = vadd.s32 %v459_v46, %v455_v21  ;;  %v464_v15 = vsel %vm463_vm12, 1, %v4015_v42 }
  0xda   : > { %v800_v29 = vshrl.u32 %v782_v25, %v798_v56  ;;  %v803_v7 = vadd.s32 127, %v802_v37  ;;  %v418_v23 = vsel %vm414_vm0, %v4595_v34, %v417_v55  ;;  %v460_v43 = vshrl.u32 %v456_v2, 16  ;;  %v4678_v37 = vld [vmem:[%s4152_s17 + $0x38] sm:$0xff] }
  0xdb   : > { %v448_v31 = vadd.s32 %v446_v12, %v444_v47  ;;  %v466_v25 = vadd.s32 %v464_v15, %v458_v19  ;;  %vm467_vm13 = vc.u32 %v465_v27, %v461_v45  ;;  %v812_v17 = vsub.s32 4, %v4606_v57 }
  0xdc   : > { %v801_v13 = vor.u32 %v800_v29, %v799_v51  ;;  %v804_v52 = vshll.u32 %v803_v7, 23  ;;  %v468_v21 = vsel %vm467_vm13, 1, %v4015_v42  ;;  %v462_v46 = vshrl.u32 %v457_v5, 16 }
  0xdd   : > { %v449_v48 = vadd.s32 %v448_v31, %v438_v59  ;;  %v470_v56 = vadd.s32 %v468_v21, %v466_v25  ;;  %v999_v51 = vand.u32 2139095040, %v4669_v10  ;;  %v469_v7 = vadd.s32 %v465_v27, %v461_v45 }
  0xde   : > { %v805_v18 = vor.u32 4788187, %v804_v52  ;;  %v808_v9 = vcvt.s32.f32 %v801_v13  ;;  %v419_v34 = vsel %vm413_vm3, %v416_v58, %v418_v23  ;;  %vm690_vm15 = vcmp.lt.s32.totalorder %v4338_v61, 0 }
  0xdf   : > { %v450_v29 = vadd.s32 %v449_v48, %v440_v6  ;;  %v471_v2 = vadd.s32 %v470_v56, %v460_v43  ;;  %v1000_v55 = vshrl.u32 %v999_v51, 23  ;;  %v996_v19 = vand.u32 2147483647, %v4669_v10 }
  0xe0   : > { %v806_v38 = vand.u32 2147483647, %v805_v18  ;;  %v1307_v5 = vand.u32 2139095040, %v4678_v37  ;;  %v813_v47 = vsel %vm690_vm15, %v812_v17, %v4606_v57  ;;  %vm689_vm0 = vcmp.le.f32.partialorder %v688_v35, 0.7853982 }
  0xe1   : > { %v472_v12 = vadd.s32 %v471_v2, %v462_v46  ;;  %v3732_v13 = vadd.s32 4294967169, %v1000_v55  ;;  %v473_v60 = vmul.u32 %v4612_v22, %v419_v34  ;;  %vm475_vm1 = vc.u32 %v450_v29, %v469_v7 }
  0xe2   : > { %v809_v59 = vmul.f32 %v808_v9, %v806_v38  ;;  %v4689_v52 = vsel %vm689_vm0, 0, %v813_v47  ;;  %v1003_v31 = vand.u32 8388607, %v996_v19  ;;  %v1308_v15 = vshrl.u32 %v1307_v5, 23 }
  0xe3   : > { %v476_v58 = vadd.s32 1, %v472_v12  ;;  %v1006_v45 = vadd.s32 1, %v3732_v13  ;;  %v6109_v43 = vand.u32 2147483647, %v4678_v37  ;;  %v4696_v22 = vand.u32 3, %v4689_v52 }
  0xe4   : > { %v810_v6 = vxor.u32 2147483648, %v809_v59  ;;  %v3738_v46 = vadd.s32 4294967169, %v1308_v15  ;;  %v4698_v56 = vadd.s32 %v469_v7, %v450_v29  ;;  %v1004_v51 = vor.u32 8388608, %v1003_v31 }
  0xe5   : > { %v477_v23 = vsel %vm475_vm1, %v476_v58, %v472_v12  ;;  %vm1007_vm2 = vcmp.gt.s32.totalorder %v1006_v45, 0  ;;  %v4702_v34 = vand.u32 8388607, %v6109_v43  ;;  %vm837_vm3 = vcmp.eq.s32.totalorder %v4696_v22, 2 }
  0xe6   : > { %v811_v27 = vsel %vm690_vm15, %v810_v6, %v809_v59  ;;  %v478_v25 = vadd.s32 %v477_v23, %v473_v60  ;;  %v1008_v18 = vsel %vm1007_vm2, %v1006_v45, 0  ;;  %v1314_v58 = vadd.s32 1, %v3738_v46 }
  0xe7   : > { %v814_v57 = vsel %vm689_vm0, %v4338_v61, %v811_v27  ;;  %v1010_v9 = vand.u32 31, %v1008_v18  ;;  %vm834_vm4 = vcmp.eq.s32.totalorder %v4696_v22, 0  ;;  %v4714_v45 = vshrl.u32 %v1008_v18, 5 }
  0xe8   : > { %v816_v35 = vmul.f32 %v814_v57, %v814_v57  ;;  %v479_v17 = vadd.s32 536870912, %v478_v25  ;;  %vm833_vm5 = vcmp.lt.s32.totalorder %v4696_v22, 2  ;;  %vm831_vm6 = vweird.f32 %v4338_v61 }
  0xe9   : > { %v1011_v38 = vsub.s32 32, %v1010_v9  ;;  %v1013_v5 = vshll.u32 %v6112_v24, %v1010_v9  ;;  %v1016_v12 = vshll.u32 %v4010_v26, %v1010_v9  ;;  %v1022_v7 = vshll.u32 %v4012_v30, %v1010_v9 }
  0xea   : > { %v817_v48 = vmul.f32 -0.001358992, %v816_v35  ;;  %v824_v21 = vmul.f32 -0.00019511016, %v816_v35  ;;  %v4704_v59 = vshrl.u32 %v479_v17, 30  ;;  %v1019_v27 = vshll.u32 %v4011_v28, %v1010_v9 }
  0xeb   : > { %v1014_v47 = vshrl.u32 %v4010_v26, %v1011_v38  ;;  %v1017_v29 = vshrl.u32 %v4011_v28, %v1011_v38  ;;  %v1020_v31 = vshrl.u32 %v4012_v30, %v1011_v38  ;;  %v1023_v15 = vshrl.u32 %v4013_v32, %v1011_v38 }
  0xec   : > { %v818_v2 = vadd.f32 0.041655596, %v817_v48  ;;  %v825_v55 = vadd.f32 0.008332121, %v824_v21  ;;  %v481_v60 = vshll.u32 %v4704_v59, 30  ;;  %v1025_v18 = vshll.u32 %v4013_v32, %v1010_v9 }
  0xed   : > { %v1015_v17 = vor.u32 %v1014_v47, %v1013_v5  ;;  %v1018_v46 = vor.u32 %v1017_v29, %v1016_v12  ;;  %vm1028_vm10 = vcmp.lt.s32.totalorder %v4714_v45, 1  ;;  %vm1030_vm11 = vcmp.lt.s32.totalorder %v4714_v45, 3 }
  0xee   : > { %v819_v13 = vmul.f32 %v818_v2, %v816_v35  ;;  %v826_v6 = vmul.f32 %v825_v55, %v816_v35  ;;  %v4720_v21 = vsub.s32 %v478_v25, %v481_v60  ;;  %v1024_v2 = vor.u32 %v1023_v15, %v1022_v7 }
  0xef   : > { %v1026_v55 = vshrl.u32 %v4014_v41, %v1011_v38  ;;  %v4729_v25 = vshll.u32 %v1004_v51, 8  ;;  %vm1031_vm12 = vcmp.lt.s32.totalorder %v4714_v45, 4  ;;  %vm1029_vm13 = vcmp.lt.s32.totalorder %v4714_v45, 2 }
  0xf0   : > { %v820_v23 = vadd.f32 -0.4999988, %v819_v13  ;;  %v827_v48 = vadd.f32 -0.16666654, %v826_v6  ;;  %vm483_vm9 = vcmp.lt.s32.totalorder %v4720_v21, 0  ;;  %v484_v13 = vsub.s32 0, %v4720_v21 }
  0xf1   : > { %v1021_v6 = vor.u32 %v1020_v31, %v1019_v27  ;;  %vm1315_vm15 = vcmp.gt.s32.totalorder %v1314_v58, 0  ;;  %v1036_v51 = vsel %vm1028_vm10, %v1015_v17, %v1018_v46  ;;  %vm382_vm0 = vcmp.lt.s32.totalorder %v4457_v49, 0 }
  0xf2   : > { %v821_v16 = vmul.f32 %v820_v23, %v816_v35  ;;  %v828_v50 = vmul.f32 %v827_v48, %v816_v35  ;;  %v485_v9 = vsel %vm483_vm9, %v484_v13, %v4720_v21  ;;  %v1027_v35 = vor.u32 %v1026_v55, %v1025_v18 }
  0xf3   : > { %v486_v12 = vclz %v485_v9  ;;  %v1045_v27 = vand.u32 65535, %v4729_v25  ;;  %v1046_v31 = vshrl.u32 %v4729_v25, 16  ;;  %v1012_v23 = vshrl.u32 %v6112_v24, %v1011_v38 }
  0xf4   : > { %v4731_v5 = vadd.f32 1.0, %v821_v16  ;;  %v829_v47 = vadd.f32 1.0, %v828_v50  ;;  %v1037_v16 = vsel %vm1031_vm12, %v1024_v2, 920167782  ;;  %v1316_v48 = vsel %vm1315_vm15, %v1314_v58, 0 }
  0xf5   : > { %v3721_v50 = vadd.s32 4294967294, %v486_v12  ;;  %v1038_v60 = vsel %vm1030_vm11, %v1021_v6, %v1037_v16  ;;  %v1033_v18 = vsel %vm1031_vm12, %v1021_v6, 2102212464  ;;  %v1040_v13 = vsel %vm1028_vm10, %v1018_v46, %v1021_v6 }
  0xf6   : > { %v4736_v29 = vmul.f32 %v829_v47, %v814_v57  ;;  %v6103_v7 = vxor.u32 2147483648, %v4731_v5  ;;  %v1039_v55 = vsel %vm1029_vm13, %v1036_v51, %v1038_v60  ;;  %v1041_v38 = vsel %vm1031_vm12, %v1027_v35, 1326507024 }
  0xf7   : > { %vm3722_vm1 = vcmp.lt.s32.totalorder %v3721_v50, 0  ;;  %v1069_v58 = vand.u32 65535, %v1039_v55  ;;  %v4785_v8 = vshrl.u32 %v1316_v48, 5  ;;  %vm4789_vm2 = vcmp.le.f32.partialorder %v380_v33, 0.7853982 }
  0xf8   : > { %v6104_v57 = vxor.u32 2147483648, %v4736_v29  ;;  %v839_v15 = vsel %vm837_vm3, %v6103_v7, %v4736_v29  ;;  %v489_v9 = vsel %vm3722_vm1, 0, %v3721_v50  ;;  %v504_v7 = vsub.s32 4, %v4704_v59 }
  0xf9   : > { %v490_v16 = vsub.s32 32, %v489_v9  ;;  %v491_v51 = vshll.u32 %v4720_v21, %v489_v9  ;;  %v494_v60 = vsub.s32 4294967266, %v489_v9  ;;  %v1034_v50 = vsel %vm1030_vm11, %v1018_v46, %v1033_v18 }
  0xfa   : > { %v836_v47 = vsel %vm834_vm4, %v4731_v5, %v6104_v57  ;;  %v1032_v57 = vsel %vm1028_vm10, %v1012_v23, %v1015_v17  ;;  %v1042_v21 = vsel %vm1030_vm11, %v1024_v2, %v1041_v38  ;;  %v1073_v9 = vmul.u32 %v1069_v58, %v1046_v31 }
  0xfb   : > { %v840_v12 = vsel %vm833_vm5, %v836_v47, %v839_v15  ;;  %v492_v22 = vshrl.u32 %v4698_v56, %v490_v16  ;;  %v495_v35 = vadd.s32 127, %v494_v60  ;;  %v1070_v15 = vshrl.u32 %v1039_v55, 16 }
  0xfc   : > { %v841_v6 = vsel %vm831_vm6, nan, %v840_v12  ;;  %v1043_v47 = vsel %vm1029_vm13, %v1040_v13, %v1042_v21  ;;  %v1312_v12 = vor.u32 8388608, %v4702_v34  ;;  %v505_v2 = vsel %vm382_vm0, %v504_v7, %v4704_v59 }
  0xfd   : > { %2712 = vrot.lane.b32.xlu1 %v841_v6, %s4016_s23  ;;  %v493_v56 = vor.u32 %v492_v22, %v491_v51  ;;  %v496_v46 = vshll.u32 %v495_v35, 23  ;;  %v1047_v23 = vand.u32 65535, %v1043_v47  ;;  %v1048_v18 = vshrl.u32 %v1043_v47, 16 }
  0xfe   : > { %v4798_v55 = vsel %vm1029_vm13, %v1032_v57, %v1034_v50  ;;  %v1071_v13 = vmul.u32 %v1069_v58, %v1045_v27  ;;  %v1072_v38 = vmul.u32 %v1070_v15, %v1045_v27  ;;  %v1074_v44 = vmul.u32 %v1070_v15, %v1046_v31 }
  0xff   : > { %v497_v16 = vor.u32 4788187, %v496_v46  ;;  %v500_v60 = vcvt.s32.f32 %v493_v56  ;;  %v1049_v33 = vmul.u32 %v1047_v23, %v1045_v27  ;;  %v1050_v6 = vmul.u32 %v1048_v18, %v1045_v27 }
 0x100   : > { %v1051_v21 = vmul.u32 %v1047_v23, %v1046_v31  ;;  %v1075_v51 = vshll.u32 %v1072_v38, 16  ;;  %v1077_v22 = vshll.u32 %v1073_v9, 16  ;;  %v1052_v47 = vmul.u32 %v1048_v18, %v1046_v31 }
 0x101   : > { %v498_v35 = vand.u32 2147483647, %v497_v16  ;;  %v1053_v11 = vshll.u32 %v1050_v6, 16  ;;  %v1076_v14 = vshrl.u32 %v1072_v38, 16  ;;  %v1318_v45 = vand.u32 31, %v1316_v48 }
 0x102   : > { %v1055_v43 = vshll.u32 %v1051_v21, 16  ;;  %vm1079_vm3 = vc.u32 %v1071_v13, %v1075_v51  ;;  %v1081_v59 = vadd.s32 %v1075_v51, %v1071_v13  ;;  %v1054_v50 = vshrl.u32 %v1050_v6, 16 }
 0x103   : > { %v501_v7 = vmul.f32 %v500_v60, %v498_v35  ;;  %vm1057_vm4 = vc.u32 %v1049_v33, %v1053_v11  ;;  %v1059_v57 = vadd.s32 %v1053_v11, %v1049_v33  ;;  %v1080_v58 = vsel %vm1079_vm3, 1, %v4015_v42 }
 0x104   : > { %v1058_v27 = vsel %vm1057_vm4, 1, %v4015_v42  ;;  %v1082_v56 = vadd.s32 %v1080_v58, %v1074_v44  ;;  %vm1083_vm5 = vc.u32 %v1081_v59, %v1077_v22  ;;  %v1078_v18 = vshrl.u32 %v1073_v9, 16 }
 0x105   : > { %v502_v15 = vxor.u32 2147483648, %v501_v7  ;;  %v1060_v46 = vadd.s32 %v1058_v27, %v1052_v47  ;;  %vm1061_vm9 = vc.u32 %v1059_v57, %v1055_v43  ;;  %v1084_v31 = vsel %vm1083_vm5, 1, %v4015_v42 }
 0x106   : > { %v1062_v23 = vsel %vm1061_vm9, 1, %v4015_v42  ;;  %v1086_v13 = vadd.s32 %v1084_v31, %v1082_v56  ;;  %v4804_v48 = vsub.s32 32, %v1318_v45  ;;  %v4810_v38 = vsel %vm4789_vm2, 0, %v505_v2 }
 0x107   : > { %v503_v11 = vsel %vm382_vm0, %v502_v15, %v501_v7  ;;  %v1056_v44 = vshrl.u32 %v1051_v21, 16  ;;  %v1064_v16 = vadd.s32 %v1062_v23, %v1060_v46  ;;  %v4815_v60 = vadd.s32 %v1081_v59, %v1077_v22 }
 0x108   : > { %v506_v43 = vsel %vm4789_vm2, %v4457_v49, %v503_v11  ;;  %v1087_v33 = vadd.s32 %v1086_v13, %v1076_v14  ;;  %v1089_v9 = vmul.u32 %v4729_v25, %v4798_v55  ;;  %v1321_v35 = vshll.u32 %v6112_v24, %v1318_v45 }
 0x109   : > { %v508_v6 = vmul.f32 %v506_v43, %v506_v43  ;;  %v1065_v51 = vadd.s32 %v1064_v16, %v1054_v50  ;;  %v1324_v47 = vshll.u32 %v4010_v26, %v1318_v45  ;;  %v1322_v21 = vshrl.u32 %v4010_v26, %v4804_v48 }
 0x10a   : > { %v1088_v2 = vadd.s32 %v1087_v33, %v1078_v18  ;;  %v1330_v7 = vshll.u32 %v4012_v30, %v1318_v45  ;;  %v1331_v17 = vshrl.u32 %v4013_v32, %v4804_v48  ;;  %v1325_v25 = vshrl.u32 %v4011_v28, %v4804_v48 }
 0x10b   : > { %v509_v22 = vmul.f32 -0.001358992, %v508_v6  ;;  %v516_v14 = vmul.f32 -0.00019511016, %v508_v6  ;;  %v4826_v59 = vadd.s32 %v1065_v51, %v1056_v44  ;;  %v1327_v57 = vshll.u32 %v4011_v28, %v1318_v45 }
 0x10c   : > { %v1092_v55 = vadd.s32 1, %v1088_v2  ;;  %v1328_v58 = vshrl.u32 %v4012_v30, %v4804_v48  ;;  %v1333_v50 = vshll.u32 %v4013_v32, %v1318_v45  ;;  %v524_v15 = vand.u32 3, %v4810_v38 }
 0x10d   : > { %v510_v27 = vadd.f32 0.041655596, %v509_v22  ;;  %v517_v56 = vadd.f32 0.008332121, %v516_v14  ;;  %vm1091_vm10 = vc.u32 %v4826_v59, %v4815_v60  ;;  %v4837_v31 = vor.u32 %v1322_v21, %v1321_v35 }
 0x10e   : > { %v1093_v46 = vsel %vm1091_vm10, %v1092_v55, %v1088_v2  ;;  %v1332_v23 = vor.u32 %v1331_v17, %v1330_v7  ;;  %v1334_v18 = vshrl.u32 %v4014_v41, %v4804_v48  ;;  %v4841_v16 = vor.u32 %v1325_v25, %v1324_v47 }
 0x10f   : > { %v511_v13 = vmul.f32 %v510_v27, %v508_v6  ;;  %v518_v11 = vmul.f32 %v517_v56, %v508_v6  ;;  %v1094_v44 = vadd.s32 %v1093_v46, %v1089_v9  ;;  %v4843_v45 = vor.u32 %v1328_v58, %v1327_v57 }
 0x110   : > { %v1335_v33 = vor.u32 %v1334_v18, %v1333_v50  ;;  %vm1336_vm11 = vcmp.lt.s32.totalorder %v4785_v8, 1  ;;  %vm1339_vm12 = vcmp.lt.s32.totalorder %v4785_v8, 4  ;;  %vm1338_vm13 = vcmp.lt.s32.totalorder %v4785_v8, 3 }
 0x111   : > { %v512_v51 = vadd.f32 -0.4999988, %v511_v13  ;;  %v519_v2 = vadd.f32 -0.16666654, %v518_v11  ;;  %v1095_v35 = vadd.s32 536870912, %v1094_v44  ;;  %vm1337_vm15 = vcmp.lt.s32.totalorder %v4785_v8, 2 }
 0x112   : > { %v1345_v21 = vsel %vm1339_vm12, %v1332_v23, 920167782  ;;  %v1344_v17 = vsel %vm1336_vm11, %v4837_v31, %v4841_v16  ;;  %vm525_vm0 = vcmp.lt.s32.totalorder %v524_v15, 2  ;;  %v1349_v14 = vsel %vm1339_vm12, %v1335_v33, 1326507024 }
 0x113   : > { %v513_v9 = vmul.f32 %v512_v51, %v508_v6  ;;  %v520_v47 = vmul.f32 %v519_v2, %v508_v6  ;;  %v4851_v7 = vshrl.u32 %v1095_v35, 30  ;;  %v1346_v22 = vsel %vm1338_vm13, %v4843_v45, %v1345_v21 }
 0x114   : > { %v4864_v25 = vshll.u32 %v1312_v12, 8  ;;  %v1348_v58 = vsel %vm1336_vm11, %v4841_v16, %v4843_v45  ;;  %vm529_vm1 = vcmp.eq.s32.totalorder %v524_v15, 2  ;;  %v1347_v50 = vsel %vm1337_vm15, %v1344_v17, %v1346_v22 }
 0x115   : > { %v4866_v6 = vadd.f32 1.0, %v513_v9  ;;  %v521_v55 = vadd.f32 1.0, %v520_v47  ;;  %v1097_v57 = vshll.u32 %v4851_v7, 30  ;;  %v1350_v27 = vsel %vm1338_vm13, %v1332_v23, %v1349_v14 }
 0x116   : > { %v1353_v34 = vand.u32 65535, %v4864_v25  ;;  %vm526_vm2 = vcmp.eq.s32.totalorder %v524_v15, 0  ;;  %v1351_v18 = vsel %vm1337_vm15, %v1348_v58, %v1350_v27  ;;  %v1354_v13 = vshrl.u32 %v4864_v25, 16 }
 0x117   : > { %v4878_v12 = vmul.f32 %v521_v55, %v506_v43  ;;  %v6110_v56 = vxor.u32 2147483648, %v4866_v6  ;;  %v1098_v46 = vsub.s32 %v1094_v44, %v1097_v57  ;;  %v1377_v11 = vand.u32 65535, %v1347_v50 }
 0x118   : > { %v1378_v33 = vshrl.u32 %v1347_v50, 16  ;;  %vm523_vm4 = vweird.f32 %v4457_v49  ;;  %v1355_v2 = vand.u32 65535, %v1351_v18  ;;  %v1356_v35 = vshrl.u32 %v1351_v18, 16 }
 0x119   : > { %v6111_v51 = vxor.u32 2147483648, %v4878_v12  ;;  %v531_v23 = vsel %vm529_vm1, %v6110_v56, %v4878_v12  ;;  %vm1099_vm3 = vcmp.lt.s32.totalorder %v1098_v46, 0  ;;  %v1100_v43 = vsub.s32 0, %v1098_v46 }
 0x11a   : > { %v4889_v44 = vmul.u32 %v1378_v33, %v1353_v34  ;;  %v1357_v22 = vmul.u32 %v1355_v2, %v1353_v34  ;;  %v1358_v14 = vmul.u32 %v1356_v35, %v1353_v34  ;;  %v1359_v57 = vmul.u32 %v1355_v2, %v1354_v13 }
 0x11b   : > { %v528_v21 = vsel %vm526_vm2, %v4866_v6, %v6111_v51  ;;  %v1101_v9 = vsel %vm1099_vm3, %v1100_v43, %v1098_v46  ;;  %v1379_v58 = vmul.u32 %v1377_v11, %v1353_v34  ;;  %v1320_v56 = vshrl.u32 %v6112_v24, %v4804_v48 }
 0x11c   : > { %v532_v47 = vsel %vm525_vm0, %v528_v21, %v531_v23  ;;  %v1102_v17 = vclz %v1101_v9  ;;  %v1383_v50 = vshll.u32 %v4889_v44, 16  ;;  %v1361_v18 = vshll.u32 %v1358_v14, 16 }
 0x11d   : > { %v533_v55 = vsel %vm523_vm4, nan, %v532_v47  ;;  %v1360_v43 = vmul.u32 %v1356_v35, %v1354_v13  ;;  %v1363_v15 = vshll.u32 %v1359_v57, 16  ;;  %v1381_v23 = vmul.u32 %v1377_v11, %v1354_v13 }
 0x11e   : > { %2708 = vrot.lane.b32.xlu0 %v533_v55, %s4016_s23  ;;  %v3733_v27 = vadd.s32 4294967294, %v1102_v17  ;;  %v1090_v21 = vadd.s32 %v4815_v60, %v4826_v59  ;;  %vm1365_vm9 = vc.u32 %v1357_v22, %v1361_v18  ;;  %v1382_v2 = vmul.u32 %v1378_v33, %v1354_v13  ;;  %v4908_v59 = vld [vmem:[%s4152_s17 + $0x30] sm:$0xff]  ;;  %s5706_s17 = sld [smem:[#allocation6 + $0x7]] }
 0x11f   : > { %v1366_v9 = vsel %vm1365_vm9, 1, %v4015_v42  ;;  %v1367_v47 = vadd.s32 %v1361_v18, %v1357_v22  ;;  %vm1387_vm10 = vc.u32 %v1379_v58, %v1383_v50  ;;  %v1341_v48 = vsel %vm1339_vm12, %v4843_v45, 2102212464 }
 0x120   : > { %vm3734_vm5 = vcmp.lt.s32.totalorder %v3733_v27, 0  ;;  %v1362_v11 = vshrl.u32 %v1358_v14, 16  ;;  %v1368_v35 = vadd.s32 %v1366_v9, %v1360_v43  ;;  %v1385_v60 = vshll.u32 %v1381_v23, 16 }
 0x121   : > { %v1105_v34 = vsel %vm3734_vm5, 0, %v3733_v27  ;;  %vm1369_vm0 = vc.u32 %v1367_v47, %v1363_v15  ;;  %v1388_v22 = vsel %vm1387_vm10, 1, %v4015_v42  ;;  %v1389_v18 = vadd.s32 %v1383_v50, %v1379_v58 }
 0x122   : > { %v1106_v17 = vsub.s32 32, %v1105_v34  ;;  %v1107_v55 = vshll.u32 %v1098_v46, %v1105_v34  ;;  %v1110_v51 = vsub.s32 4294967266, %v1105_v34  ;;  %v1370_v33 = vsel %vm1369_vm0, 1, %v4015_v42 }
 0x123   : > { %v1340_v46 = vsel %vm1336_vm11, %v1320_v56, %v4837_v31  ;;  %v1372_v27 = vadd.s32 %v1370_v33, %v1368_v35  ;;  %v1390_v34 = vadd.s32 %v1388_v22, %v1382_v2  ;;  %v1364_v43 = vshrl.u32 %v1359_v57, 16 }
 0x124   : > { %v1108_v24 = vshrl.u32 %v1090_v21, %v1106_v17  ;;  %v1111_v13 = vadd.s32 127, %v1110_v51  ;;  %v1153_v15 = vand.u32 2139095040, %v4908_v59  ;;  %v1342_v51 = vsel %vm1338_vm13, %v4841_v16, %v1341_v48 }
 0x125   : > { %v1373_v21 = vadd.s32 %v1372_v27, %v1362_v11  ;;  %v1384_v9 = vshrl.u32 %v4889_v44, 16  ;;  %vm1391_vm12 = vc.u32 %v1389_v18, %v1385_v60  ;;  %v1386_v58 = vshrl.u32 %v1381_v23, 16 }
 0x126   : > { %v1109_v45 = vor.u32 %v1108_v24, %v1107_v55  ;;  %v1112_v14 = vshll.u32 %v1111_v13, 23  ;;  %v1392_v31 = vsel %vm1391_vm12, 1, %v4015_v42  ;;  %v1154_v56 = vshrl.u32 %v1153_v15, 23 }
 0x127   : > { %v1394_v50 = vadd.s32 %v1392_v31, %v1390_v34  ;;  %v4921_v2 = vadd.s32 %v1373_v21, %v1364_v43  ;;  %v4923_v57 = vadd.s32 %v1389_v18, %v1385_v60  ;;  %v1120_v35 = vsub.s32 4, %v4851_v7 }
 0x128   : > { %v1113_v47 = vor.u32 4788187, %v1112_v14  ;;  %v1116_v17 = vcvt.s32.f32 %v1109_v45  ;;  %v3735_v55 = vadd.s32 4294967169, %v1154_v56  ;;  %v1343_v16 = vsel %vm1337_vm15, %v1340_v46, %v1342_v51 }
 0x129   : > { %v1395_v44 = vadd.s32 %v1394_v50, %v1384_v9  ;;  %v6116_v48 = vand.u32 2147483647, %v4908_v59  ;;  %vm997_vm11 = vcmp.le.f32.partialorder %v996_v19, 0.7853982  ;;  %vm998_vm13 = vcmp.lt.s32.totalorder %v4669_v10, 0 }
 0x12a   : > { %v1114_v24 = vand.u32 2147483647, %v1113_v47  ;;  %v1160_v13 = vadd.s32 1, %v3735_v55  ;;  %v1397_v60 = vmul.u32 %v4864_v25, %v1343_v16  ;;  %vm1399_vm1 = vc.u32 %v4921_v2, %v4923_v57 }
 0x12b   : > { %v1396_v23 = vadd.s32 %v1395_v44, %v1386_v58  ;;  %v1121_v8 = vsel %vm998_vm13, %v1120_v35, %v4851_v7  ;;  %v1157_v46 = vand.u32 8388607, %v6116_v48  ;;  %v2067_v0 = vadd.s32 3, %v4689_v52 }
 0x12c   : > { %v1117_v11 = vmul.f32 %v1116_v17, %v1114_v24  ;;  %vm1161_vm2 = vcmp.gt.s32.totalorder %v1160_v13, 0  ;;  %v4939_v14 = vsel %vm997_vm11, 0, %v1121_v8 }
 0x12d   : > { %v1400_v22 = vadd.s32 1, %v1396_v23  ;;  %v1162_v27 = vsel %vm1161_vm2, %v1160_v13, 0  ;;  %v1158_v51 = vor.u32 8388608, %v1157_v46  ;;  %v1140_v13 = vand.u32 3, %v4939_v14 }
 0x12e   : > { %v1118_v33 = vxor.u32 2147483648, %v1117_v11  ;;  %v1164_v34 = vand.u32 31, %v1162_v27  ;;  %v4943_v21 = vshrl.u32 %v1162_v27, 5 }
 0x12f   : > { %v1401_v45 = vsel %vm1399_vm1, %v1400_v22, %v1396_v23  ;;  %v6171_v23 = vmov 683565275   ;;  %v4964_v22 = vshll.u32 %v1158_v51, 8  ;;  %vm1145_vm3 = vcmp.eq.s32.totalorder %v1140_v13, 2 }
 0x130   : > { %v1119_v18 = vsel %vm998_vm13, %v1118_v33, %v1117_v11  ;;  %v1402_v25 = vadd.s32 %v1401_v45, %v1397_v60  ;;  %v4941_v15 = vsub.s32 32, %v1164_v34  ;;  %v1170_v7 = vshll.u32 %v4010_v26, %v1164_v34 }
 0x131   : > { %v1122_v19 = vsel %vm997_vm11, %v4669_v10, %v1119_v18  ;;  %v1173_v9 = vshll.u32 %v4011_v28, %v1164_v34  ;;  %v1176_v56 = vshll.u32 %v4012_v30, %v1164_v34  ;;  %v1179_v55 = vshll.u32 %v4013_v32, %v1164_v34 }
 0x132   : > { %v1124_v43 = vmul.f32 %v1122_v19, %v1122_v19  ;;  %v1403_v31 = vadd.s32 536870912, %v1402_v25  ;;  %v1171_v58 = vshrl.u32 %v4011_v28, %v4941_v15  ;;  %v1174_v50 = vshrl.u32 %v4012_v30, %v4941_v15 }
 0x133   : > { %v1177_v24 = vshrl.u32 %v4013_v32, %v4941_v15  ;;  %v1180_v11 = vshrl.u32 %v4014_v41, %v4941_v15  ;;  %v1167_v33 = vshll.u32 %v6171_v23, %v1164_v34  ;;  %v1168_v28 = vshrl.u32 %v4010_v26, %v4941_v15 }
 0x134   : > { %v1125_v47 = vmul.f32 -0.001358992, %v1124_v43  ;;  %v1132_v17 = vmul.f32 -0.00019511016, %v1124_v43  ;;  %v4955_v44 = vshrl.u32 %v1403_v31, 30  ;;  %v4966_v32 = vor.u32 %v1171_v58, %v1170_v7 }
 0x135   : > { %v4968_v46 = vor.u32 %v1174_v50, %v1173_v9  ;;  %v1178_v27 = vor.u32 %v1177_v24, %v1176_v56  ;;  %v1181_v18 = vor.u32 %v1180_v11, %v1179_v55  ;;  %vm1182_vm15 = vcmp.lt.s32.totalorder %v4943_v21, 1 }
 0x136   : > { %v1126_v35 = vadd.f32 0.041655596, %v1125_v47  ;;  %v1133_v16 = vadd.f32 0.008332121, %v1132_v17  ;;  %v1405_v8 = vshll.u32 %v4955_v44, 30  ;;  %v4971_v34 = vor.u32 %v1168_v28, %v1167_v33 }
 0x137   : > { %vm1184_vm5 = vcmp.lt.s32.totalorder %v4943_v21, 3  ;;  %vm1185_vm9 = vcmp.lt.s32.totalorder %v4943_v21, 4  ;;  %vm1183_vm0 = vcmp.lt.s32.totalorder %v4943_v21, 2  ;;  %vm1142_vm12 = vcmp.eq.s32.totalorder %v1140_v13, 0 }
 0x138   : > { %v1127_v30 = vmul.f32 %v1126_v35, %v1124_v43  ;;  %v1134_v60 = vmul.f32 %v1133_v16, %v1124_v43  ;;  %v1406_v47 = vsub.s32 %v1402_v25, %v1405_v8  ;;  %v1191_v9 = vsel %vm1185_vm9, %v1178_v27, 920167782 }
 0x139   : > { %v1194_v25 = vsel %vm1182_vm15, %v4966_v32, %v4968_v46  ;;  %v1195_v17 = vsel %vm1185_vm9, %v1181_v18, 1326507024  ;;  %v1190_v24 = vsel %vm1182_vm15, %v4971_v34, %v4966_v32  ;;  %v1200_v35 = vshrl.u32 %v4964_v22, 16 }
 0x13a   : > { %v1128_v41 = vadd.f32 -0.4999988, %v1127_v30  ;;  %v1135_v45 = vadd.f32 -0.16666654, %v1134_v60  ;;  %vm1407_vm10 = vcmp.lt.s32.totalorder %v1406_v47, 0  ;;  %v1408_v7 = vsub.s32 0, %v1406_v47 }
 0x13b   : > { %v1196_v55 = vsel %vm1184_vm5, %v1178_v27, %v1195_v17  ;;  %v1192_v33 = vsel %vm1184_vm5, %v4968_v46, %v1191_v9  ;;  %vm1139_vm11 = vweird.f32 %v4669_v10  ;;  %vm1141_vm13 = vcmp.lt.s32.totalorder %v1140_v13, 2 }
 0x13c   : > { %v1129_v26 = vmul.f32 %v1128_v41, %v1124_v43  ;;  %v1136_v51 = vmul.f32 %v1135_v45, %v1124_v43  ;;  %v1409_v58 = vsel %vm1407_vm10, %v1408_v7, %v1406_v47  ;;  %v1199_v43 = vand.u32 65535, %v4964_v22 }
 0x13d   : > { %v1410_v50 = vclz %v1409_v58  ;;  %v1197_v28 = vsel %vm1183_vm0, %v1194_v25, %v1196_v55  ;;  %v1398_v18 = vadd.s32 %v4923_v57, %v4921_v2  ;;  %v1193_v41 = vsel %vm1183_vm0, %v1190_v24, %v1192_v33 }
 0x13e   : > { %v4984_v31 = vadd.f32 1.0, %v1129_v26  ;;  %v1137_v56 = vadd.f32 1.0, %v1136_v51  ;;  %v1201_v60 = vand.u32 65535, %v1197_v28  ;;  %v1202_v8 = vshrl.u32 %v1197_v28, 16 }
 0x13f   : > { %v3739_v30 = vadd.s32 4294967294, %v1410_v50  ;;  %v1223_v2 = vand.u32 65535, %v1193_v41  ;;  %vm1306_vm10 = vcmp.lt.s32.totalorder %v4678_v37, 0 }
 0x140   : > { %v4994_v16 = vmul.f32 %v1137_v56, %v1122_v19  ;;  %v6114_v11 = vxor.u32 2147483648, %v4984_v31  ;;  %v1203_v45 = vmul.u32 %v1201_v60, %v1199_v43  ;;  %v1204_v7 = vmul.u32 %v1202_v8, %v1199_v43 }
 0x141   : > { %vm3740_vm1 = vcmp.lt.s32.totalorder %v3739_v30, 0  ;;  %v1205_v9 = vmul.u32 %v1201_v60, %v1200_v35  ;;  %v1206_v24 = vmul.u32 %v1202_v8, %v1200_v35 }
 0x142   : > { %v6115_v27 = vxor.u32 2147483648, %v4994_v16  ;;  %v1147_v19 = vsel %vm1145_vm3, %v6114_v11, %v4994_v16  ;;  %v1413_v51 = vsel %vm3740_vm1, 0, %v3739_v30  ;;  %v1207_v55 = vshll.u32 %v1204_v7, 16 }
 0x143   : > { %v1414_v17 = vsub.s32 32, %v1413_v51  ;;  %v1415_v56 = vshll.u32 %v1406_v47, %v1413_v51  ;;  %v1418_v13 = vsub.s32 4294967266, %v1413_v51  ;;  %v1208_v33 = vshrl.u32 %v1204_v7, 16 }
 0x144   : > { %v1144_v26 = vsel %vm1142_vm12, %v4984_v31, %v6115_v27  ;;  %v1209_v28 = vshll.u32 %v1205_v9, 16  ;;  %v1224_v11 = vshrl.u32 %v1193_v41, 16  ;;  %vm1211_vm2 = vc.u32 %v1203_v45, %v1207_v55 }
 0x145   : > { %v1148_v25 = vsel %vm1141_vm13, %v1144_v26, %v1147_v19  ;;  %v1416_v57 = vshrl.u32 %v1398_v18, %v1414_v17  ;;  %v1419_v50 = vadd.s32 127, %v1418_v13  ;;  %v1213_v60 = vadd.s32 %v1207_v55, %v1203_v45 }
 0x146   : > { %v1149_v58 = vsel %vm1139_vm11, nan, %v1148_v25  ;;  %v1212_v47 = vsel %vm1211_vm2, 1, %v4015_v42  ;;  %v1225_v19 = vmul.u32 %v1223_v2, %v1199_v43  ;;  %v1226_v26 = vmul.u32 %v1224_v11, %v1199_v43 }
 0x147   : > { %2716 = vrot.lane.b32.xlu2 %v1149_v58, %s4016_s23  ;;  %v1417_v30 = vor.u32 %v1416_v57, %v1415_v56  ;;  %v1420_v27 = vshll.u32 %v1419_v50, 23  ;;  %v1227_v51 = vmul.u32 %v1223_v2, %v1200_v35  ;;  %v1214_v36 = vadd.s32 %v1212_v47, %v1206_v24 }
 0x148   : > { %vm1215_vm3 = vc.u32 %v1213_v60, %v1209_v28  ;;  %v1228_v8 = vmul.u32 %v1224_v11, %v1200_v35  ;;  %v1229_v17 = vshll.u32 %v1226_v26, 16  ;;  %v1166_v41 = vshrl.u32 %v6171_v23, %v4941_v15 }
 0x149   : > { %v1421_v25 = vor.u32 4788187, %v1420_v27  ;;  %v1424_v48 = vcvt.s32.f32 %v1417_v30  ;;  %v1216_v18 = vsel %vm1215_vm3, 1, %v4015_v42  ;;  %v1231_v13 = vshll.u32 %v1227_v51, 16 }
 0x14a   : > { %v1218_v56 = vadd.s32 %v1216_v18, %v1214_v36  ;;  %v1187_v43 = vsel %vm1185_vm9, %v4968_v46, 2102212464  ;;  %vm1233_vm12 = vc.u32 %v1225_v19, %v1229_v17  ;;  %v1235_v27 = vadd.s32 %v1229_v17, %v1225_v19 }
 0x14b   : > { %v1422_v7 = vand.u32 2147483647, %v1421_v25  ;;  %v1210_v58 = vshrl.u32 %v1205_v9, 16  ;;  %v1234_v35 = vsel %vm1233_vm12, 1, %v4015_v42  ;;  %v6172_v11 = vand.u32 2147483647, %v4678_v37 }
 0x14c   : > { %v1219_v2 = vadd.s32 %v1218_v56, %v1208_v33  ;;  %v1230_v36 = vshrl.u32 %v1226_v26, 16  ;;  %v1236_v15 = vadd.s32 %v1234_v35, %v1228_v8  ;;  %vm1237_vm1 = vc.u32 %v1235_v27, %v1231_v13 }
 0x14d   : > { %v1425_v45 = vmul.f32 %v1424_v48, %v1422_v7  ;;  %vm5029_vm13 = vcmp.le.f32.partialorder %v6172_v11, 0.7853982  ;;  %v1186_v46 = vsel %vm1182_vm15, %v1166_v41, %v4971_v34  ;;  %v1188_v48 = vsel %vm1184_vm5, %v4966_v32, %v1187_v43 }
 0x14e   : > { %v1238_v9 = vsel %vm1237_vm1, 1, %v4015_v42  ;;  %v1232_v50 = vshrl.u32 %v1227_v51, 16  ;;  %v1220_v33 = vadd.s32 %v1219_v2, %v1210_v58  ;;  %v1239_v28 = vadd.s32 %v1235_v27, %v1231_v13 }
 0x14f   : > { %v1426_v23 = vxor.u32 2147483648, %v1425_v45  ;;  %v1240_v24 = vadd.s32 %v1238_v9, %v1236_v15  ;;  %v1428_v30 = vsub.s32 4, %v4955_v44  ;;  %v1189_v34 = vsel %vm1183_vm0, %v1186_v46, %v1188_v48 }
 0x150   : > { %v1243_v51 = vmul.u32 %v4964_v22, %v1189_v34  ;;  %vm1245_vm15 = vc.u32 %v1220_v33, %v1239_v28  ;;  %vm1447_vm3 = vweird.f32 %v4678_v37  ;;  %v6182_v52 = vxor.u32 2147483648, %v4994_v16 }
 0x151   : > { %v1427_v55 = vsel %vm1306_vm10, %v1426_v23, %v1425_v45  ;;  %v1241_v47 = vadd.s32 %v1240_v24, %v1230_v36  ;;  %v1429_v25 = vsel %vm1306_vm10, %v1428_v30, %v4955_v44 }
 0x152   : > { %v1430_v60 = vsel %vm5029_vm13, %v4678_v37, %v1427_v55  ;;  %v5054_v21 = vsel %vm5029_vm13, 0, %v1429_v25 }
 0x153   : > { %v1432_v32 = vmul.f32 %v1430_v60, %v1430_v60  ;;  %v1242_v19 = vadd.s32 %v1241_v47, %v1232_v50  ;;  %v1448_v22 = vand.u32 3, %v5054_v21  ;;  %v1244_v47 = vadd.s32 %v1239_v28, %v1220_v33 }
 0x154   : > { %v6175_v28 = vxor.u32 2147483648, %v4415_v40 }
 0x155   : > { %v1433_v42 = vmul.f32 -0.001358992, %v1432_v32  ;;  %v1440_v26 = vmul.f32 -0.00019511016, %v1432_v32  ;;  %v1246_v18 = vadd.s32 1, %v1242_v19  ;;  %vm1453_vm5 = vcmp.eq.s32.totalorder %v1448_v22, 2 }
 0x156   : > { %vm1449_vm9 = vcmp.lt.s32.totalorder %v1448_v22, 2  ;;  %vm1450_vm0 = vcmp.eq.s32.totalorder %v1448_v22, 0  ;;  %v6176_v22 = vxor.u32 2147483648, %v4409_v62 }
 0x157   : > { %v1434_v8 = vadd.f32 0.041655596, %v1433_v42  ;;  %v1441_v17 = vadd.f32 0.008332121, %v1440_v26  ;;  %v1247_v7 = vsel %vm1245_vm15, %v1246_v18, %v1242_v19 }
 0x158   : > { %v1248_v13 = vadd.s32 %v1247_v7, %v1243_v51  ;;  %v1602_v7 = vadd.s32 3, %v4433_v39 }
 0x159   : > { %v1435_v41 = vmul.f32 %v1434_v8, %v1432_v32  ;;  %v1442_v56 = vmul.f32 %v1441_v17, %v1432_v32  ;;  %v1912_v17 = vadd.s32 3, %v4342_v1 }
 0x15a   : > { %v1249_v45 = vadd.s32 536870912, %v1248_v13 }
 0x15b   : > { %v1436_v43 = vadd.f32 -0.4999988, %v1435_v41  ;;  %v1443_v27 = vadd.f32 -0.16666654, %v1442_v56 }
 0x15c   : > { %v5057_v35 = vshrl.u32 %v1249_v45, 30 }
 0x15d   : > { %v1437_v58 = vmul.f32 %v1436_v43, %v1432_v32  ;;  %v1444_v2 = vmul.f32 %v1443_v27, %v1432_v32  ;;  %v1603_v43 = vand.u32 3, %v1602_v7 }
 0x15e   : > { %v1251_v36 = vshll.u32 %v5057_v35, 30 }
 0x15f   : > { %v5059_v44 = vadd.f32 1.0, %v1437_v58  ;;  %v1445_v11 = vadd.f32 1.0, %v1444_v2  ;;  %vm1604_vm15 = vcmp.lt.s32.totalorder %v1603_v43, 2  ;;  %v6177_v58 = vxor.u32 2147483648, %v4487_v4 }
 0x160   : > { %v1252_v23 = vsub.s32 %v1248_v13, %v1251_v36  ;;  %v1913_v13 = vand.u32 3, %v1912_v17  ;;  %v6185_v17 = vxor.u32 2147483648, %v4731_v5 }
 0x161   : > { %v5062_v57 = vmul.f32 %v1445_v11, %v1430_v60  ;;  %v1454_v15 = vxor.u32 2147483648, %v5059_v44  ;;  %v6178_v11 = vand.u32 2147483647, %v4908_v59 }
 0x162   : > { %vm1253_vm2 = vcmp.lt.s32.totalorder %v1252_v23, 0  ;;  %v1254_v9 = vsub.s32 0, %v1252_v23  ;;  %vm1914_vm12 = vcmp.lt.s32.totalorder %v1913_v13, 2  ;;  %vm1915_vm13 = vcmp.eq.s32.totalorder %v1913_v13, 0 }
 0x163   : > { %v1451_v46 = vxor.u32 2147483648, %v5062_v57  ;;  %v1455_v48 = vsel %vm1453_vm5, %v1454_v15, %v5062_v57  ;;  %vm1918_vm1 = vcmp.eq.s32.totalorder %v1913_v13, 2  ;;  %v1917_v45 = vsel %vm1915_vm13, %v4409_v62, %v6175_v28 }
 0x164   : > { %v1255_v24 = vsel %vm1253_vm2, %v1254_v9, %v1252_v23  ;;  %v1920_v1 = vsel %vm1918_vm1, %v6176_v22, %v4415_v40  ;;  %vm1605_vm5 = vcmp.eq.s32.totalorder %v1603_v43, 0  ;;  %vm5090_vm2 = vcmp.le.f32.partialorder %v6178_v11, 0.7853982 }
 0x165   : > { %v1452_v50 = vsel %vm1450_vm0, %v5059_v44, %v1451_v46  ;;  %v1256_v30 = vclz %v1255_v24  ;;  %v1921_v39 = vsel %vm1914_vm12, %v1917_v45, %v1920_v1  ;;  %v1607_v2 = vsel %vm1605_vm5, %v4482_v20, %v6177_v58 }
 0x166   : > { %v1456_v55 = vsel %vm1449_vm9, %v1452_v50, %v1455_v48  ;;  %vm1152_vm9 = vcmp.lt.s32.totalorder %v4908_v59, 0  ;;  %vm1608_vm0 = vcmp.eq.s32.totalorder %v1603_v43, 2  ;;  %v1922_v62 = vsel %vm677_vm8, nan, %v1921_v39 }
 0x167   : > { %v1457_v60 = vsel %vm1447_vm3, nan, %v1456_v55  ;;  %v3736_v34 = vadd.s32 4294967294, %v1256_v30  ;;  %v6181_v40 = vxor.u32 2147483648, %v4482_v20  ;;  %v1274_v9 = vsub.s32 4, %v5057_v35 }
 0x168   : > { %2720 = vrot.lane.b32.xlu1 %v1457_v60, %s4016_s23  ;;  %v2377_v24 = vadd.s32 3, %v4939_v14  ;;  %v2687_v13 = vadd.s32 3, %v5054_v21  ;;  %v1757_v28 = vadd.s32 3, %v4810_v38 }
 0x169   : > { %vm3737_vm10 = vcmp.lt.s32.totalorder %v3736_v34, 0  ;;  %v1610_v48 = vsel %vm1608_vm0, %v6181_v40, %v4487_v4  ;;  %v1275_v14 = vsel %vm1152_vm9, %v1274_v9, %v5057_v35 }
 0x16a   : > { %v1259_v32 = vsel %vm3737_vm10, 0, %v3736_v34  ;;  %v1611_v50 = vsel %vm1604_vm15, %v1607_v2, %v1610_v48  ;;  %v2378_v4 = vand.u32 3, %v2377_v24  ;;  %v2068_v34 = vand.u32 3, %v2067_v0 }
 0x16b   : > { %v1260_v19 = vsub.s32 32, %v1259_v32  ;;  %v1261_v42 = vshll.u32 %v1252_v23, %v1259_v32  ;;  %v1264_v26 = vsub.s32 4294967266, %v1259_v32  ;;  %v1612_v30 = vsel %vm369_vm14, nan, %v1611_v50 }
 0x16c   : > { %2756 = vrot.lane.b32.xlu2 %v1612_v30, %s4016_s23  ;;  %vm2379_vm8 = vcmp.lt.s32.totalorder %v2378_v4, 2  ;;  %vm2380_vm10 = vcmp.eq.s32.totalorder %v2378_v4, 0  ;;  %vm2383_vm12 = vcmp.eq.s32.totalorder %v2378_v4, 2  ;;  %vm2069_vm14 = vcmp.lt.s32.totalorder %v2068_v34, 2 }
 0x16d   : > { %v1262_v51 = vshrl.u32 %v1244_v47, %v1260_v19  ;;  %v1265_v25 = vadd.s32 127, %v1264_v26  ;;  %v2382_v32 = vsel %vm2380_vm10, %v4984_v31, %v6182_v52  ;;  %v6183_v19 = vxor.u32 2147483648, %v4984_v31 }
 0x16e   : > { %vm2070_vm13 = vcmp.eq.s32.totalorder %v2068_v34, 0  ;;  %vm2073_vm1 = vcmp.eq.s32.totalorder %v2068_v34, 2  ;;  %v1758_v38 = vand.u32 3, %v1757_v28  ;;  %v6186_v50 = vxor.u32 2147483648, %v4878_v12 }
 0x16f   : > { %v1263_v18 = vor.u32 %v1262_v51, %v1261_v42  ;;  %v1266_v8 = vshll.u32 %v1265_v25, 23  ;;  %v2385_v42 = vsel %vm2383_vm12, %v6183_v19, %v4994_v16  ;;  %v2075_v31 = vsel %vm2073_vm1, %v6185_v17, %v4736_v29 }
 0x170   : > { %2760 = vrot.lane.b32.xlu1 %v1922_v62, %s4016_s23  ;;  %v2386_v26 = vsel %vm2379_vm8, %v2382_v32, %v2385_v42  ;;  %v1277_v16 = vsel %vm5090_vm2, 0, %v1275_v14  ;;  %vm1293_vm12 = vweird.f32 %v4908_v59  ;;  %vm1759_vm1 = vcmp.lt.s32.totalorder %v1758_v38, 2 }
 0x171   : > { %v1267_v41 = vor.u32 4788187, %v1266_v8  ;;  %v1270_v56 = vcvt.s32.f32 %v1263_v18  ;;  %v2387_v35 = vsel %vm1139_vm11, nan, %v2386_v26  ;;  %v6184_v18 = vxor.u32 2147483648, %v4736_v29 }
 0x172   : > { %v2532_v29 = vadd.s32 3, %v1277_v16 }
 0x173   : > { %v1268_v27 = vand.u32 2147483647, %v1267_v41  ;;  %v2072_v8 = vsel %vm2070_vm13, %v4731_v5, %v6184_v18  ;;  %v2688_v5 = vand.u32 3, %v2687_v13  ;;  %vm1763_vm13 = vcmp.eq.s32.totalorder %v1758_v38, 2 }
 0x174   : > { %v2533_v1 = vand.u32 3, %v2532_v29  ;;  %v5201_v13 = vstv %s3768_s20  ;;  %s3787_s20 = sshll.u32 %s4061_s16, 4 }
 0x175   : > { %v1271_v33 = vmul.f32 %v1270_v56, %v1268_v27  ;;  %v2076_v56 = vsel %vm2069_vm14, %v2072_v8, %v2075_v31  ;;  %vm2689_vm11 = vcmp.lt.s32.totalorder %v2688_v5, 2  ;;  %vm2690_vm15 = vcmp.eq.s32.totalorder %v2688_v5, 0 }
 0x176   : > { %v2077_v10 = vsel %vm831_vm6, nan, %v2076_v56  ;;  %vm2693_vm5 = vcmp.eq.s32.totalorder %v2688_v5, 2  ;;  %v2692_v21 = vsel %vm2690_vm15, %v5059_v44, %v1451_v46  ;;  %vm2535_vm8 = vcmp.eq.s32.totalorder %v2533_v1, 0 }
 0x177   : > { %v1272_v23 = vxor.u32 2147483648, %v1271_v33  ;;  %2762 = vrot.lane.b32.xlu2 %v2077_v10, %s4016_s23  ;;  %v2695_v58 = vsel %vm2693_vm5, %v1454_v15, %v5062_v57  ;;  %vm2534_vm10 = vcmp.lt.s32.totalorder %v2533_v1, 2  ;;  %vm1760_vm14 = vcmp.eq.s32.totalorder %v1758_v38, 0 }
 0x178   : > { %2766 = vrot.lane.b32.xlu1 %v2387_v35, %s4016_s23  ;;  %v2696_v2 = vsel %vm2689_vm11, %v2692_v21, %v2695_v58  ;;  %v2222_v44 = vadd.s32 3, %v4574_v63  ;;  %v1762_v24 = vsel %vm1760_vm14, %v4866_v6, %v6186_v50  ;;  %vm2730_vm15 = vcmask 7168   ;;  %v2711_v35 = vpop.permute.xlu1 %2710 }
 0x179   : > { %v1273_v55 = vsel %vm1152_vm9, %v1272_v23, %v1271_v33  ;;  %v1294_v33 = vand.u32 3, %v1277_v16  ;;  %vm2538_vm9 = vcmp.eq.s32.totalorder %v2533_v1, 2  ;;  %v2697_v23 = vsel %vm1447_vm3, nan, %v2696_v2 }
 0x17a   : > { %v1276_v20 = vsel %vm5090_vm2, %v4908_v59, %v1273_v55  ;;  %v6187_v55 = vxor.u32 2147483648, %v4866_v6  ;;  %v2223_v59 = vand.u32 3, %v2222_v44  ;;  %v2733_v29 = vsel %vm2730_vm15, 1.0, %v2711_v35 }
 0x17b   : > { %v1278_v60 = vmul.f32 %v1276_v20, %v1276_v20  ;;  %vm1299_vm6 = vcmp.eq.s32.totalorder %v1294_v33, 2  ;;  %vm1295_vm0 = vcmp.lt.s32.totalorder %v1294_v33, 2  ;;  %vm1296_vm2 = vcmp.eq.s32.totalorder %v1294_v33, 0 }
 0x17c   : > { %v1765_v30 = vsel %vm1763_vm13, %v6187_v55, %v4878_v12  ;;  %vm2225_vm3 = vcmp.eq.s32.totalorder %v2223_v59, 0  ;;  %vm2228_vm11 = vcmp.eq.s32.totalorder %v2223_v59, 2  ;;  %vm2224_vm5 = vcmp.lt.s32.totalorder %v2223_v59, 2 }
 0x17d   : > { %v1279_v3 = vmul.f32 -0.001358992, %v1278_v60  ;;  %v1286_v47 = vmul.f32 -0.00019511016, %v1278_v60  ;;  %v1766_v63 = vsel %vm1759_vm1, %v1762_v24, %v1765_v30  ;;  %v6189_v12 = vxor.u32 2147483648, %v4614_v53 }
 0x17e   : > { %v1767_v4 = vsel %vm523_vm4, nan, %v1766_v63  ;;  %vm2804_vm4 = vcmask 1040384  }
 0x17f   : > { %v1280_v51 = vadd.f32 0.041655596, %v1279_v3  ;;  %v1287_v25 = vadd.f32 0.008332121, %v1286_v47  ;;  %v2230_v34 = vsel %vm2228_vm11, %v6189_v12, %v4625_v54 }
 0x180   : > { %v2713_v56 = vpop.permute.xlu1 %2712 }
 0x181   : > { %v1281_v7 = vmul.f32 %v1280_v51, %v1278_v60  ;;  %v1288_v41 = vmul.f32 %v1287_v25, %v1278_v60  ;;  %v2707_v51 = vpop.permute.xlu0 %2706 }
 0x182   : > { %v2731_v25 = vsel %vm2730_vm15, 1.0, %v2707_v51 }
 0x183   : > { %v1282_v43 = vadd.f32 -0.4999988, %v1281_v7  ;;  %v1289_v27 = vadd.f32 -0.16666654, %v1288_v41  ;;  %v5195_v7 = vstv %s3767_s19 }
 0x185   : > { %v1283_v45 = vmul.f32 %v1282_v43, %v1278_v60  ;;  %v1290_v22 = vmul.f32 %v1289_v27, %v1278_v60  ;;  %v6188_v60 = vxor.u32 2147483648, %v4625_v54 }
 0x187   : > { %v1284_v39 = vadd.f32 1.0, %v1283_v45  ;;  %v1291_v61 = vadd.f32 1.0, %v1290_v22  ;;  %v2227_v6 = vsel %vm2225_vm3, %v4614_v53, %v6188_v60  ;;  %v2734_v45 = vsel %vm2730_vm15, 1.0, %v2713_v56 }
 0x188   : > { %v2231_v3 = vsel %vm2224_vm5, %v2227_v6, %v2230_v34  ;;  %v5253_v6 = vstv %s3770_s28 }
 0x189   : > { %v1292_v11 = vmul.f32 %v1291_v61, %v1276_v20  ;;  %v1300_v36 = vxor.u32 2147483648, %v1284_v39  ;;  %v2715_v20 = vpop.permute.xlu2 %2714  ;;  %v2232_v52 = vsel %vm985_vm7, nan, %v2231_v3  ;;  %v5266_v3 = vstv %s3769_s22 }
 0x18a   : > { %v2735_v14 = vsel %vm2730_vm15, 1.0, %v2715_v20  ;;  %vm3025_vm7 = vcmask 1046528  }
 0x18b   : > { %v1297_v62 = vxor.u32 2147483648, %v1292_v11  ;;  %v1301_v40 = vsel %vm1299_vm6, %v1300_v36, %v1292_v11  ;;  %v2540_v46 = vsel %vm2538_vm9, %v1300_v36, %v1292_v11  ;;  %vm2739_vm6 = vcmask 138240  }
 0x18c   : > { %v5165_v47 = vsel %vm2739_vm6, %v2735_v14, 1.0  ;;  %v5186_v18 = vsel %vm2739_vm6, %v2731_v25, 1.0  ;;  %v2742_v1 = vsel %vm2739_vm6, %v2733_v29, 1.0  ;;  %v5324_v29 = vstv %s3775_s29 }
 0x18d   : > { %v1298_v57 = vsel %vm1296_vm2, %v1284_v39, %v1297_v62  ;;  %v2537_v15 = vsel %vm2535_vm8, %v1284_v39, %v1297_v62  ;;  %v2811_v19 = vrot.slane %v5165_v47, 7  ;;  %v2805_v8 = vrot.slane %v5186_v18, 7  ;;  %6200 = vst [vmem:[#allocation23_spill] sm:$0xff] %v5324_v29 }
 0x18e   : > { %v1302_v48 = vsel %vm1295_vm0, %v1298_v57, %v1301_v40  ;;  %v2541_v9 = vsel %vm2534_vm10, %v2537_v15, %v2540_v46  ;;  %v2743_v39 = vsel %vm2739_vm6, %v2734_v45, 1.0  ;;  %v2808_v21 = vrot.slane %v2742_v1, 7 }
 0x18f   : > { %v1303_v37 = vsel %vm1293_vm12, nan, %v1302_v48  ;;  %v2542_v0 = vsel %vm1293_vm12, nan, %v2541_v9  ;;  %v5193_v16 = vsel %vm2804_vm4, 1.0, %v2805_v8  ;;  %v2809_v58 = vrot.slane %v2743_v39, 7 }
 0x190   : > { %2718 = vrot.lane.b32.xlu0 %v1303_v37, %s4016_s23  ;;  %2768 = vrot.lane.b32.xlu2 %v2542_v0, %s4016_s23  ;;  %6192 = vst [vmem:[#allocation15_spill] sm:$0xff] %v5193_v16  ;;  %v2907_v43 = vmul.f32 %v5195_v7, %v5193_v16  ;;  %v2709_v55 = vpop.permute.xlu0 %2708  ;;  %v5258_v12 = vsel %vm2804_vm4, 1.0, %v2811_v19  ;;  %v5331_v39 = vstv %s3776_s5  ;;  %vm3322_vm9 = vcmask 1045504   ;;  %s3594_s5 = scalar_lea.sflag [#allocation4], %s4148_s0 }
 0x191   : > { %v5227_v62 = vsel %vm2804_vm4, %v2808_v21, %v2809_v58  ;;  %v2732_v30 = vsel %vm2730_vm15, 1.0, %v2709_v55  ;;  %6196 = vst [vmem:[#allocation19_spill] sm:$0xff] %v5258_v12  ;;  %v5269_v49 = vsel %vm2804_vm4, %v2809_v58, 1.0  ;;  %v5292_v25 = vmul.f32 %v5195_v7, %v5258_v12 }
 0x192   : > { %6195 = vst [vmem:[#allocation18_spill] sm:$0xff] %v5227_v62  ;;  %v2910_v9 = vmul.f32 %v5195_v7, %v5227_v62  ;;  %v2741_v59 = vsel %vm2739_vm6, %v2732_v30, 1.0  ;;  %v5300_v18 = vmul.f32 %v5266_v3, %v5258_v12  ;;  %vm3567_vm0 = vcmask 138248  }
 0x193   : > { %v2806_v20 = vrot.slane %v2741_v59, 7  ;;  %6198 = vst [vmem:[#allocation21_spill] sm:$0xff] %v5269_v49  ;;  %vm3590_vm2 = vcmask 130048  }
 0x195   : > { %v5277_v47 = vsel %vm2804_vm4, %v2806_v20, 1.0 }
 0x198   : > { %2758 = vrot.lane.b32.xlu0 %v1767_v4, %s4016_s23 }
 0x1a0   : > { %2764 = vrot.lane.b32.xlu0 %v2232_v52, %s4016_s23  ;;  %v5274_v52 = vsel %vm2804_vm4, %v2805_v8, %v2806_v20 }
 0x1a1   : > { %v2717_v32 = vpop.permute.xlu2 %2716 }
 0x1a2   : > { %v2736_v42 = vsel %vm2730_vm15, 1.0, %v2717_v32 }
 0x1a3   : > { %v5173_v53 = vsel %vm2739_vm6, %v2736_v42, 1.0 }
 0x1a4   : > { %v2812_v54 = vrot.slane %v5173_v53, 7  ;;  %v5286_v53 = vstv %s3773_s30  ;;  %s3605_s30 = scalar_lea.hbm %s6100_s3, %s3787_s20 }
 0x1a5   : > { %6199 = vst [vmem:[#allocation22_spill] sm:$0xff] %v5286_v53  ;;  %v5390_v20 = vmul.f32 %v5286_v53, %v5269_v49  ;;  %s3608_s29 = sshll.u32 %s3605_s30, 4  ;;  %s3609_s29 = int_to_ptr.hbm [resolvable:$true] %s3608_s29 }
 0x1a6   : > { %v5181_v26 = vsel %vm2804_vm4, %v2811_v19, %v2812_v54  ;;  %v5263_v34 = vsel %vm2804_vm4, %v2812_v54, 1.0  ;;  %v2975_v19 = vmul.f32 %v5266_v3, %v5193_v16  ;;  %v5288_v54 = vstv %s3774_s4 }
 0x1a7   : > { %6191 = vst [vmem:[#allocation14_spill] sm:$0xff] %v5181_v26  ;;  %v5296_v35 = vmul.f32 %v5195_v7, %v5181_v26  ;;  %v5304_v8 = vmul.f32 %v5266_v3, %v5181_v26  ;;  %v5340_v58 = vmul.f32 %v5286_v53, %v5181_v26 }
 0x1a8   : > { %2770 = vrot.lane.b32.xlu0 %v2697_v23, %s4016_s23  ;;  %v5224_v23 = vsel %vm2804_vm4, 1.0, %v2808_v21  ;;  %6197 = vst [vmem:[#allocation20_spill] sm:$0xff] %v5263_v34 }
 0x1a9   : > { %6194 = vst [vmem:[#allocation17_spill] sm:$0xff] %v5224_v23  ;;  %v2909_v15 = vmul.f32 %v5195_v7, %v5224_v23  ;;  %v5329_v1 = vmul.f32 %v5286_v53, %v5224_v23 }
 0x1aa   : > { %6205 = vst [vmem:[#allocation28_spill] sm:$0xff] %v5390_v20 }
 0x1c6   : > { %v2757_v17 = vpop.permute.xlu2 %2756 }
 0x1c7   : > { %v2780_v31 = vsel %vm2730_vm15, 0.0, %v2757_v17 }
 0x1c8   : > { %v5198_v41 = vsel %vm2739_vm6, %v2780_v31, 0.0 }
 0x1c9   : > { %v2845_v10 = vrot.slane %v5198_v41, 7 }
 0x1cb   : > { %v5208_v27 = vsel %vm2804_vm4, 0.0, %v2845_v10 }
 0x1cc   : > { %6193 = vst [vmem:[#allocation16_spill] sm:$0xff] %v5208_v27  ;;  %v2917_v33 = vmul.f32 %v5201_v13, %v5208_v27  ;;  %v2989_v42 = vmul.f32 %v5253_v6, %v5208_v27 }
 0x1ce   : > { %v2925_v28 = vsub.f32 %v2907_v43, %v2917_v33  ;;  %v5315_v43 = vmul.f32 %v5266_v3, %v5224_v23 }
 0x1d0   : > { %2941 = vrot.lane.b32.xlu1 %v2925_v28, %s4017_s27  ;;  %v3168_v28 = vmul.f32 %v5286_v53, %v5193_v16 }
 0x1d1   : > { %v2763_v22 = vpop.permute.xlu2 %2762 }
 0x1d2   : > { %v2783_v61 = vsel %vm2730_vm15, 0.0, %v2763_v22  ;;  %v3001_v22 = vsub.f32 %v2975_v19, %v2989_v42  ;;  %v5399_v42 = vmul.f32 %v5266_v3, %v5263_v34 }
 0x1d3   : > { %v5219_v38 = vsel %vm2739_vm6, %v2783_v61, 0.0 }
 0x1d4   : > { %v2849_v40 = vrot.slane %v5219_v38, 7  ;;  %v5344_v38 = vmul.f32 %v5286_v53, %v5258_v12 }
 0x1d6   : > { %v5334_v61 = vsel %vm2804_vm4, %v2849_v40, 0.0  ;;  %6202 = vst [vmem:[#allocation25_spill] sm:$0xff] %v5344_v38 }
 0x1d7   : > { %6201 = vst [vmem:[#allocation24_spill] sm:$0xff] %v5334_v61  ;;  %v2994_v55 = vmul.f32 %v5253_v6, %v5334_v61 }
 0x1da   : > { %v2721_v5 = vpop.permute.xlu1 %2720 }
 0x1db   : > { %v2738_v60 = vsel %vm2730_vm15, 1.0, %v2721_v5  ;;  %v3182_v5 = vmul.f32 %v5288_v54, %v5208_v27 }
 0x1dc   : > { %v5280_v32 = vsel %vm2739_vm6, %v2738_v60, 1.0  ;;  %v5394_v60 = vmul.f32 %v5288_v54, %v5334_v61 }
 0x1dd   : > { %v6120_v17 = vrot.slane %v5280_v32, 7 }
 0x1de   : > { %6206 = vst [vmem:[#allocation29_spill] sm:$0xff] %v5394_v60 }
 0x1e2   : > { %v2761_v2 = vpop.permute.xlu1 %2760 }
 0x1e3   : > { %v2782_v11 = vsel %vm2730_vm15, 0.0, %v2761_v2  ;;  %v5349_v2 = vsel %vm2804_vm4, %v6120_v17, 1.0 }
 0x1e4   : > { %v2790_v36 = vsel %vm2739_vm6, %v2782_v11, 0.0 }
 0x1e5   : > { %v2848_v46 = vrot.slane %v2790_v36, 7  ;;  %v5358_v36 = vmul.f32 %v5324_v29, %v5224_v23 }
 0x1e7   : > { %v5231_v44 = vsel %vm2804_vm4, %v2848_v46, %v2849_v40  ;;  %v5234_v57 = vsel %vm2804_vm4, 0.0, %v2848_v46  ;;  %v5362_v40 = vmul.f32 %v5324_v29, %v5193_v16  ;;  %v2908_v46 = vmul.f32 %v5195_v7, %v5274_v52 }
 0x1e8   : > { %v2919_v48 = vmul.f32 %v5201_v13, %v5234_v57  ;;  %v2920_v37 = vmul.f32 %v5201_v13, %v5231_v44 }
 0x1e9   : > { %6203 = vst [vmem:[#allocation26_spill] sm:$0xff] %v5362_v40  ;;  %v2993_v40 = vmul.f32 %v5253_v6, %v5231_v44 }
 0x1ea   : > { %v2927_v50 = vsub.f32 %v2909_v15, %v2919_v48  ;;  %v2928_v24 = vsub.f32 %v2910_v9, %v2920_v37  ;;  %v2769_v0 = vpop.permute.xlu2 %2768  ;;  %v3194_v48 = vsub.f32 %v3168_v28, %v3182_v5  ;;  %v5372_v9 = vmul.f32 %v5331_v39, %v5208_v27 }
 0x1eb   : > { %v2786_v63 = vsel %vm2730_vm15, 0.0, %v2769_v0  ;;  %v2976_v37 = vmul.f32 %v5266_v3, %v5274_v52  ;;  %v2767_v0 = vpop.permute.xlu1 %2766  ;;  %v2977_v5 = vmul.f32 %v5266_v3, %v5277_v47 }
 0x1ec   : > { %2945 = vrot.lane.b32.xlu0 %v2927_v50, %s4017_s27  ;;  %2947 = vrot.lane.b32.xlu1 %v2928_v24, %s4017_s27  ;;  %v5250_v4 = vsel %vm2739_vm6, %v2786_v63, 0.0  ;;  %6204 = vst [vmem:[#allocation27_spill] sm:$0xff] %v5372_v9  ;;  %v5376_v50 = vrot.slane %v3001_v22, 1  ;;  %v2980_v24 = vmul.f32 %v5266_v3, %v5269_v49  ;;  %v5386_v63 = vmul.f32 %v5266_v3, %v5227_v62 }
 0x1ed   : > { %v6118_v14 = vrot.slane %v5250_v4, 7  ;;  %v5413_v22 = vrot.slane %v3194_v48, 1  ;;  %v5430_v48 = vmul.f32 %v5324_v29, %v5227_v62 }
 0x1ef   : > { %v5311_v56 = vsel %vm2804_vm4, 0.0, %v6118_v14  ;;  %6208 = vst [vmem:[#allocation31_spill] sm:$0xff] %v5413_v22  ;;  %v3006_v14 = vsub.f32 %v2980_v24, %v2994_v55  ;;  %v5438_v24 = vmul.f32 %v5324_v29, %v5277_v47 }
 0x1f0   : > { %v2923_v21 = vmul.f32 %v5201_v13, %v5311_v56 }
 0x1f1   : > { %6211 = vst [vmem:[#allocation34_spill] sm:$0xff] %v5438_v24  ;;  %v3005_v24 = vsub.f32 %v5386_v63, %v2993_v40 }
 0x202   : > { %v2719_v51 = vpop.permute.xlu0 %2718 }
 0x203   : > { %v2737_v31 = vsel %vm2730_vm15, 1.0, %v2719_v51  ;;  %v5403_v51 = vmul.f32 %v5286_v53, %v5227_v62 }
 0x204   : > { %v5318_v33 = vsel %vm2739_vm6, %v2737_v31, 1.0  ;;  %v5407_v31 = vmul.f32 %v5286_v53, %v5274_v52 }
 0x205   : > { %v6119_v45 = vrot.slane %v5318_v33, 7 }
 0x206   : > { %6207 = vst [vmem:[#allocation30_spill] sm:$0xff] %v5407_v31 }
 0x207   : > { %v5354_v11 = vsel %vm2804_vm4, 1.0, %v6119_v45  ;;  %v5422_v45 = vmul.f32 %v5286_v53, %v5277_v47 }
 0x208   : > { %v2913_v15 = vmul.f32 %v5195_v7, %v5354_v11 }
 0x209   : > { %6209 = vst [vmem:[#allocation32_spill] sm:$0xff] %v5422_v45 }
 0x20a   : > { %v2759_v30 = vpop.permute.xlu0 %2758  ;;  %v2931_v59 = vsub.f32 %v2913_v15, %v2923_v21  ;;  %v5417_v21 = vmul.f32 %v5286_v53, %v5263_v34 }
 0x20b   : > { %v2781_v19 = vsel %vm2730_vm15, 0.0, %v2759_v30  ;;  %v2785_v30 = vsel %vm2730_vm15, 0.0, %v2767_v0 }
 0x20c   : > { %v2789_v28 = vsel %vm2739_vm6, %v2781_v19, 0.0  ;;  %2953 = vrot.lane.b32.xlu1 %v2931_v59, %s4017_s27  ;;  %v5434_v19 = vmul.f32 %v5324_v29, %v5274_v52  ;;  %v5453_v59 = vstv %s5364_s7  ;;  %v2793_v17 = vsel %vm2739_vm6, %v2785_v30, 0.0  ;;  %s3943_s7 = sshra.s32 %s3609_s29, 4  ;;  %s3944_s7 = int_to_ptr.hbm [resolvable:$true] %s3943_s7 }
 0x20d   : > { %v2846_v15 = vrot.slane %v2789_v28, 7  ;;  %v5470_v28 = vmul.f32 %v5453_v59, %v5274_v52  ;;  %v5473_v30 = vstv %s5382_s9  ;;  %v5477_v49 = vmul.f32 %v5453_v59, %v5277_v47  ;;  %p3950_p0 = scmp.lt.s32.totalorder %s3944_s7, %s6100_s3 }
 0x20e   : > { %6210 = vst [vmem:[#allocation33_spill] sm:$0xff] %v5434_v19 }
 0x20f   : > { %v5445_v55 = vsel %vm2804_vm4, %v2845_v10, %v2846_v15  ;;  %v5448_v0 = vsel %vm2804_vm4, %v2846_v15, 0.0  ;;  %v5462_v10 = vrot.slane %v3006_v14, 1  ;;  %v5466_v15 = vmul.f32 %v5266_v3, %v5349_v2 }
 0x210   : > { %v2918_v62 = vmul.f32 %v5201_v13, %v5445_v55  ;;  %v2990_v23 = vmul.f32 %v5253_v6, %v5445_v55  ;;  %v2991_v41 = vmul.f32 %v5253_v6, %v5448_v0  ;;  %v2852_v14 = vrot.slane %v2793_v17, 7 }
 0x211   : > { %v2992_v17 = vmul.f32 %v5253_v6, %v5234_v57 }
 0x212   : > { %v2765_v27 = vpop.permute.xlu0 %2764  ;;  %v2926_v16 = vsub.f32 %v2908_v46, %v2918_v62  ;;  %v3002_v34 = vsub.f32 %v2976_v37, %v2990_v23  ;;  %v3003_v61 = vsub.f32 %v2977_v5, %v2991_v41  ;;  %v5488_v46 = vmul.f32 %v5453_v59, %v5258_v12 }
 0x213   : > { %v2784_v9 = vsel %vm2730_vm15, 0.0, %v2765_v27  ;;  %v3185_v27 = vmul.f32 %v5288_v54, %v5234_v57  ;;  %v5496_v5 = vmul.f32 %v5453_v59, %v5181_v26  ;;  %v5529_v22 = vsel %vm2804_vm4, %v2852_v14, 0.0 }
 0x214   : > { %v2792_v29 = vsel %vm2739_vm6, %v2784_v9, 0.0  ;;  %2943 = vrot.lane.b32.xlu2 %v2926_v16, %s4017_s27  ;;  %v5484_v62 = vrot.slane %v3002_v34, 1  ;;  %v3029_v23 = vrot.slane %v3003_v61, 1  ;;  %v5502_v34 = vmul.f32 %v5253_v6, %v5311_v56 }
 0x215   : > { %v2851_v37 = vrot.slane %v2792_v29, 7  ;;  %v5505_v61 = vstv %s5424_s11  ;;  %v5508_v29 = vstv %s5440_s8  ;;  %v3004_v40 = vsub.f32 %v5315_v43, %v2992_v17  ;;  %s3949_s11 = scalar_lea.hbm %s6100_s3, 32 }
 0x216   : > { %v3030_v16 = vsel %vm3025_vm7, %v5484_v62, %v3029_v23  ;;  %v3186_v23 = vmul.f32 %v5288_v54, %v5231_v44  ;;  %v3197_v63 = vsub.f32 %v5329_v1, %v3185_v27  ;;  %v6212_v26 = vrot.slane %v5280_v32, 7 }
 0x217   : > { %v5511_v9 = vsel %vm2804_vm4, %v2851_v37, %v2852_v14  ;;  %v5514_v41 = vsel %vm2804_vm4, 0.0, %v2851_v37  ;;  %3048 = vrot.lane.b32.xlu1 %v3030_v16, %s4016_s23  ;;  %v3289_v16 = vmul.f32 %v5331_v39, %v5234_v57  ;;  %v6213_v14 = vrot.slane %v5318_v33, 7 }
 0x218   : > { %v2921_v19 = vmul.f32 %v5201_v13, %v5514_v41  ;;  %v2922_v60 = vmul.f32 %v5201_v13, %v5511_v9  ;;  %v2995_v20 = vmul.f32 %v5253_v6, %v5514_v41  ;;  %v2996_v37 = vmul.f32 %v5253_v6, %v5511_v9 }
 0x219   : > { %v5544_v43 = vsel %vm2804_vm4, %v6213_v14, %v6212_v26  ;;  %v3032_v17 = vrot.slane %v3005_v24, 1  ;;  %v3198_v27 = vsub.f32 %v5403_v51, %v3186_v23  ;;  %v3480_v32 = vmul.f32 %v5473_v30, %v5445_v55 }
 0x21a   : > { %v2771_v38 = vpop.permute.xlu0 %2770  ;;  %v2929_v53 = vsub.f32 %v5292_v25, %v2921_v19  ;;  %v2930_v45 = vsub.f32 %v5296_v35, %v2922_v60  ;;  %v3007_v31 = vsub.f32 %v5300_v18, %v2995_v20  ;;  %v3008_v12 = vsub.f32 %v5304_v8, %v2996_v37 }
 0x21b   : > { %v2787_v1 = vsel %vm2730_vm15, 0.0, %v2771_v38  ;;  %v2997_v26 = vmul.f32 %v5253_v6, %v5529_v22  ;;  %v5559_v33 = vmul.f32 %v5331_v39, %v5231_v44  ;;  %v3301_v38 = vsub.f32 %v5358_v36, %v3289_v16 }
 0x21c   : > { %v2795_v25 = vsel %vm2739_vm6, %v2787_v1, 0.0  ;;  %2949 = vrot.lane.b32.xlu2 %v2929_v53, %s4017_s27  ;;  %2951 = vrot.lane.b32.xlu0 %v2930_v45, %s4017_s27  ;;  %v3036_v35 = vrot.slane %v3007_v31, 1  ;;  %v5551_v18 = vrot.slane %v3008_v12, 1  ;;  %v2914_v53 = vmul.f32 %v5195_v7, %v5544_v43 }
 0x21d   : > { %v2855_v8 = vrot.slane %v2795_v25, 7  ;;  %v3031_v45 = vrot.slane %v3004_v40, 1  ;;  %v3190_v20 = vmul.f32 %v5288_v54, %v5529_v22  ;;  %v6214_v60 = vrot.slane %v5250_v4, 7 }
 0x21e   : > { %v3038_v12 = vsel %vm3025_vm7, %v3036_v35, %v5551_v18  ;;  %v2985_v7 = vmul.f32 %v5266_v3, %v5544_v43  ;;  %v3481_v36 = vmul.f32 %v5473_v30, %v5448_v0  ;;  %v3492_v23 = vsub.f32 %v5470_v28, %v3480_v32 }
 0x21f   : > { %v5571_v51 = vsel %vm2804_vm4, %v6214_v60, %v2855_v8  ;;  %v5574_v31 = vsel %vm2804_vm4, %v2855_v8, 0.0  ;;  %3054 = vrot.lane.b32.xlu1 %v3038_v12, %s4016_s23  ;;  %v3035_v37 = vsel %vm3025_vm7, %v3032_v17, %v5462_v10  ;;  %v3009_v40 = vsub.f32 %v5399_v42, %v2997_v26 }
 0x220   : > { %v2924_v19 = vmul.f32 %v5201_v13, %v5571_v51  ;;  %v2999_v4 = vmul.f32 %v5253_v6, %v5571_v51  ;;  %v3000_v24 = vmul.f32 %v5253_v6, %v5574_v31  ;;  %v3223_v16 = vrot.slane %v3197_v63, 1 }
 0x221   : > { %v5593_v14 = vrot.slane %v3198_v27, 1  ;;  %v3202_v35 = vsub.f32 %v5417_v21, %v3190_v20  ;;  %v3028_v6 = vsel %vm3025_vm7, %v5376_v50, %v5484_v62  ;;  %v3493_v28 = vsub.f32 %v5477_v49, %v3481_v36 }
 0x222   : > { %v2932_v1 = vsub.f32 %v2914_v53, %v2924_v19  ;;  %v3011_v25 = vsub.f32 %v2985_v7, %v2999_v4  ;;  %v3012_v13 = vsub.f32 %v5466_v15, %v3000_v24  ;;  %v3474_v42 = vmul.f32 %v5453_v59, %v5354_v11 }
 0x223   : > { %v3488_v10 = vmul.f32 %v5473_v30, %v5311_v56  ;;  %v5611_v63 = vrot.slane %v3492_v23, 2  ;;  %v3033_v50 = vsel %vm3025_vm7, %v3031_v45, %v3032_v17  ;;  %v3302_v49 = vsub.f32 %v5430_v48, %v5559_v33  ;;  %v6223_v33 = vld [vmem:[#allocation22_spill] sm:$0xff] }
 0x224   : > { %3046 = vrot.lane.b32.xlu0 %v3028_v6, %s4016_s23  ;;  %2955 = vrot.lane.b32.xlu2 %v2932_v1, %s4017_s27  ;;  %v5609_v15 = vrot.slane %v3011_v25, 1  ;;  %v3044_v21 = vrot.slane %v3012_v13, 1  ;;  %v5616_v62 = vrot.slane %v3301_v38, 2  ;;  %v3518_v27 = vrot.slane %v3493_v28, 2 }
 0x225   : > { %v3039_v8 = vrot.slane %v3009_v40, 1  ;;  %v3225_v26 = vsel %vm3025_vm7, %v3223_v16, %v5593_v14  ;;  %v5622_v53 = vrot.slane %v3202_v35, 1  ;;  %v2984_v17 = vmul.f32 %v5266_v3, %v5354_v11 }
 0x226   : > { %v3045_v32 = vsel %vm3025_vm7, %v5609_v15, %v3044_v21  ;;  %v5629_v38 = vsel %vm3322_vm9, %v5611_v63, %v3518_v27  ;;  %v3500_v12 = vsub.f32 %v3474_v42, %v3488_v10  ;;  %v5632_v45 = vstv %s5581_s10 }
 0x227   : > { %3060 = vrot.lane.b32.xlu1 %v3045_v32, %s4016_s23  ;;  %6215 = vst [vmem:[#allocation35_spill] sm:$0xff] %v5632_v45  ;;  %v3485_v20 = vmul.f32 %v5473_v30, %v5514_v41  ;;  %v3486_v60 = vmul.f32 %v5473_v30, %v5511_v9  ;;  %v3475_v7 = vmul.f32 %v5453_v59, %v5544_v43  ;;  %v5653_v1 = vstv %s5597_s26  ;;  %v6230_v32 = vld [vmem:[#allocation29_spill] sm:$0xff] }
 0x228   : > { %v3489_v36 = vmul.f32 %v5473_v30, %v5571_v51  ;;  %v3189_v3 = vmul.f32 %v5288_v54, %v5511_v9  ;;  %v3476_v19 = vmul.f32 %v5453_v59, %v5349_v2  ;;  %v3490_v4 = vmul.f32 %v5473_v30, %v5574_v31  ;;  %6216 = vst [vmem:[#allocation36_spill] sm:$0xff] %v5653_v1 }
 0x229   : > { %v3081_v24 = vmul.f32 %v5632_v45, %v5274_v52  ;;  %v3497_v23 = vsub.f32 %v5488_v46, %v3485_v20  ;;  %v3498_v40 = vsub.f32 %v5496_v5, %v3486_v60  ;;  %v3010_v25 = vsub.f32 %v2984_v17, %v5502_v34  ;;  %v6217_v20 = vld [vmem:[#allocation14_spill] sm:$0xff] }
 0x22a   : > { %v3501_v16 = vsub.f32 %v3475_v7, %v3489_v36  ;;  %v3502_v13 = vsub.f32 %v3476_v19, %v3490_v4  ;;  %v3530_v35 = vrot.slane %v3500_v12, 2  ;;  %v5658_v6 = vmul.f32 %v5505_v61, %v5544_v43  ;;  %v6218_v7 = vld [vmem:[#allocation19_spill] sm:$0xff] }
 0x22b   : > { %v3525_v28 = vrot.slane %v3497_v23, 2  ;;  %v5662_v42 = vrot.slane %v3498_v40, 2  ;;  %v5666_v5 = vmul.f32 %v5508_v29, %v5571_v51  ;;  %v3183_v34 = vmul.f32 %v5288_v54, %v5445_v55  ;;  %v6219_v23 = vld [vmem:[#allocation30_spill] sm:$0xff] }
 0x22c   : > { %3052 = vrot.lane.b32.xlu0 %v3035_v37, %s4016_s23  ;;  %3050 = vrot.lane.b32.xlu2 %v3033_v50, %s4016_s23  ;;  %v3531_v46 = vrot.slane %v3501_v16, 2  ;;  %v3184_v10 = vmul.f32 %v5288_v54, %v5448_v0  ;;  %v3201_v21 = vsub.f32 %v5340_v58, %v3189_v3  ;;  %v3533_v27 = vrot.slane %v3502_v13, 2  ;;  %v6220_v16 = vld [vmem:[#allocation32_spill] sm:$0xff] }
 0x22d   : > { %v5675_v37 = vsel %vm3322_vm9, %v3525_v28, %v5662_v42  ;;  %v3095_v17 = vmul.f32 %v5653_v1, %v5445_v55  ;;  %v3082_v58 = vmul.f32 %v5632_v45, %v5277_v47  ;;  %v3087_v60 = vmul.f32 %v5632_v45, %v6217_v20 }
 0x22e   : > { %v5678_v50 = vsel %vm3322_vm9, %v3530_v35, %v3531_v46  ;;  %v5686_v12 = vsel %vm3322_vm9, %v3531_v46, %v3533_v27  ;;  %v3086_v36 = vmul.f32 %v5632_v45, %v6218_v7  ;;  %v3041_v3 = vrot.slane %v3010_v25, 1 }
 0x22f   : > { %3242 = vrot.lane.b32.xlu1 %v3225_v26, %s4017_s27  ;;  %v3107_v19 = vsub.f32 %v3081_v24, %v3095_v17  ;;  %v3096_v4 = vmul.f32 %v5653_v1, %v5448_v0  ;;  %v3101_v26 = vmul.f32 %v5653_v1, %v5511_v9  ;;  %v3195_v40 = vsub.f32 %v6219_v23, %v3183_v34 }
 0x230   : > { %v3196_v13 = vsub.f32 %v6220_v16, %v3184_v10  ;;  %v3100_v35 = vmul.f32 %v5653_v1, %v5514_v41  ;;  %v3090_v28 = vmul.f32 %v5632_v45, %v5544_v43  ;;  %v5708_v24 = vrot.slane %v3201_v21, 1 }
 0x231   : > { %v5710_v25 = vrot.slane %v3107_v19, 1  ;;  %v3108_v46 = vsub.f32 %v3082_v58, %v3096_v4  ;;  %v3113_v27 = vsub.f32 %v3087_v60, %v3101_v26  ;;  %v3043_v17 = vsel %vm3025_vm7, %v3041_v3, %v5609_v15 }
 0x232   : > { %v3040_v34 = vsel %vm3025_vm7, %v5551_v18, %v3039_v8  ;;  %v3112_v10 = vsub.f32 %v3086_v36, %v3100_v35  ;;  %v3104_v23 = vmul.f32 %v5653_v1, %v5571_v51  ;;  %v3188_v21 = vmul.f32 %v5288_v54, %v5514_v41 }
 0x233   : > { %6221 = vst [vmem:[#allocation14_spill] sm:$0xff] %v5710_v25  ;;  %v5725_v58 = vrot.slane %v3302_v49, 2  ;;  %v3133_v15 = vrot.slane %v3108_v46, 1  ;;  %v5727_v60 = vrot.slane %v3113_v27, 1  ;;  %v3091_v8 = vmul.f32 %v5632_v45, %v5349_v2 }
 0x234   : > { %3058 = vrot.lane.b32.xlu0 %v3043_v17, %s4016_s23  ;;  %3056 = vrot.lane.b32.xlu2 %v3040_v34, %s4016_s23  ;;  %v3140_v18 = vrot.slane %v3112_v10, 1  ;;  %v3105_v36 = vmul.f32 %v5653_v1, %v5574_v31  ;;  %v3116_v3 = vsub.f32 %v3090_v28, %v3104_v23  ;;  %v3219_v19 = vrot.slane %v3195_v40, 1 }
 0x235   : > { %6222 = vst [vmem:[#allocation19_spill] sm:$0xff] %v5727_v60  ;;  %v3232_v48 = vsel %vm3025_vm7, %v5708_v24, %v5622_v53  ;;  %v3179_v49 = vmul.f32 %v6223_v33, %v5349_v2  ;;  %v5740_v4 = vsel %vm3025_vm7, %v5710_v25, %v3133_v15  ;;  %v3221_v26 = vrot.slane %v3196_v13, 1  ;;  %v6226_v13 = vld [vmem:[#allocation25_spill] sm:$0xff] }
 0x236   : > { %6224 = vst [vmem:[#allocation30_spill] sm:$0xff] %v5740_v4  ;;  %v5745_v16 = vsel %vm3025_vm7, %v3140_v18, %v5727_v60  ;;  %v3117_v40 = vsub.f32 %v3091_v8, %v3105_v36  ;;  %v3146_v35 = vrot.slane %v3116_v3, 1  ;;  %v3330_v53 = vsel %vm3322_vm9, %v5616_v62, %v5725_v58  ;;  %v6227_v36 = vld [vmem:[#allocation31_spill] sm:$0xff] }
 0x237   : > { %3248 = vrot.lane.b32.xlu1 %v3232_v48, %s4017_s27  ;;  %6225 = vst [vmem:[#allocation32_spill] sm:$0xff] %v5745_v16  ;;  %v3287_v28 = vmul.f32 %v5331_v39, %v5445_v55  ;;  %v3178_v46 = vmul.f32 %v6223_v33, %v5544_v43  ;;  %v5755_v27 = vstv %s5698_s6  ;;  %v3200_v17 = vsub.f32 %v6226_v13, %v3188_v21  ;;  %v6229_v13 = vld [vmem:[#allocation28_spill] sm:$0xff] }
 0x238   : > { %v3192_v34 = vmul.f32 %v5288_v54, %v5571_v51  ;;  %v3148_v10 = vrot.slane %v3117_v40, 1  ;;  %v5761_v23 = vstv %s5706_s17  ;;  %v3193_v15 = vmul.f32 %v5288_v54, %v5574_v31 }
 0x239   : > { %v3089_v62 = vmul.f32 %v5632_v45, %v5354_v11  ;;  %v3103_v18 = vmul.f32 %v5653_v1, %v5311_v56  ;;  %v3398_v8 = vmul.f32 %v5761_v23, %v5511_v9  ;;  %v3222_v21 = vsel %vm3025_vm7, %v3219_v19, %v3221_v26  ;;  %v6233_v1 = vld [vmem:[#allocation34_spill] sm:$0xff] }
 0x23a   : > { %v3220_v3 = vsel %vm3025_vm7, %v6227_v36, %v3219_v19  ;;  %v5775_v48 = vsel %vm3025_vm7, %v3146_v35, %v3148_v10  ;;  %v3384_v40 = vmul.f32 %v5755_v27, %v6217_v20  ;;  %v6231_v25 = vsub.f32 %v6229_v13, %v6230_v32 }
 0x23b   : > { %6228 = vst [vmem:[#allocation22_spill] sm:$0xff] %v5775_v48  ;;  %v3288_v26 = vmul.f32 %v5331_v39, %v5448_v0  ;;  %v3378_v19 = vmul.f32 %v5755_v27, %v5274_v52  ;;  %v3392_v10 = vmul.f32 %v5761_v23, %v5445_v55  ;;  %v3228_v36 = vrot.slane %v3200_v17, 1 }
 0x23c   : > { %3240 = vrot.lane.b32.xlu0 %v3222_v21, %s4017_s27  ;;  %3238 = vrot.lane.b32.xlu2 %v3220_v3, %s4017_s27  ;;  %v3226_v16 = vrot.slane %v6231_v25, 1  ;;  %v3410_v48 = vsub.f32 %v3384_v40, %v3398_v8  ;;  %v3379_v21 = vmul.f32 %v5755_v27, %v5277_v47  ;;  %v3393_v3 = vmul.f32 %v5761_v23, %v5448_v0  ;;  %v6232_v47 = vld [vmem:[#allocation33_spill] sm:$0xff] }
 0x23d   : > { %v3204_v60 = vsub.f32 %v3178_v46, %v3192_v34  ;;  %v3205_v32 = vsub.f32 %v3179_v49, %v3193_v15  ;;  %v3115_v25 = vsub.f32 %v3089_v62, %v3103_v18  ;;  %v3404_v13 = vsub.f32 %v3378_v19, %v3392_v10 }
 0x23e   : > { %v3227_v4 = vsel %vm3025_vm7, %v5593_v14, %v3226_v16  ;;  %v3405_v45 = vsub.f32 %v3379_v21, %v3393_v3  ;;  %v3383_v17 = vmul.f32 %v5755_v27, %v6218_v7  ;;  %v3397_v8 = vmul.f32 %v5761_v23, %v5514_v41 }
 0x23f   : > { %3347 = vrot.lane.b32.xlu1 %v3330_v53, %s4016_s23  ;;  %v3299_v40 = vsub.f32 %v6232_v47, %v3287_v28  ;;  %v3300_v0 = vsub.f32 %v6233_v1, %v3288_v26  ;;  %v3295_v49 = vmul.f32 %v5331_v39, %v5311_v56  ;;  %v5805_v46 = vrot.slane %v3404_v13, 2  ;;  %v6236_v47 = vld [vmem:[#allocation26_spill] sm:$0xff] }
 0x240   : > { %v3230_v14 = vsel %vm3025_vm7, %v3228_v36, %v5708_v24  ;;  %v5809_v16 = vrot.slane %v3410_v48, 2  ;;  %v3430_v53 = vrot.slane %v3405_v45, 2  ;;  %v3409_v34 = vsub.f32 %v3383_v17, %v3397_v8  ;;  %v6235_v45 = vld [vmem:[#allocation23_spill] sm:$0xff] }
 0x241   : > { %v3234_v15 = vrot.slane %v3204_v60, 1  ;;  %v3236_v62 = vrot.slane %v3205_v32, 1  ;;  %v3296_v18 = vmul.f32 %v5331_v39, %v5571_v51  ;;  %v3145_v28 = vrot.slane %v3115_v25, 1 }
 0x242   : > { %6234 = vst [vmem:[#allocation25_spill] sm:$0xff] %v5809_v16  ;;  %v5815_v1 = vsel %vm3322_vm9, %v5805_v46, %v3430_v53  ;;  %v3437_v26 = vrot.slane %v3409_v34, 2  ;;  %v3386_v19 = vmul.f32 %v5755_v27, %v5354_v11  ;;  %v3400_v24 = vmul.f32 %v5761_v23, %v5311_v56  ;;  %v6239_v53 = vld [vmem:[#allocation21_spill] sm:$0xff] }
 0x243   : > { %v3281_v60 = vmul.f32 %v6235_v45, %v5354_v11  ;;  %v3282_v48 = vmul.f32 %v6235_v45, %v5544_v43  ;;  %v5828_v10 = vsel %vm3025_vm7, %v3145_v28, %v3146_v35  ;;  %v3324_v36 = vrot.slane %v3299_v40, 2  ;;  %v6237_v40 = vld [vmem:[#allocation27_spill] sm:$0xff] }
 0x244   : > { %3246 = vrot.lane.b32.xlu0 %v3230_v14, %s4017_s27  ;;  %3244 = vrot.lane.b32.xlu2 %v3227_v4, %s4017_s27  ;;  %v5832_v21 = vsel %vm3322_vm9, %v3437_v26, %v5809_v16  ;;  %v3326_v3 = vrot.slane %v3300_v0, 2  ;;  %v3237_v32 = vsel %vm3025_vm7, %v3234_v15, %v3236_v62  ;;  %v3387_v4 = vmul.f32 %v5755_v27, %v5544_v43  ;;  %v6240_v43 = vld [vmem:[#allocation24_spill] sm:$0xff] }
 0x245   : > { %v3308_v25 = vsub.f32 %v3282_v48, %v3296_v18  ;;  %v3388_v13 = vmul.f32 %v5755_v27, %v5349_v2  ;;  %v3401_v35 = vmul.f32 %v5761_v23, %v5571_v51  ;;  %v3402_v17 = vmul.f32 %v5761_v23, %v5574_v31 }
 0x246   : > { %v3412_v8 = vsub.f32 %v3386_v19, %v3400_v24  ;;  %v6238_v0 = vsub.f32 %v6236_v47, %v6237_v40  ;;  %v3277_v34 = vmul.f32 %v6235_v45, %v6239_v53  ;;  %v3291_v62 = vmul.f32 %v5331_v39, %v6240_v43 }
 0x247   : > { %3252 = vrot.lane.b32.xlu1 %v3237_v32, %s4017_s27  ;;  %v3307_v18 = vsub.f32 %v3281_v60, %v3295_v49  ;;  %v3177_v28 = vmul.f32 %v6223_v33, %v5354_v11  ;;  %v3191_v51 = vmul.f32 %v5288_v54, %v5311_v56  ;;  %v3413_v26 = vsub.f32 %v3387_v4, %v3401_v35 }
 0x248   : > { %v3323_v14 = vrot.slane %v6238_v0, 2  ;;  %v3414_v48 = vsub.f32 %v3388_v13, %v3402_v17  ;;  %v3327_v19 = vsel %vm3322_vm9, %v3324_v36, %v3326_v3  ;;  %v3339_v24 = vrot.slane %v3308_v25, 2 }
 0x249   : > { %v3443_v47 = vrot.slane %v3413_v26, 2  ;;  %v3442_v0 = vrot.slane %v3412_v8, 2  ;;  %v3303_v49 = vsub.f32 %v3277_v34, %v3291_v62  ;;  %v3338_v60 = vrot.slane %v3307_v18, 2  ;;  %v6241_v8 = vld [vmem:[#allocation20_spill] sm:$0xff] }
 0x24a   : > { %v3325_v32 = vsel %vm3322_vm9, %v3323_v14, %v3324_v36  ;;  %v3445_v40 = vrot.slane %v3414_v48, 2  ;;  %v3203_v33 = vsub.f32 %v3177_v28, %v3191_v51  ;;  %v3293_v36 = vmul.f32 %v5331_v39, %v5511_v9 }
 0x24b   : > { %v5863_v54 = vsel %vm3322_vm9, %v3442_v0, %v3443_v47  ;;  %v3340_v3 = vsel %vm3322_vm9, %v3338_v60, %v3339_v24  ;;  %v3294_v25 = vmul.f32 %v5331_v39, %v5529_v22  ;;  %v3292_v4 = vmul.f32 %v5331_v39, %v5514_v41 }
 0x24c   : > { %3345 = vrot.lane.b32.xlu0 %v3327_v19, %s4016_s23  ;;  %3343 = vrot.lane.b32.xlu2 %v3325_v32, %s4016_s23  ;;  %v5860_v16 = vsel %vm3322_vm9, %v3443_v47, %v3445_v40  ;;  %v3331_v13 = vrot.slane %v3303_v49, 2  ;;  %v3233_v35 = vrot.slane %v3203_v33, 1  ;;  %v3279_v17 = vmul.f32 %v6235_v45, %v6217_v20  ;;  %v6242_v40 = vld [vmem:[#allocation15_spill] sm:$0xff] }
 0x24d   : > { %v3280_v14 = vmul.f32 %v6235_v45, %v6241_v8  ;;  %v3278_v34 = vmul.f32 %v6235_v45, %v6218_v7  ;;  %v3297_v47 = vmul.f32 %v5331_v39, %v5574_v31  ;;  %v3283_v49 = vmul.f32 %v6235_v45, %v5349_v2  ;;  %v6244_v45 = vld [vmem:[#allocation17_spill] sm:$0xff] }
 0x24e   : > { %v3332_v62 = vsel %vm3322_vm9, %v5725_v58, %v3331_v13  ;;  %v3235_v18 = vsel %vm3025_vm7, %v3233_v35, %v3234_v15  ;;  %v3305_v28 = vsub.f32 %v3279_v17, %v3293_v36  ;;  %v3465_v58 = vmul.f32 %v5453_v59, %v6242_v40  ;;  %v6243_v15 = vld [vmem:[#allocation16_spill] sm:$0xff] }
 0x24f   : > { %3355 = vrot.lane.b32.xlu1 %v3340_v3, %s4016_s23  ;;  %v3306_v51 = vsub.f32 %v3280_v14, %v3294_v25  ;;  %v3304_v26 = vsub.f32 %v3278_v34, %v3292_v4  ;;  %v3479_v0 = vmul.f32 %v5473_v30, %v6243_v15  ;;  %v3309_v3 = vsub.f32 %v3283_v49, %v3297_v47  ;;  %v6245_v4 = vld [vmem:[#allocation18_spill] sm:$0xff] }
 0x250   : > { %v3334_v48 = vrot.slane %v3305_v28, 2  ;;  %v3483_v31 = vmul.f32 %v5473_v30, %v5231_v44  ;;  %v3482_v2 = vmul.f32 %v5473_v30, %v5234_v57  ;;  %v3468_v36 = vmul.f32 %v5453_v59, %v6244_v45 }
 0x251   : > { %v3336_v19 = vrot.slane %v3306_v51, 2  ;;  %v3333_v32 = vrot.slane %v3304_v26, 2  ;;  %v3341_v39 = vrot.slane %v3309_v3, 2  ;;  %v3469_v13 = vmul.f32 %v5453_v59, %v6245_v4 }
 0x252   : > { %v3470_v35 = vmul.f32 %v5453_v59, %v6239_v53  ;;  %v3484_v17 = vmul.f32 %v5473_v30, %v6240_v43  ;;  %v3487_v26 = vmul.f32 %v5473_v30, %v5529_v22  ;;  %v2880_v47 = vmul.f32 %v5505_v61, %v5274_v52  ;;  %v2942_v30 = vpop.permute.xlu1 %2941 }
 0x253   : > { %v3337_v60 = vsel %vm3322_vm9, %v3334_v48, %v3336_v19  ;;  %v3335_v33 = vsel %vm3322_vm9, %v3333_v32, %v3334_v48  ;;  %v3342_v14 = vsel %vm3322_vm9, %v3339_v24, %v3341_v39  ;;  %v3495_v34 = vsub.f32 %v3469_v13, %v3483_v31 }
 0x254   : > { %3250 = vrot.lane.b32.xlu0 %v3235_v18, %s4017_s27  ;;  %3349 = vrot.lane.b32.xlu2 %v3332_v62, %s4016_s23  ;;  %v3494_v62 = vsub.f32 %v3468_v36, %v3482_v2  ;;  %v3496_v18 = vsub.f32 %v3470_v35, %v3484_v17  ;;  %v3473_v24 = vmul.f32 %v5453_v59, %v6241_v8 }
 0x255   : > { %v3521_v28 = vrot.slane %v3495_v34, 2  ;;  %v2893_v59 = vmul.f32 %v5508_v29, %v5514_v41  ;;  %v2895_v31 = vmul.f32 %v5508_v29, %v5311_v56  ;;  %v2885_v41 = vmul.f32 %v5505_v61, %v5354_v11  ;;  %v6247_v11 = vld [vmem:[#allocation36_spill] sm:$0xff] }
 0x256   : > { %v3520_v51 = vrot.slane %v3494_v62, 2  ;;  %v3523_v48 = vrot.slane %v3496_v18, 2  ;;  %v2881_v13 = vmul.f32 %v5505_v61, %v6244_v45  ;;  %v3102_v34 = vmul.f32 %v6247_v11, %v5529_v22  ;;  %v6248_v18 = vld [vmem:[#allocation35_spill] sm:$0xff] }
 0x257   : > { %3537 = vrot.lane.b32.xlu1 %v5629_v38, %s4017_s27  ;;  %v3491_v38 = vsub.f32 %v3465_v58, %v3479_v0  ;;  %v3499_v58 = vsub.f32 %v3473_v24, %v3487_v26 }
 0x258   : > { %v3524_v19 = vsel %vm3322_vm9, %v3521_v28, %v3523_v48  ;;  %v3522_v32 = vsel %vm3322_vm9, %v3520_v51, %v3521_v28  ;;  %v3088_v28 = vmul.f32 %v6248_v18, %v6241_v8  ;;  %v2884_v48 = vmul.f32 %v5505_v61, %v6217_v20 }
 0x259   : > { %v3515_v25 = vrot.slane %v3491_v38, 2 }
 0x25a   : > { %v3114_v26 = vsub.f32 %v3088_v28, %v3102_v34 }
 0x25c   : > { %3353 = vrot.lane.b32.xlu0 %v3337_v60, %s4016_s23  ;;  %3351 = vrot.lane.b32.xlu2 %v3335_v33, %s4016_s23  ;;  %v2883_v33 = vmul.f32 %v5505_v61, %v6218_v7  ;;  %v2903_v7 = vsub.f32 %v2885_v41, %v2895_v31 }
 0x25e   : > { %v5940_v52 = vpop.permute.xlu1 %2947  ;;  %v2901_v3 = vsub.f32 %v2883_v33, %v2893_v59  ;;  %v2946_v17 = vpop.permute.xlu0 %2945 }
 0x25f   : > { %3543 = vrot.lane.b32.xlu1 %v5675_v37, %s4017_s27  ;;  %v3517_v37 = vsel %vm3322_vm9, %v3515_v25, %v5611_v63  ;;  %v2890_v63 = vmul.f32 %v5508_v29, %v5445_v55  ;;  %v3528_v55 = vrot.slane %v3499_v58, 2  ;;  %v3143_v58 = vrot.slane %v3114_v26, 1 }
 0x261   : > { %v3529_v60 = vsel %vm3322_vm9, %v5662_v42, %v3528_v55  ;;  %v2891_v42 = vmul.f32 %v5508_v29, %v5234_v57 }
 0x264   : > { %3535 = vrot.lane.b32.xlu0 %v3517_v37, %s4017_s27  ;;  %3357 = vrot.lane.b32.xlu2 %v3342_v14, %s4016_s23  ;;  %v2899_v37 = vsub.f32 %v2881_v13, %v2891_v42  ;;  %s3716_s23 = sshll.u32 %s4148_s0, 4 }
 0x265   : > { %s217_s19 = scalar_lea.vmem [#allocation9], %s3716_s23 }
 0x266   : > { %v2967_v56 = vmul.f32 %v2946_v17, %v2899_v37  ;;  %v6252_v37 = vld [vmem:[#allocation14_spill] sm:$0xff]  ;;  %s3606_s4 = sshll.u32 %s217_s19, 4  ;;  %s3607_s4 = int_to_ptr.vmem [resolvable:$true] %s3606_s4 }
 0x267   : > { %3549 = vrot.lane.b32.xlu1 %v5686_v12, %s4017_s27  ;;  %v2898_v12 = vsub.f32 %v2880_v47, %v2890_v63  ;;  %v3094_v47 = vmul.f32 %v6247_v11, %v6243_v15 }
 0x26c   : > { %3541 = vrot.lane.b32.xlu0 %v3524_v19, %s4017_s27  ;;  %3539 = vrot.lane.b32.xlu2 %v3522_v32, %s4017_s27  ;;  %v3080_v32 = vmul.f32 %v6248_v18, %v6242_v40 }
 0x26e   : > { %v2944_v0 = vpop.permute.xlu2 %2943 }
 0x26f   : > { %v2966_v49 = vmul.f32 %v2944_v0, %v2898_v12  ;;  %v2889_v12 = vmul.f32 %v5508_v29, %v6243_v15 }
 0x274   : > { %3547 = vrot.lane.b32.xlu0 %v5678_v50, %s4017_s27  ;;  %3545 = vrot.lane.b32.xlu2 %v3529_v60, %s4017_s27  ;;  %v6246_v50 = vsub.f32 %v5658_v6, %v5666_v5  ;;  %v2894_v6 = vmul.f32 %v5508_v29, %v5511_v9  ;;  %v2879_v9 = vmul.f32 %v5505_v61, %v6242_v40 }
 0x275   : > { %v3106_v60 = vsub.f32 %v3080_v32, %v3094_v47 }
 0x276   : > { %v2950_v38 = vpop.permute.xlu2 %2949  ;;  %v2902_v63 = vsub.f32 %v2884_v48, %v2894_v6  ;;  %v2897_v31 = vsub.f32 %v2879_v9, %v2889_v12 }
 0x277   : > { %v2969_v39 = vmul.f32 %v2950_v38, %v2901_v3  ;;  %v6250_v3 = vld [vmem:[#allocation19_spill] sm:$0xff] }
 0x278   : > { %v3144_v38 = vsel %vm3025_vm7, %v6250_v3, %v3143_v58  ;;  %v2965_v42 = vmul.f32 %v2942_v30, %v2897_v31  ;;  %v3098_v31 = vmul.f32 %v6247_v11, %v5231_v44 }
 0x27e   : > { %v2956_v2 = vpop.permute.xlu2 %2955  ;;  %v2954_v36 = vpop.permute.xlu1 %2953 }
 0x27f   : > { %v2972_v25 = vmul.f32 %v2956_v2, %v6246_v50  ;;  %v2971_v35 = vmul.f32 %v2954_v36, %v2903_v7  ;;  %v3130_v2 = vrot.slane %v3106_v60, 1  ;;  %v6251_v50 = vld [vmem:[#allocation32_spill] sm:$0xff] }
 0x286   : > { %v3051_v14 = vpop.permute.xlu2 %3050 }
 0x287   : > { %v5955_v62 = vmul.f32 %v3051_v14, %v2967_v56  ;;  %v3132_v56 = vsel %vm3025_vm7, %v3130_v2, %v6252_v37 }
 0x289   : > { %v3049_v5 = vpop.permute.xlu1 %3048 }
 0x28a   : > { %v3071_v51 = vmul.f32 %v3049_v5, %v2966_v49  ;;  %v6249_v49 = vld [vmem:[#allocation30_spill] sm:$0xff] }
 0x28b   : > { %v6253_v5 = vld [vmem:[#allocation22_spill] sm:$0xff] }
 0x28c   : > { %v3159_v55 = vmul.f32 %v6249_v49, %v3071_v51 }
 0x28e   : > { %v3057_v24 = vpop.permute.xlu2 %3056  ;;  %v2952_v19 = vpop.permute.xlu0 %2951 }
 0x28f   : > { %v2970_v0 = vmul.f32 %v2952_v19, %v2902_v63  ;;  %v3391_v19 = vmul.f32 %v5761_v23, %v6243_v15 }
 0x291   : > { %v3075_v20 = vmul.f32 %v3057_v24, %v2970_v0  ;;  %v3055_v59 = vpop.permute.xlu1 %3054  ;;  %v3377_v24 = vmul.f32 %v5755_v27, %v6242_v40 }
 0x292   : > { %v3074_v33 = vmul.f32 %v3055_v59, %v2969_v39 }
 0x293   : > { %v5974_v41 = vmul.f32 %v3144_v38, %v3075_v20  ;;  %v3403_v47 = vsub.f32 %v3377_v24, %v3391_v19  ;;  %v3381_v19 = vmul.f32 %v5755_v27, %v6245_v4 }
 0x294   : > { %v3162_v13 = vmul.f32 %v6251_v50, %v3074_v33 }
 0x295   : > { %v3427_v49 = vrot.slane %v3403_v47, 2 }
 0x296   : > { %v3239_v7 = vpop.permute.xlu2 %3238  ;;  %v3047_v36 = vpop.permute.xlu0 %3046 }
 0x297   : > { %v3070_v17 = vmul.f32 %v3047_v36, %v2965_v42 }
 0x299   : > { %v3158_v14 = vmul.f32 %v3132_v56, %v3070_v17  ;;  %v3061_v34 = vpop.permute.xlu1 %3060 }
 0x29a   : > { %v3077_v28 = vmul.f32 %v3061_v34, %v2972_v25  ;;  %v3399_v34 = vmul.f32 %v5761_v23, %v5529_v22  ;;  %v3099_v22 = vmul.f32 %v6247_v11, %v6240_v43 }
 0x29b   : > { %v3262_v58 = vmul.f32 %v3239_v7, %v3158_v14  ;;  %v3097_v7 = vmul.f32 %v6247_v11, %v5234_v57 }
 0x29c   : > { %v3165_v51 = vmul.f32 %v6253_v5, %v3077_v28 }
 0x29e   : > { %v5979_v39 = vpop.permute.xlu2 %3244  ;;  %v5981_v6 = vpop.permute.xlu0 %3052 }
 0x2a1   : > { %v5984_v26 = vpop.permute.xlu1 %3242 }
 0x2a6   : > { %v3344_v30 = vpop.permute.xlu2 %3343  ;;  %v3059_v48 = vpop.permute.xlu0 %3058 }
 0x2a7   : > { %v3076_v63 = vmul.f32 %v3059_v48, %v2971_v35  ;;  %v3367_v0 = vmul.f32 %v3344_v30, %v3262_v58  ;;  %v3429_v35 = vsel %vm3322_vm9, %v3427_v49, %v5805_v46  ;;  %v3084_v46 = vmul.f32 %v6248_v18, %v6245_v4 }
 0x2a8   : > { %v3395_v30 = vmul.f32 %v5761_v23, %v5231_v44 }
 0x2a9   : > { %v3249_v32 = vpop.permute.xlu1 %3248  ;;  %v3164_v25 = vmul.f32 %v5828_v10, %v3076_v63  ;;  %v5995_v59 = vmul.f32 %v3429_v35, %v3367_v0  ;;  %v3110_v37 = vsub.f32 %v3084_v46, %v3098_v31  ;;  %v2892_v63 = vmul.f32 %v5508_v29, %v5231_v44 }
 0x2ab   : > { %v3136_v28 = vrot.slane %v3110_v37, 1 }
 0x2ae   : > { %v5991_v12 = vpop.permute.xlu2 %3349  ;;  %v3241_v9 = vpop.permute.xlu0 %3240 }
 0x2af   : > { %v3263_v42 = vmul.f32 %v3241_v9, %v3159_v55 }
 0x2b1   : > { %v3348_v20 = vpop.permute.xlu1 %3347 }
 0x2b6   : > { %v3352_v40 = vpop.permute.xlu2 %3351  ;;  %v3247_v60 = vpop.permute.xlu0 %3246 }
 0x2b7   : > { %v3266_v33 = vmul.f32 %v3247_v60, %v3162_v13  ;;  %v3083_v13 = vmul.f32 %v6248_v18, %v6244_v45  ;;  %v3267_v60 = vmul.f32 %v3249_v32, %v5974_v41  ;;  %v3382_v41 = vmul.f32 %v5755_v27, %v6239_v53 }
 0x2b8   : > { %v3396_v32 = vmul.f32 %v5761_v23, %v6240_v43 }
 0x2b9   : > { %v3371_v15 = vmul.f32 %v3352_v40, %v3266_v33  ;;  %v3253_v3 = vpop.permute.xlu1 %3252  ;;  %v3109_v14 = vsub.f32 %v3083_v13, %v3097_v7 }
 0x2ba   : > { %v3269_v38 = vmul.f32 %v3253_v3, %v3165_v51  ;;  %v3394_v51 = vmul.f32 %v5761_v23, %v5234_v57  ;;  %v3380_v57 = vmul.f32 %v5755_v27, %v6244_v45 }
 0x2bb   : > { %v3459_v10 = vmul.f32 %v5832_v21, %v3371_v15  ;;  %v3135_v5 = vrot.slane %v3109_v14, 1 }
 0x2bc   : > { %v3406_v29 = vsub.f32 %v3380_v57, %v3394_v51 }
 0x2bd   : > { %v3137_v44 = vsel %vm3025_vm7, %v3135_v5, %v3136_v28 }
 0x2be   : > { %v3358_v2 = vpop.permute.xlu2 %3357  ;;  %v3346_v36 = vpop.permute.xlu0 %3345  ;;  %v3160_v0 = vmul.f32 %v3137_v44, %v5955_v62 }
 0x2bf   : > { %v3368_v50 = vmul.f32 %v3346_v36, %v3263_v42  ;;  %v3374_v17 = vmul.f32 %v3358_v2, %v3269_v38  ;;  %v6254_v42 = vld [vmem:[#allocation25_spill] sm:$0xff] }
 0x2c0   : > { %v3264_v40 = vmul.f32 %v5984_v26, %v3160_v0 }
 0x2c1   : > { %v3356_v56 = vpop.permute.xlu1 %3355  ;;  %v6007_v21 = vmul.f32 %v5815_v1, %v3368_v50  ;;  %v6010_v55 = vmul.f32 %v5860_v16, %v3374_v17  ;;  %v3385_v1 = vmul.f32 %v5755_v27, %v6241_v8  ;;  %v3085_v16 = vmul.f32 %v6248_v18, %v6239_v53 }
 0x2c2   : > { %v2882_v8 = vmul.f32 %v5505_v61, %v6245_v4  ;;  %v3407_v18 = vsub.f32 %v3381_v19, %v3395_v30  ;;  %v3432_v61 = vrot.slane %v3406_v29, 2  ;;  %v3369_v3 = vmul.f32 %v3348_v20, %v3264_v40 }
 0x2c3   : > { %v3411_v47 = vsub.f32 %v3385_v1, %v3399_v34  ;;  %v3111_v49 = vsub.f32 %v3085_v16, %v3099_v22  ;;  %v3408_v17 = vsub.f32 %v3382_v41, %v3396_v32 }
 0x2c4   : > { %v3433_v4 = vrot.slane %v3407_v18, 2 }
 0x2c5   : > { %v3440_v45 = vrot.slane %v3411_v47, 2  ;;  %v3138_v31 = vrot.slane %v3111_v49, 1  ;;  %v3435_v43 = vrot.slane %v3408_v17, 2 }
 0x2c6   : > { %v3251_v48 = vpop.permute.xlu0 %3250  ;;  %v3540_v2 = vpop.permute.xlu2 %3539 }
 0x2c7   : > { %v3268_v24 = vmul.f32 %v3251_v48, %v3164_v25  ;;  %v2900_v25 = vsub.f32 %v2882_v8, %v2892_v63  ;;  %v3441_v62 = vsel %vm3322_vm9, %v6254_v42, %v3440_v45  ;;  %v3139_v7 = vsel %vm3025_vm7, %v3136_v28, %v3138_v31 }
 0x2c9   : > { %v3373_v58 = vmul.f32 %v3356_v56, %v3268_v24  ;;  %v3538_v9 = vpop.permute.xlu1 %3537  ;;  %v2968_v35 = vmul.f32 %v5940_v52, %v2900_v25  ;;  %v3434_v52 = vsel %vm3322_vm9, %v3432_v61, %v3433_v4 }
 0x2ca   : > { %v3457_v20 = vmul.f32 %v3434_v52, %v3369_v3  ;;  %v3560_v5 = vmul.f32 %v3538_v9, %v6007_v21 }
 0x2cb   : > { %v3461_v11 = vmul.f32 %v5863_v54, %v3373_v58  ;;  %v3073_v15 = vmul.f32 %v5981_v6, %v2968_v35 }
 0x2cc   : > { %v3561_v36 = vmul.f32 %v3540_v2, %v3457_v20  ;;  %v3575_v1 = vsel %vm3567_vm0, %v3560_v5, 0.0 }
 0x2cd   : > { %v3161_v6 = vmul.f32 %v3139_v7, %v3073_v15 }
 0x2ce   : > { %v3354_v33 = vpop.permute.xlu0 %3353  ;;  %v3569_v14 = vsel %vm3567_vm0, %v3561_v36, 0.0 }
 0x2cf   : > { %v3372_v38 = vmul.f32 %v3354_v33, %v3267_v60  ;;  %v3265_v13 = vmul.f32 %v5979_v39, %v3161_v6  ;;  %v3546_v39 = vpop.permute.xlu2 %3545 }
 0x2d1   : > { %v3460_v54 = vmul.f32 %v3441_v62, %v3372_v38  ;;  %v3544_v26 = vpop.permute.xlu1 %3543  ;;  %v3370_v56 = vmul.f32 %v5991_v12, %v3265_v13 }
 0x2d2   : > { %v3563_v46 = vmul.f32 %v3544_v26, %v3459_v10  ;;  %v3436_v10 = vsel %vm3322_vm9, %v3433_v4, %v3435_v43 }
 0x2d3   : > { %v3458_v51 = vmul.f32 %v3436_v10, %v3370_v56 }
 0x2d4   : > { %v3571_v53 = vsel %vm3567_vm0, %v3563_v46, 0.0 }
 0x2d6   : > { %v3536_v50 = vpop.permute.xlu0 %3535 }
 0x2d7   : > { %v3559_v37 = vmul.f32 %v3536_v50, %v5995_v59  ;;  %v3564_v59 = vmul.f32 %v3546_v39, %v3460_v54 }
 0x2d9   : > { %v3568_v27 = vsel %vm3567_vm0, %v3559_v37, 0.0  ;;  %v3550_v28 = vpop.permute.xlu1 %3549  ;;  %v3578_v24 = vsel %vm3567_vm0, %v3564_v59, 0.0 }
 0x2da   : > { %v3570_v23 = vadd.f32 %v3569_v14, %v3568_v27  ;;  %v3566_v48 = vmul.f32 %v3550_v28, %v6010_v55 }
 0x2dc   : > { %v3572_v34 = vadd.f32 %v3571_v53, %v3570_v23  ;;  %v3580_v22 = vsel %vm3567_vm0, %v3566_v48, 0.0 }
 0x2de   : > { %v3542_v30 = vpop.permute.xlu0 %3541 }
 0x2df   : > { %v3562_v12 = vmul.f32 %v3542_v30, %v3458_v51 }
 0x2e1   : > { %v3576_v63 = vsel %vm3567_vm0, %v3562_v12, 0.0 }
 0x2e2   : > { %v3577_v16 = vadd.f32 %v3576_v63, %v3575_v1 }
 0x2e4   : > { %v3579_v57 = vadd.f32 %v3578_v24, %v3577_v16 }
 0x2e6   : > { %v3581_v21 = vadd.f32 %v3580_v22, %v3579_v57  ;;  %v3548_v19 = vpop.permute.xlu0 %3547 }
 0x2e7   : > { %v3565_v47 = vmul.f32 %v3548_v19, %v3461_v11 }
 0x2e8   : > { %3586 = vrot.lane.b32.xlu0 %v3581_v21, %s4017_s27 }
 0x2e9   : > { %v3573_v8 = vsel %vm3567_vm0, %v3565_v47, 0.0 }
 0x2ea   : > { %v3574_v55 = vadd.f32 %v3573_v8, %v3572_v34 }
 0x2ec   : > { %3584 = vrot.lane.b32.xlu2 %v3574_v55, %s4017_s27  ;;  %s3945_s27 = scalar_lea.hbm %s3944_s7, 16 }
 0x2ed   : > { %p3946_p4 = scmp.ne.s32.totalorder %s3944_s7, %s3945_s27  ;;  %p3951_p7 = scmp.lt.s32.totalorder %s3949_s11, %s3945_s27 }
 0x2ef   : > { %p3947_p6 = pnand %p3946_p4, %p4092_p11  ;;  %p3952_p5 = por %p3951_p7, %p3950_p0 }
 0x2f1   : > { %p3948_p13 = pneg %p3947_p6 }
 0x2f3   : > { %p3953_p8 = pnand %p3952_p5, %p3948_p13 }
 0x346   : > { %v3585_v58 = vpop.permute.xlu2 %3584 }
 0x347   : > { %3591 = vst.msk [vmem:[%s217_s19] sm:$0xff] %vm3590_vm2, %v3585_v58 }
 0x35a   : > { %v3587_v9 = vpop.permute.xlu0 %3586 }
 0x35b   : > { %3592 = vst.msk [vmem:[%s217_s19 + $0x8] sm:$0xff] %vm3590_vm2, %v3587_v9 }
 0x35c   : > { %3956 = shalt.err (!%p3953_p8)
}
 0x35d   : > { %s4018_s0 = smov 128   ;;  %s4019_s26 = smov 8  }
 0x35e   : > { %3798 = dma.vmem_to_hbm [thread:$0]  (%p4092_p11), %s3607_s4, 256, %s3609_s29, %s3594_s5, %s4018_s0, %s4018_s0, %s4019_s26  }
 0x35f PF: > { %s3623_s6 = sand.u32 1, %s3991_s12   ;;  %p6255_p9 = scmp.ge.s32.totalorder %s4003_s15, 2 }
 0x360   : > { %s3624_s17 = scalar_lea.sflag [#allocation4], %s3623_s6 }
 0x361   : > { %p3812_p10 = pnand %p6255_p9, %p4096_p12 }
 0x363   : > { %p3813_p1 = pneg %p3812_p10 }
 0x365   : > { %3986 = dma.done.wait (%p3813_p1), %s3624_s17, 256  }
 0x366   : > { %3988 = vsyncadd (%p3813_p1), %s3624_s17, 4294967040  ;;  %p18_p2 = scmp.ge.s32.totalorder %s4065_s18, 4   ;;  %s6256_s12 = smov %s3995_s13 }
 0x367   : > { %s6257_s13 = smov %s3999_s14  ;;  %s6258_s14 = smov %s4077_s21 }
 0x368   : > { %s6259_s15 = smov %s4065_s18  ;;  %20 = sbr.rel (!%p18_p2) target bundleno = 9 (0x9), region = 86 }
 0x36d   :  { %3630 = vsyncpa [#allocation3], 1 }
 0x36e   :  { %3632 = vsyncpa [#allocation3 + $0x1], 1 }
 0x36f   :  { %3633 = vsyncpa [#allocation4], 1 }
 0x370   :  { %3635 = vsyncpa [#allocation4 + $0x1], 1 }
 0x371   :  { %3636 = vsyncpa [#allocation5], 1 }
 0x372   :  { %3638 = vsyncpa [#allocation5 + $0x1], 1 }
 0x373   :  { %3639 = vsyncpa [#allocation7], 1 }

</bundles_post_ra>
